<compile_context>
chip_gen: v6e
topology: v6e:2x2x1
jax: 0.10.0
libtpu: 0.0.40
codegen_flags: <defaults>
</compile_context>

<pallas_src>
import functools
import math

import jax
import jax.numpy as jnp
from jax.experimental import pallas as pl
from jax.experimental.pallas import tpu as pltpu


_LANES = 128                      # lane width / padded class width of the output head
_W_RESIDENT_MAX_BYTES = 4 << 20   # keep the projection weight VMEM-resident below this


def _round_up(v, m):
    return (v + m - 1) // m * m


def _pad2(a, rows, cols):
    return jnp.pad(a, ((0, rows - a.shape[0]), (0, cols - a.shape[1])))


def _pick_tile(dim):
    """Largest tile in {512, 384, 256, 128} whose padding waste stays <= ~dim/3."""
    for t in (512, 384, 256, 128):
        d_p = _round_up(dim, t)
        if d_p - dim <= dim // 3:
            return t, d_p
    return 128, _round_up(dim, 128)


def _cparams():
    return pltpu.CompilerParams(
        dimension_semantics=("parallel", "arbitrary"),
        vmem_limit_bytes=32 * 1024 * 1024,
    )


# --------------------------------------------------------------------------------------
# Kernel A: projection  [self | neigh] = h @ [W_top | W_bot]
#           bf16 MXU inputs, f32 accumulation, both halves stored straight to bf16.
# --------------------------------------------------------------------------------------
def _proj_kernel(h_ref, w_ref, self_ref, neigh_ref, acc_ref, *, tk, h_p, w_resident):
    k = pl.program_id(1)

    @pl.when(k == 0)
    def _():
        acc_ref[...] = jnp.zeros_like(acc_ref)

    if w_resident:
        ks = pl.multiple_of(k * tk, tk)
        w_blk = w_ref[pl.ds(ks, tk), :]     # weight resident; slice the K block
    else:
        w_blk = w_ref[...]                  # weight streamed per K block
    acc_ref[...] += jnp.dot(h_ref[...], w_blk, preferred_element_type=jnp.float32)

    @pl.when(k == pl.num_programs(1) - 1)
    def _():
        self_ref[...] = acc_ref[:, :h_p].astype(self_ref.dtype)
        neigh_ref[...] = acc_ref[:, h_p:].astype(neigh_ref.dtype)


def _project(h_bf, w_bf, *, tm, tk, h_p):
    n_p, k_p = h_bf.shape
    w_resident = (w_bf.size * 2) <= _W_RESIDENT_MAX_BYTES   # bf16 bytes
    w_spec = (pl.BlockSpec((k_p, 2 * h_p), lambda i, k: (0, 0)) if w_resident
              else pl.BlockSpec((tk, 2 * h_p), lambda i, k: (k, 0)))
    kern = functools.partial(_proj_kernel, tk=tk, h_p=h_p, w_resident=w_resident)
    out = jax.ShapeDtypeStruct((n_p, h_p), jnp.bfloat16)
    return pl.pallas_call(
        kern,
        out_shape=(out, out),
        grid_spec=pltpu.PrefetchScalarGridSpec(
            num_scalar_prefetch=0,
            grid=(n_p // tm, k_p // tk),
            in_specs=[
                pl.BlockSpec((tm, tk), lambda i, k: (i, k)),
                w_spec,
            ],
            out_specs=[
                pl.BlockSpec((tm, h_p), lambda i, k: (i, 0)),
                pl.BlockSpec((tm, h_p), lambda i, k: (i, 0)),
            ],
            scratch_shapes=[pltpu.VMEM((tm, 2 * h_p), jnp.float32)],
        ),
        compiler_params=_cparams(),
    )(h_bf, w_bf)


# --------------------------------------------------------------------------------------
# Kernel B: h1 = relu(self1 + adj @ neigh1), then fused layer-2 projection
#           [self2 | neigh2] = h1 @ [W2_top | W2_bot]   (h1 never leaves VMEM)
# --------------------------------------------------------------------------------------
def _agg_proj_kernel(adj_ref, neigh_ref, self_ref, w2_ref,
                     self2_ref, neigh2_ref, acc_ref, *, h_p):
    k = pl.program_id(1)

    @pl.when(k == 0)
    def _():
        acc_ref[...] = jnp.zeros_like(acc_ref)

    acc_ref[...] += jnp.dot(adj_ref[...], neigh_ref[...],
                            preferred_element_type=jnp.float32)

    @pl.when(k == pl.num_programs(1) - 1)
    def _():
        h1 = jnp.maximum(acc_ref[...] + self_ref[...].astype(jnp.float32), 0.0)
        proj2 = jnp.dot(h1.astype(jnp.bfloat16), w2_ref[...],
                        preferred_element_type=jnp.float32)
        self2_ref[...] = proj2[:, :h_p].astype(self2_ref.dtype)
        neigh2_ref[...] = proj2[:, h_p:].astype(neigh2_ref.dtype)


def _aggregate_project(adj_bf, neigh_bf, self_bf, w2_bf, *, tm, tk, h_p):
    n_p = adj_bf.shape[0]
    kern = functools.partial(_agg_proj_kernel, h_p=h_p)
    out = jax.ShapeDtypeStruct((n_p, h_p), jnp.bfloat16)
    return pl.pallas_call(
        kern,
        out_shape=(out, out),
        grid_spec=pltpu.PrefetchScalarGridSpec(
            num_scalar_prefetch=0,
            grid=(n_p // tm, n_p // tk),
            in_specs=[
                pl.BlockSpec((tm, tk), lambda i, k: (i, k)),         # adj
                pl.BlockSpec((tk, h_p), lambda i, k: (k, 0)),        # neigh1 (bf16)
                pl.BlockSpec((tm, h_p), lambda i, k: (i, 0)),        # self1  (bf16)
                pl.BlockSpec((h_p, 2 * h_p), lambda i, k: (0, 0)),   # wcat2  (resident)
            ],
            out_specs=[
                pl.BlockSpec((tm, h_p), lambda i, k: (i, 0)),
                pl.BlockSpec((tm, h_p), lambda i, k: (i, 0)),
            ],
            scratch_shapes=[pltpu.VMEM((tm, h_p), jnp.float32)],
        ),
        compiler_params=_cparams(),
    )(adj_bf, neigh_bf, self_bf, w2_bf)


# --------------------------------------------------------------------------------------
# Kernel C: h2 = relu(self2 + adj @ neigh2), linear head, masked log_softmax
#           (class lanes padded to 128, masked with -1e30 inside the softmax)
# --------------------------------------------------------------------------------------
def _agg_head_kernel(adj_ref, neigh_ref, self_ref, wlin_ref, o_ref, acc_ref, *, nclass):
    k = pl.program_id(1)

    @pl.when(k == 0)
    def _():
        acc_ref[...] = jnp.zeros_like(acc_ref)

    acc_ref[...] += jnp.dot(adj_ref[...], neigh_ref[...],
                            preferred_element_type=jnp.float32)

    @pl.when(k == pl.num_programs(1) - 1)
    def _():
        h2 = jnp.maximum(acc_ref[...] + self_ref[...].astype(jnp.float32), 0.0)
        logits = jnp.dot(h2.astype(jnp.bfloat16), wlin_ref[...],
                         preferred_element_type=jnp.float32)
        col = jax.lax.broadcasted_iota(jnp.int32, logits.shape, 1)
        logits = jnp.where(col < nclass, logits, jnp.full_like(logits, -1e30))
        m = jnp.max(logits, axis=1, keepdims=True)
        z = logits - m
        lse = jnp.log(jnp.sum(jnp.exp(z), axis=1, keepdims=True))
        o_ref[...] = z - lse


def _aggregate_head(adj_bf, neigh_bf, self_bf, wlin_bf, nclass, *, tm, tk, h_p):
    n_p = adj_bf.shape[0]
    kern = functools.partial(_agg_head_kernel, nclass=nclass)
    return pl.pallas_call(
        kern,
        out_shape=jax.ShapeDtypeStruct((n_p, _LANES), jnp.float32),
        grid_spec=pltpu.PrefetchScalarGridSpec(
            num_scalar_prefetch=0,
            grid=(n_p // tm, n_p // tk),
            in_specs=[
                pl.BlockSpec((tm, tk), lambda i, k: (i, k)),         # adj
                pl.BlockSpec((tk, h_p), lambda i, k: (k, 0)),        # neigh2 (bf16)
                pl.BlockSpec((tm, h_p), lambda i, k: (i, 0)),        # self2  (bf16)
                pl.BlockSpec((h_p, _LANES), lambda i, k: (0, 0)),    # wlin   (resident)
            ],
            out_specs=pl.BlockSpec((tm, _LANES), lambda i, k: (i, 0)),
            scratch_shapes=[pltpu.VMEM((tm, h_p), jnp.float32)],
        ),
        compiler_params=_cparams(),
    )(adj_bf, neigh_bf, self_bf, wlin_bf)


# --------------------------------------------------------------------------------------
# Full forward (eval mode): 2 GraphConvolution layers (with_relu=True, with_bias=False)
# + nn.Linear(nhid, nclass, bias=False) + log_softmax(dim=1)
# --------------------------------------------------------------------------------------
@jax.jit
def graphsage_forward(x, adj, w1, w2, wlin):
    n, nfeat = x.shape
    nhid = w1.shape[1]
    nclass = wlin.shape[1]
    assert nclass <= _LANES, "nclass > 128 would need a tiled head"

    tm, n_p = _pick_tile(n)        # node-row tile (also the aggregation contraction tile)
    tkf, f_p = _pick_tile(nfeat)   # projection contraction tile
    h_p = _round_up(nhid, _LANES)

    # ---- padding + bf16 casts (plain-JAX glue on small arrays only) ----
    x_p = _pad2(x, n_p, f_p).astype(jnp.bfloat16)
    adj_p = _pad2(adj, n_p, n_p).astype(jnp.bfloat16)

    # GraphConvolution weight (2*in, out) -> fused projection weight (in_p, 2*h_p)
    wcat1 = jnp.concatenate(
        [_pad2(w1[:nfeat], f_p, h_p), _pad2(w1[nfeat:], f_p, h_p)],
        axis=1).astype(jnp.bfloat16)
    wcat2 = jnp.concatenate(
        [_pad2(w2[:nhid], h_p, h_p), _pad2(w2[nhid:], h_p, h_p)],
        axis=1).astype(jnp.bfloat16)
    wlin_p = _pad2(wlin, h_p, _LANES).astype(jnp.bfloat16)

    # ---- layer 1 projection: [self1 | neigh1] = x @ [W1_top | W1_bot] ----
    self1, neigh1 = _project(x_p, wcat1, tm=tm, tk=tkf, h_p=h_p)

    # ---- layer 1 aggregation + ReLU + layer 2 projection (fused; h1 stays in VMEM) ----
    # (dropout between layers is identity in eval mode)
    self2, neigh2 = _aggregate_project(adj_p, neigh1, self1, wcat2,
                                       tm=tm, tk=tm, h_p=h_p)

    # ---- layer 2 aggregation + ReLU + linear head + log_softmax ----
    logp = _aggregate_head(adj_p, neigh2, self2, wlin_p, nclass,
                           tm=tm, tk=tm, h_p=h_p)

    return logp[:n, :nclass]


# --------------------------------------------------------------------------------------
# References
# --------------------------------------------------------------------------------------
def _reference_forward(x, adj, w1, w2, wlin):
    """Pure-f32 JAX reference mirroring the PyTorch forward (eval mode)."""
    def gc(h, w):
        s = adj @ h
        return jnp.concatenate([h, s], axis=1) @ w
    h = jax.nn.relu(gc(x, w1))
    h = jax.nn.relu(gc(h, w2))
    return jax.nn.log_softmax(h @ wlin, axis=1)


def _matched_reference(x, adj, w1, w2, wlin):
    """Reference mirroring the kernel numerics (bf16 MXU inputs, f32 accumulation,
    re-associated aggregation, bf16 intermediate handoffs) for a tight comparison."""
    bf = jnp.bfloat16
    nfeat = x.shape[1]
    nhid = w1.shape[1]
    adj_b = adj.astype(bf)

    def split_cat(w, d_in):
        return jnp.concatenate([w[:d_in], w[d_in:]], axis=1).astype(bf)

    def project(h_bf, wcat):
        p = jnp.dot(h_bf, wcat, preferred_element_type=jnp.float32)
        return p[:, :nhid].astype(bf), p[:, nhid:].astype(bf)

    def aggregate(self_bf, neigh_bf):
        agg = jnp.dot(adj_b, neigh_bf, preferred_element_type=jnp.float32)
        return jax.nn.relu(agg + self_bf.astype(jnp.float32))

    self1, neigh1 = project(x.astype(bf), split_cat(w1, nfeat))
    h1 = aggregate(self1, neigh1)
    self2, neigh2 = project(h1.astype(bf), split_cat(w2, nhid))
    h2 = aggregate(self2, neigh2)
    logits = jnp.dot(h2.astype(bf), wlin.astype(bf),
                     preferred_element_type=jnp.float32)
    return jax.nn.log_softmax(logits, axis=1)


if __name__ == "__main__":
    # Small Cora-like problem; deliberately not tile-aligned to exercise the padding.
    N, nfeat, nhid, nclass = 200, 300, 64, 7

    key = jax.random.PRNGKey(0)
    k_x, k_adj, k_w1, k_w2, k_lin = jax.random.split(key, 5)

    x = jax.random.normal(k_x, (N, nfeat), dtype=jnp.float32)

    # Dense symmetric adjacency with self loops, row-normalized (adj_norm surrogate).
    a = (jax.random.uniform(k_adj, (N, N)) > 0.95).astype(jnp.float32)
    a = jnp.maximum(a, a.T) + jnp.eye(N, dtype=jnp.float32)
    adj = a / jnp.sum(a, axis=1, keepdims=True)

    # GraphConvolution weights: uniform(-stdv, stdv) with stdv = 1/sqrt(out_features).
    stdv = 1.0 / math.sqrt(nhid)
    w1 = jax.random.uniform(k_w1, (nfeat * 2, nhid), minval=-stdv, maxval=stdv,
                            dtype=jnp.float32)
    w2 = jax.random.uniform(k_w2, (nhid * 2, nhid), minval=-stdv, maxval=stdv,
                            dtype=jnp.float32)
    # nn.Linear(nhid, nclass, bias=False): stored as (in, out) for x @ W.
    wlin = jax.random.uniform(k_lin, (nhid, nclass), minval=-stdv, maxval=stdv,
                              dtype=jnp.float32)

    out = graphsage_forward(x, adj, w1, w2, wlin)
    out = jax.block_until_ready(out)
    assert out.shape == (N, nclass)

    # Tight check against a numerics-matched (bf16 MXU, f32 accum) reference.
    ref_matched = _matched_reference(x, adj, w1, w2, wlin)
    err_matched = float(jnp.max(jnp.abs(out - ref_matched)))
    assert err_matched < 2e-3, f"mismatch vs matched reference: {err_matched}"

    # Loose semantic check against the pure-f32 PyTorch-equivalent forward
    # (tolerance accounts for bf16 MXU inputs and bf16 intermediate handoffs).
    ref_f32 = _reference_forward(x, adj, w1, w2, wlin)
    err_f32 = float(jnp.max(jnp.abs(out - ref_f32)))
    assert err_f32 < 8e-2, f"mismatch vs f32 reference: {err_f32}"

    # log-probabilities must exponentiate to a valid distribution.
    assert jnp.allclose(jnp.sum(jnp.exp(out), axis=1), 1.0, atol=1e-3)

    print("KERNEL_OK")
</pallas_src>

<mosaic_0001>
module attributes {stable_mosaic.version = 11 : i64} {
  func.func @_proj_kernel(%arg0: i32, %arg1: i32, %arg2: memref<256x384xbf16, #tpu.memory_space<vmem>>, %arg3: memref<384x256xbf16, #tpu.memory_space<vmem>>, %arg4: memref<256x128xbf16, #tpu.memory_space<vmem>>, %arg5: memref<256x128xbf16, #tpu.memory_space<vmem>>, %arg6: memref<256x256xf32, #tpu.memory_space<vmem>>) attributes {dimension_semantics = [#tpu.dimension_semantics<parallel>, #tpu.dimension_semantics<arbitrary>], iteration_bounds = array<i64: 1, 1>, scalar_prefetch = 0 : i64, scratch_operands = 1 : i64, tpu.core_type = #tpu.core_type<tc>, window_params = [{transform_indices = @transform_0, window_bounds = array<i64: 256, 384>}, {pipeline_mode = #tpu.pipeline_mode<synchronous>, transform_indices = @transform_1, window_bounds = array<i64: 384, 256>}, {transform_indices = @transform_2, window_bounds = array<i64: 256, 128>}, {transform_indices = @transform_3, window_bounds = array<i64: 256, 128>}]} {
    %c0_i32 = arith.constant 0 : i32
    %0 = arith.cmpi eq, %arg1, %c0_i32 : i32
    %1 = arith.extui %0 : i1 to i32
    %c0_i32_0 = arith.constant 0 : i32
    %2 = arith.cmpi ne, %1, %c0_i32_0 : i32
    scf.if %2 {
      %cst_9 = arith.constant 0.000000e+00 : f32
      %15 = vector.broadcast %cst_9 : f32 to vector<256x256xf32>
      %c0_10 = arith.constant 0 : index
      %c0_11 = arith.constant 0 : index
      %16 = vector.load %arg6[%c0_10, %c0_11] : memref<256x256xf32, #tpu.memory_space<vmem>>, vector<256x256xf32>
      tpu.vector_store %arg6[%c0_10, %c0_11], %15 {strides = array<i32>} : memref<256x256xf32, #tpu.memory_space<vmem>>, vector<256x256xf32>,
    } else {
    }
    %c384_i32 = arith.constant 384 : i32
    %3 = arith.muli %arg1, %c384_i32 : i32
    %4 = tpu.assume_multiple %3, 384 : i32
    %5 = arith.index_cast %4 : i32 to index
    %c0 = arith.constant 0 : index
    %6 = vector.load %arg3[%5, %c0] : memref<384x256xbf16, #tpu.memory_space<vmem>>, vector<384x256xbf16>
    %c0_1 = arith.constant 0 : index
    %c0_2 = arith.constant 0 : index
    %7 = vector.load %arg6[%c0_1, %c0_2] : memref<256x256xf32, #tpu.memory_space<vmem>>, vector<256x256xf32>
    %c0_3 = arith.constant 0 : index
    %c0_4 = arith.constant 0 : index
    %8 = vector.load %arg2[%c0_3, %c0_4] : memref<256x384xbf16, #tpu.memory_space<vmem>>, vector<256x384xbf16>
    %cst = arith.constant dense<0.000000e+00> : vector<256x256xf32>
    %9 = tpu.matmul %8, %6, %cst {dimension_numbers = #tpu.dot_dimension_numbers<[1], [0], [0], [1], [0, 0, 1, 1], [], []>} : vector<256x384xbf16>, vector<384x256xbf16>, vector<256x256xf32> -> vector<256x256xf32>
    %10 = arith.addf %7, %9 : vector<256x256xf32>
    %c0_5 = arith.constant 0 : index
    %c0_6 = arith.constant 0 : index
    %11 = vector.load %arg6[%c0_5, %c0_6] : memref<256x256xf32, #tpu.memory_space<vmem>>, vector<256x256xf32>
    tpu.vector_store %arg6[%c0_5, %c0_6], %10 {strides = array<i32>} : memref<256x256xf32, #tpu.memory_space<vmem>>, vector<256x256xf32>,
    %c0_i32_7 = arith.constant 0 : i32
    %12 = arith.cmpi eq, %arg1, %c0_i32_7 : i32
    %13 = arith.extui %12 : i1 to i32
    %c0_i32_8 = arith.constant 0 : i32
    %14 = arith.cmpi ne, %13, %c0_i32_8 : i32
    scf.if %14 {
      %c0_9 = arith.constant 0 : index
      %c0_10 = arith.constant 0 : index
      %15 = vector.load %arg6[%c0_9, %c0_10] : memref<256x256xf32, #tpu.memory_space<vmem>>, vector<256x128xf32>
      %16 = arith.truncf %15 : vector<256x128xf32> to vector<256x128xbf16>
      %c0_11 = arith.constant 0 : index
      %c0_12 = arith.constant 0 : index
      %17 = vector.load %arg4[%c0_11, %c0_12] : memref<256x128xbf16, #tpu.memory_space<vmem>>, vector<256x128xbf16>
      tpu.vector_store %arg4[%c0_11, %c0_12], %16 {strides = array<i32>} : memref<256x128xbf16, #tpu.memory_space<vmem>>, vector<256x128xbf16>,
      %c0_13 = arith.constant 0 : index
      %c128 = arith.constant 128 : index
      %18 = vector.load %arg6[%c0_13, %c128] : memref<256x256xf32, #tpu.memory_space<vmem>>, vector<256x128xf32>
      %19 = arith.truncf %18 : vector<256x128xf32> to vector<256x128xbf16>
      %c0_14 = arith.constant 0 : index
      %c0_15 = arith.constant 0 : index
      %20 = vector.load %arg5[%c0_14, %c0_15] : memref<256x128xbf16, #tpu.memory_space<vmem>>, vector<256x128xbf16>
      tpu.vector_store %arg5[%c0_14, %c0_15], %19 {strides = array<i32>} : memref<256x128xbf16, #tpu.memory_space<vmem>>, vector<256x128xbf16>,
    } else {
    }
    return
  }
  func.func @transform_0(%arg0: i32, %arg1: i32) -> (i32, i32) {
    %c0_i32 = arith.constant 0 : i32
    return %arg0, %arg1 : i32, i32
  }
  func.func @transform_1(%arg0: i32, %arg1: i32) -> (i32, i32) {
    %c0_i32 = arith.constant 0 : i32
    %c0_i32_0 = arith.constant 0 : i32
    %c0_i32_1 = arith.constant 0 : i32
    return %c0_i32, %c0_i32_0 : i32, i32
  }
  func.func @transform_2(%arg0: i32, %arg1: i32) -> (i32, i32) {
    %c0_i32 = arith.constant 0 : i32
    %c0_i32_0 = arith.constant 0 : i32
    return %arg0, %c0_i32 : i32, i32
  }
  func.func @transform_3(%arg0: i32, %arg1: i32) -> (i32, i32) {
    %c0_i32 = arith.constant 0 : i32
    %c0_i32_0 = arith.constant 0 : i32
    return %arg0, %c0_i32 : i32, i32
  }
}

module attributes {stable_mosaic.version = 11 : i64} {
  func.func @_agg_proj_kernel(%arg0: i32, %arg1: i32, %arg2: memref<256x256xbf16, #tpu.memory_space<vmem>>, %arg3: memref<256x128xbf16, #tpu.memory_space<vmem>>, %arg4: memref<256x128xbf16, #tpu.memory_space<vmem>>, %arg5: memref<128x256xbf16, #tpu.memory_space<vmem>>, %arg6: memref<256x128xbf16, #tpu.memory_space<vmem>>, %arg7: memref<256x128xbf16, #tpu.memory_space<vmem>>, %arg8: memref<256x128xf32, #tpu.memory_space<vmem>>) attributes {dimension_semantics = [#tpu.dimension_semantics<parallel>, #tpu.dimension_semantics<arbitrary>], iteration_bounds = array<i64: 1, 1>, scalar_prefetch = 0 : i64, scratch_operands = 1 : i64, tpu.core_type = #tpu.core_type<tc>, window_params = [{transform_indices = @transform_0, window_bounds = array<i64: 256, 256>}, {transform_indices = @transform_1, window_bounds = array<i64: 256, 128>}, {transform_indices = @transform_2, window_bounds = array<i64: 256, 128>}, {pipeline_mode = #tpu.pipeline_mode<synchronous>, transform_indices = @transform_3, window_bounds = array<i64: 128, 256>}, {transform_indices = @transform_4, window_bounds = array<i64: 256, 128>}, {transform_indices = @transform_5, window_bounds = array<i64: 256, 128>}]} {
    %c0_i32 = arith.constant 0 : i32
    %0 = arith.cmpi eq, %arg1, %c0_i32 : i32
    %1 = arith.extui %0 : i1 to i32
    %c0_i32_0 = arith.constant 0 : i32
    %2 = arith.cmpi ne, %1, %c0_i32_0 : i32
    scf.if %2 {
      %cst_10 = arith.constant 0.000000e+00 : f32
      %12 = vector.broadcast %cst_10 : f32 to vector<256x128xf32>
      %c0_11 = arith.constant 0 : index
      %c0_12 = arith.constant 0 : index
      %13 = vector.load %arg8[%c0_11, %c0_12] : memref<256x128xf32, #tpu.memory_space<vmem>>, vector<256x128xf32>
      tpu.vector_store %arg8[%c0_11, %c0_12], %12 {strides = array<i32>} : memref<256x128xf32, #tpu.memory_space<vmem>>, vector<256x128xf32>,
    } else {
    }
    %c0 = arith.constant 0 : index
    %c0_1 = arith.constant 0 : index
    %3 = vector.load %arg8[%c0, %c0_1] : memref<256x128xf32, #tpu.memory_space<vmem>>, vector<256x128xf32>
    %c0_2 = arith.constant 0 : index
    %c0_3 = arith.constant 0 : index
    %4 = vector.load %arg2[%c0_2, %c0_3] : memref<256x256xbf16, #tpu.memory_space<vmem>>, vector<256x256xbf16>
    %c0_4 = arith.constant 0 : index
    %c0_5 = arith.constant 0 : index
    %5 = vector.load %arg3[%c0_4, %c0_5] : memref<256x128xbf16, #tpu.memory_space<vmem>>, vector<256x128xbf16>
    %cst = arith.constant dense<0.000000e+00> : vector<256x128xf32>
    %6 = tpu.matmul %4, %5, %cst {dimension_numbers = #tpu.dot_dimension_numbers<[1], [0], [0], [1], [0, 0, 1, 1], [], []>} : vector<256x256xbf16>, vector<256x128xbf16>, vector<256x128xf32> -> vector<256x128xf32>
    %7 = arith.addf %3, %6 : vector<256x128xf32>
    %c0_6 = arith.constant 0 : index
    %c0_7 = arith.constant 0 : index
    %8 = vector.load %arg8[%c0_6, %c0_7] : memref<256x128xf32, #tpu.memory_space<vmem>>, vector<256x128xf32>
    tpu.vector_store %arg8[%c0_6, %c0_7], %7 {strides = array<i32>} : memref<256x128xf32, #tpu.memory_space<vmem>>, vector<256x128xf32>,
    %c0_i32_8 = arith.constant 0 : i32
    %9 = arith.cmpi eq, %arg1, %c0_i32_8 : i32
    %10 = arith.extui %9 : i1 to i32
    %c0_i32_9 = arith.constant 0 : i32
    %11 = arith.cmpi ne, %10, %c0_i32_9 : i32
    scf.if %11 {
      %c0_10 = arith.constant 0 : index
      %c0_11 = arith.constant 0 : index
      %12 = vector.load %arg8[%c0_10, %c0_11] : memref<256x128xf32, #tpu.memory_space<vmem>>, vector<256x128xf32>
      %c0_12 = arith.constant 0 : index
      %c0_13 = arith.constant 0 : index
      %13 = vector.load %arg4[%c0_12, %c0_13] : memref<256x128xbf16, #tpu.memory_space<vmem>>, vector<256x128xbf16>
      %14 = arith.extf %13 : vector<256x128xbf16> to vector<256x128xf32>
      %15 = arith.addf %12, %14 : vector<256x128xf32>
      %cst_14 = arith.constant 0.000000e+00 : f32
      %16 = vector.broadcast %cst_14 : f32 to vector<256x128xf32>
      %17 = arith.maximumf %15, %16 : vector<256x128xf32>
      %18 = arith.truncf %17 : vector<256x128xf32> to vector<256x128xbf16>
      %c0_15 = arith.constant 0 : index
      %c0_16 = arith.constant 0 : index
      %19 = vector.load %arg5[%c0_15, %c0_16] : memref<128x256xbf16, #tpu.memory_space<vmem>>, vector<128x256xbf16>
      %cst_17 = arith.constant dense<0.000000e+00> : vector<256x256xf32>
      %20 = tpu.matmul %18, %19, %cst_17 {dimension_numbers = #tpu.dot_dimension_numbers<[1], [0], [0], [1], [0, 0, 1, 1], [], []>} : vector<256x128xbf16>, vector<128x256xbf16>, vector<256x256xf32> -> vector<256x256xf32>
      %21 = vector.extract_strided_slice %20 {offsets = [0, 0], sizes = [256, 128], strides = [1, 1]} : vector<256x256xf32> to vector<256x128xf32>
      %22 = arith.truncf %21 : vector<256x128xf32> to vector<256x128xbf16>
      %c0_18 = arith.constant 0 : index
      %c0_19 = arith.constant 0 : index
      %23 = vector.load %arg6[%c0_18, %c0_19] : memref<256x128xbf16, #tpu.memory_space<vmem>>, vector<256x128xbf16>
      tpu.vector_store %arg6[%c0_18, %c0_19], %22 {strides = array<i32>} : memref<256x128xbf16, #tpu.memory_space<vmem>>, vector<256x128xbf16>,
      %24 = vector.extract_strided_slice %20 {offsets = [0, 128], sizes = [256, 128], strides = [1, 1]} : vector<256x256xf32> to vector<256x128xf32>
      %25 = arith.truncf %24 : vector<256x128xf32> to vector<256x128xbf16>
      %c0_20 = arith.constant 0 : index
      %c0_21 = arith.constant 0 : index
      %26 = vector.load %arg7[%c0_20, %c0_21] : memref<256x128xbf16, #tpu.memory_space<vmem>>, vector<256x128xbf16>
      tpu.vector_store %arg7[%c0_20, %c0_21], %25 {strides = array<i32>} : memref<256x128xbf16, #tpu.memory_space<vmem>>, vector<256x128xbf16>,
    } else {
    }
    return
  }
  func.func @transform_0(%arg0: i32, %arg1: i32) -> (i32, i32) {
    %c0_i32 = arith.constant 0 : i32
    return %arg0, %arg1 : i32, i32
  }
  func.func @transform_1(%arg0: i32, %arg1: i32) -> (i32, i32) {
    %c0_i32 = arith.constant 0 : i32
    %c0_i32_0 = arith.constant 0 : i32
    return %arg1, %c0_i32 : i32, i32
  }
  func.func @transform_2(%arg0: i32, %arg1: i32) -> (i32, i32) {
    %c0_i32 = arith.constant 0 : i32
    %c0_i32_0 = arith.constant 0 : i32
    return %arg0, %c0_i32 : i32, i32
  }
  func.func @transform_3(%arg0: i32, %arg1: i32) -> (i32, i32) {
    %c0_i32 = arith.constant 0 : i32
    %c0_i32_0 = arith.constant 0 : i32
    %c0_i32_1 = arith.constant 0 : i32
    return %c0_i32, %c0_i32_0 : i32, i32
  }
  func.func @transform_4(%arg0: i32, %arg1: i32) -> (i32, i32) {
    %c0_i32 = arith.constant 0 : i32
    %c0_i32_0 = arith.constant 0 : i32
    return %arg0, %c0_i32 : i32, i32
  }
  func.func @transform_5(%arg0: i32, %arg1: i32) -> (i32, i32) {
    %c0_i32 = arith.constant 0 : i32
    %c0_i32_0 = arith.constant 0 : i32
    return %arg0, %c0_i32 : i32, i32
  }
}

module attributes {stable_mosaic.version = 11 : i64} {
  func.func @_agg_head_kernel(%arg0: i32, %arg1: i32, %arg2: memref<256x256xbf16, #tpu.memory_space<vmem>>, %arg3: memref<256x128xbf16, #tpu.memory_space<vmem>>, %arg4: memref<256x128xbf16, #tpu.memory_space<vmem>>, %arg5: memref<128x128xbf16, #tpu.memory_space<vmem>>, %arg6: memref<256x128xf32, #tpu.memory_space<vmem>>, %arg7: memref<256x128xf32, #tpu.memory_space<vmem>>) attributes {dimension_semantics = [#tpu.dimension_semantics<parallel>, #tpu.dimension_semantics<arbitrary>], iteration_bounds = array<i64: 1, 1>, scalar_prefetch = 0 : i64, scratch_operands = 1 : i64, tpu.core_type = #tpu.core_type<tc>, window_params = [{transform_indices = @transform_0, window_bounds = array<i64: 256, 256>}, {transform_indices = @transform_1, window_bounds = array<i64: 256, 128>}, {transform_indices = @transform_2, window_bounds = array<i64: 256, 128>}, {pipeline_mode = #tpu.pipeline_mode<synchronous>, transform_indices = @transform_3, window_bounds = array<i64: 128, 128>}, {transform_indices = @transform_4, window_bounds = array<i64: 256, 128>}]} {
    %c0_i32 = arith.constant 0 : i32
    %0 = arith.cmpi eq, %arg1, %c0_i32 : i32
    %1 = arith.extui %0 : i1 to i32
    %c0_i32_0 = arith.constant 0 : i32
    %2 = arith.cmpi ne, %1, %c0_i32_0 : i32
    scf.if %2 {
      %cst_10 = arith.constant 0.000000e+00 : f32
      %12 = vector.broadcast %cst_10 : f32 to vector<256x128xf32>
      %c0_11 = arith.constant 0 : index
      %c0_12 = arith.constant 0 : index
      %13 = vector.load %arg7[%c0_11, %c0_12] : memref<256x128xf32, #tpu.memory_space<vmem>>, vector<256x128xf32>
      tpu.vector_store %arg7[%c0_11, %c0_12], %12 {strides = array<i32>} : memref<256x128xf32, #tpu.memory_space<vmem>>, vector<256x128xf32>,
    } else {
    }
    %c0 = arith.constant 0 : index
    %c0_1 = arith.constant 0 : index
    %3 = vector.load %arg7[%c0, %c0_1] : memref<256x128xf32, #tpu.memory_space<vmem>>, vector<256x128xf32>
    %c0_2 = arith.constant 0 : index
    %c0_3 = arith.constant 0 : index
    %4 = vector.load %arg2[%c0_2, %c0_3] : memref<256x256xbf16, #tpu.memory_space<vmem>>, vector<256x256xbf16>
    %c0_4 = arith.constant 0 : index
    %c0_5 = arith.constant 0 : index
    %5 = vector.load %arg3[%c0_4, %c0_5] : memref<256x128xbf16, #tpu.memory_space<vmem>>, vector<256x128xbf16>
    %cst = arith.constant dense<0.000000e+00> : vector<256x128xf32>
    %6 = tpu.matmul %4, %5, %cst {dimension_numbers = #tpu.dot_dimension_numbers<[1], [0], [0], [1], [0, 0, 1, 1], [], []>} : vector<256x256xbf16>, vector<256x128xbf16>, vector<256x128xf32> -> vector<256x128xf32>
    %7 = arith.addf %3, %6 : vector<256x128xf32>
    %c0_6 = arith.constant 0 : index
    %c0_7 = arith.constant 0 : index
    %8 = vector.load %arg7[%c0_6, %c0_7] : memref<256x128xf32, #tpu.memory_space<vmem>>, vector<256x128xf32>
    tpu.vector_store %arg7[%c0_6, %c0_7], %7 {strides = array<i32>} : memref<256x128xf32, #tpu.memory_space<vmem>>, vector<256x128xf32>,
    %c0_i32_8 = arith.constant 0 : i32
    %9 = arith.cmpi eq, %arg1, %c0_i32_8 : i32
    %10 = arith.extui %9 : i1 to i32
    %c0_i32_9 = arith.constant 0 : i32
    %11 = arith.cmpi ne, %10, %c0_i32_9 : i32
    scf.if %11 {
      %c0_10 = arith.constant 0 : index
      %c0_11 = arith.constant 0 : index
      %12 = vector.load %arg7[%c0_10, %c0_11] : memref<256x128xf32, #tpu.memory_space<vmem>>, vector<256x128xf32>
      %c0_12 = arith.constant 0 : index
      %c0_13 = arith.constant 0 : index
      %13 = vector.load %arg4[%c0_12, %c0_13] : memref<256x128xbf16, #tpu.memory_space<vmem>>, vector<256x128xbf16>
      %14 = arith.extf %13 : vector<256x128xbf16> to vector<256x128xf32>
      %15 = arith.addf %12, %14 : vector<256x128xf32>
      %cst_14 = arith.constant 0.000000e+00 : f32
      %16 = vector.broadcast %cst_14 : f32 to vector<256x128xf32>
      %17 = arith.maximumf %15, %16 : vector<256x128xf32>
      %18 = arith.truncf %17 : vector<256x128xf32> to vector<256x128xbf16>
      %c0_15 = arith.constant 0 : index
      %c0_16 = arith.constant 0 : index
      %19 = vector.load %arg5[%c0_15, %c0_16] : memref<128x128xbf16, #tpu.memory_space<vmem>>, vector<128x128xbf16>
      %cst_17 = arith.constant dense<0.000000e+00> : vector<256x128xf32>
      %20 = tpu.matmul %18, %19, %cst_17 {dimension_numbers = #tpu.dot_dimension_numbers<[1], [0], [0], [1], [0, 0, 1, 1], [], []>} : vector<256x128xbf16>, vector<128x128xbf16>, vector<256x128xf32> -> vector<256x128xf32>
      %21 = tpu.iota {dimensions = array<i32: 1>} : vector<256x128xi32>
      %c7_i32 = arith.constant 7 : i32
      %22 = vector.broadcast %c7_i32 : i32 to vector<256x128xi32>
      %23 = arith.cmpi slt, %21, %22 : vector<256x128xi32>
      %cst_18 = arith.constant -1.000000e+30 : f32
      %24 = vector.broadcast %cst_18 : f32 to vector<256x128xf32>
      %25 = arith.select %23, %20, %24 : vector<256x128xi1>, vector<256x128xf32>
      %cst_19 = arith.constant dense<0xFF800000> : vector<256xf32>
      %26 = vector.multi_reduction <maximumf>, %25, %cst_19 [1] : vector<256x128xf32> to vector<256xf32>
      %27 = vector.shape_cast %26 : vector<256xf32> to vector<256x1xf32>
      %28 = vector.broadcast %27 : vector<256x1xf32> to vector<256x128xf32>
      %29 = arith.subf %25, %28 : vector<256x128xf32>
      %30 = math.exp %29 : vector<256x128xf32>
      %cst_20 = arith.constant dense<0.000000e+00> : vector<256xf32>
      %31 = vector.multi_reduction <add>, %30, %cst_20 [1] : vector<256x128xf32> to vector<256xf32>
      %32 = vector.shape_cast %31 : vector<256xf32> to vector<256x1xf32>
      %33 = math.log %32 : vector<256x1xf32>
      %34 = vector.broadcast %33 : vector<256x1xf32> to vector<256x128xf32>
      %35 = arith.subf %29, %34 : vector<256x128xf32>
      %c0_21 = arith.constant 0 : index
      %c0_22 = arith.constant 0 : index
      %36 = vector.load %arg6[%c0_21, %c0_22] : memref<256x128xf32, #tpu.memory_space<vmem>>, vector<256x128xf32>
      tpu.vector_store %arg6[%c0_21, %c0_22], %35 {strides = array<i32>} : memref<256x128xf32, #tpu.memory_space<vmem>>, vector<256x128xf32>,
    } else {
    }
    return
  }
  func.func @transform_0(%arg0: i32, %arg1: i32) -> (i32, i32) {
    %c0_i32 = arith.constant 0 : i32
    return %arg0, %arg1 : i32, i32
  }
  func.func @transform_1(%arg0: i32, %arg1: i32) -> (i32, i32) {
    %c0_i32 = arith.constant 0 : i32
    %c0_i32_0 = arith.constant 0 : i32
    return %arg1, %c0_i32 : i32, i32
  }
  func.func @transform_2(%arg0: i32, %arg1: i32) -> (i32, i32) {
    %c0_i32 = arith.constant 0 : i32
    %c0_i32_0 = arith.constant 0 : i32
    return %arg0, %c0_i32 : i32, i32
  }
  func.func @transform_3(%arg0: i32, %arg1: i32) -> (i32, i32) {
    %c0_i32 = arith.constant 0 : i32
    %c0_i32_0 = arith.constant 0 : i32
    %c0_i32_1 = arith.constant 0 : i32
    return %c0_i32, %c0_i32_0 : i32, i32
  }
  func.func @transform_4(%arg0: i32, %arg1: i32) -> (i32, i32) {
    %c0_i32 = arith.constant 0 : i32
    %c0_i32_0 = arith.constant 0 : i32
    return %arg0, %c0_i32 : i32, i32
  }
}

</mosaic_0001>

<bundles_post_ra>
// kernel: graphsage_forward.4
= control target key start
LH: loop header
LB: loop body
LE: loop exit
PB: predicated region body
PF: predicated region fallthrough
CT: control target
= control target key end

     0   :  { %v2091_v55 = vmov 0   ;;  %s2474_s1 = inlined_call_operand.vmem [shape: bf16[256,128], index: 1, kind: input, shape index: {}]   ;;  %s2475_s0 = inlined_call_operand.vmem [shape: bf16[256,256], index: 0, kind: input, shape index: {}]   ;;  %s2476_s3 = inlined_call_operand.vmem [shape: bf16[128,256], index: 3, kind: input, shape index: {}]   ;;  %s2477_s2 = inlined_call_operand.vmem [shape: bf16[256,128], index: 2, kind: input, shape index: {}]   ;;  %s2478_s4 = inlined_call_operand.vmem [shape: bf16[256,128], index: 4, kind: output, shape index: {0}]   ;;  %s2479_s5 = inlined_call_operand.vmem [shape: bf16[256,128], index: 5, kind: output, shape index: {1}]  }
   0x1   :  { %v2003_v0 = vld [vmem:[%s2474_s1 + $0x78] sm:$0xff]   ;;  %v2005_v2 = vld [vmem:[%s2474_s1 + $0x70] sm:$0xff]   ;;  %v2007_v4 = vld [vmem:[%s2474_s1 + $0x68] sm:$0xff]   ;;  %940 = vmatprep.mubr.bf16.mxu1 %v2091_v55 }
   0x2   :  { %v2004_v1 = vld [vmem:[%s2474_s1 + $0x38] sm:$0xff]   ;;  %1890 = vmatprep.subr.bf16.mxu0 %v2003_v0  ;;  %v2006_v3 = vld [vmem:[%s2474_s1 + $0x30] sm:$0xff]   ;;  %v2008_v5 = vld [vmem:[%s2474_s1 + $0x28] sm:$0xff]  }
   0x3   :  { %1891 = vmatpush3.bf16.msra.mxu0 %v2004_v1  ;;  %v2009_v6 = vld [vmem:[%s2474_s1 + $0x60] sm:$0xff]   ;;  %v2011_v8 = vld [vmem:[%s2474_s1 + $0x58] sm:$0xff]   ;;  %v2013_v10 = vld [vmem:[%s2474_s1 + $0x50] sm:$0xff]  }
   0x4   :  { %1892 = vmatprep.subr.bf16.mxu0 %v2005_v2  ;;  %v2010_v7 = vld [vmem:[%s2474_s1 + $0x20] sm:$0xff]   ;;  %v2012_v9 = vld [vmem:[%s2474_s1 + $0x18] sm:$0xff]   ;;  %v2014_v12 = vld [vmem:[%s2474_s1 + $0x10] sm:$0xff]  }
   0x5   :  { %v2021_v11 = vld [vmem:[%s2475_s0 + $0x4] ss:$8 sps:$4 sm:$0xff]   ;;  %v2019_v17 = vld [vmem:[%s2475_s0] ss:$8 sps:$4 sm:$0xff]   ;;  %v2022_v18 = vld [vmem:[%s2475_s0 + $0x14] ss:$8 sps:$4 sm:$0xff]  }
   0x6   :  { %440 = vmatprep.mubr.bf16.mxu0 %v2021_v11  ;;  %v2015_v13 = vld [vmem:[%s2474_s1 + $0x48] sm:$0xff]   ;;  %v2017_v15 = vld [vmem:[%s2474_s1 + $0x40] sm:$0xff]   ;;  %v2024_v19 = vld [vmem:[%s2475_s0 + $0x10] ss:$8 sps:$4 sm:$0xff]  }
   0x7   :  { %1893 = vmatpush3.bf16.msra.mxu0 %v2006_v3  ;;  %v2016_v14 = vld [vmem:[%s2474_s1 + $0x8] sm:$0xff]   ;;  %v2018_v16 = vld [vmem:[%s2474_s1] sm:$0xff]   ;;  %v2067_v20 = vld [vmem:[%s2476_s3 + $0x74] ss:$8 sps:$4 sm:$0xff]  }
   0x8   :  { %1894 = vmatprep.subr.bf16.mxu0 %v2007_v4  ;;  %v2069_v21 = vld [vmem:[%s2476_s3 + $0x70] ss:$8 sps:$4 sm:$0xff]   ;;  %v2025_v22 = vld [vmem:[%s2475_s0 + $0x24] ss:$8 sps:$4 sm:$0xff]   ;;  %908 = vmatprep.subr.bf16.mxu1 %v2067_v20  ;;  %v2072_v24 = vld [vmem:[%s2476_s3 + $0x60] ss:$8 sps:$4 sm:$0xff]  }
   0x9   :  { %v2070_v23 = vld [vmem:[%s2476_s3 + $0x64] ss:$8 sps:$4 sm:$0xff]   ;;  %909 = vmatpush1.bf16.msra.mxu1 %v2069_v21  ;;  %v2073_v25 = vld [vmem:[%s2476_s3 + $0x54] ss:$8 sps:$4 sm:$0xff]   ;;  %v2075_v26 = vld [vmem:[%s2476_s3 + $0x50] ss:$8 sps:$4 sm:$0xff]  }
   0xa   :  { %910 = vmatprep.subr.bf16.mxu1 %v2070_v23  ;;  %v2027_v27 = vld [vmem:[%s2475_s0 + $0x20] ss:$8 sps:$4 sm:$0xff]   ;;  %v2076_v28 = vld [vmem:[%s2476_s3 + $0x44] ss:$8 sps:$4 sm:$0xff]   ;;  %v2028_v29 = vld [vmem:[%s2475_s0 + $0x34] ss:$8 sps:$4 sm:$0xff]  }
   0xb   :  { %1895 = vmatpush3.bf16.msra.mxu0 %v2008_v5  ;;  %v2078_v30 = vld [vmem:[%s2476_s3 + $0x40] ss:$8 sps:$4 sm:$0xff]   ;;  %v2079_v31 = vld [vmem:[%s2476_s3 + $0x34] ss:$8 sps:$4 sm:$0xff]   ;;  %v2030_v32 = vld [vmem:[%s2475_s0 + $0x30] ss:$8 sps:$4 sm:$0xff]  }
   0xc   :  { %1896 = vmatprep.subr.bf16.mxu0 %v2009_v6  ;;  %v2031_v33 = vld [vmem:[%s2475_s0 + $0x44] ss:$8 sps:$4 sm:$0xff]   ;;  %v2033_v34 = vld [vmem:[%s2475_s0 + $0x40] ss:$8 sps:$4 sm:$0xff]   ;;  %v2034_v35 = vld [vmem:[%s2475_s0 + $0x54] ss:$8 sps:$4 sm:$0xff]  }
   0xd   :  { %911 = vmatpush1.bf16.msra.mxu1 %v2072_v24  ;;  %v2036_v36 = vld [vmem:[%s2475_s0 + $0x50] ss:$8 sps:$4 sm:$0xff]   ;;  %v2037_v37 = vld [vmem:[%s2475_s0 + $0x64] ss:$8 sps:$4 sm:$0xff]   ;;  %v2039_v38 = vld [vmem:[%s2475_s0 + $0x60] ss:$8 sps:$4 sm:$0xff]  }
   0xe   :  { %912 = vmatprep.subr.bf16.mxu1 %v2073_v25  ;;  %v2040_v39 = vld [vmem:[%s2475_s0 + $0x74] ss:$8 sps:$4 sm:$0xff]   ;;  %v2042_v40 = vld [vmem:[%s2475_s0 + $0x70] ss:$8 sps:$4 sm:$0xff]   ;;  %v2043_v41 = vld [vmem:[%s2475_s0 + $0x84] ss:$8 sps:$4 sm:$0xff]  }
   0xf   :  { %1897 = vmatpush3.bf16.msra.mxu0 %v2010_v7  ;;  %v2045_v42 = vld [vmem:[%s2475_s0 + $0x80] ss:$8 sps:$4 sm:$0xff]   ;;  %v2046_v43 = vld [vmem:[%s2475_s0 + $0x94] ss:$8 sps:$4 sm:$0xff]   ;;  %v2081_v44 = vld [vmem:[%s2476_s3 + $0x30] ss:$8 sps:$4 sm:$0xff]  }
  0x10   :  { %1898 = vmatprep.subr.bf16.mxu0 %v2011_v8  ;;  %v2082_v45 = vld [vmem:[%s2476_s3 + $0x24] ss:$8 sps:$4 sm:$0xff]   ;;  %v2084_v46 = vld [vmem:[%s2476_s3 + $0x20] ss:$8 sps:$4 sm:$0xff]   ;;  %v2048_v47 = vld [vmem:[%s2475_s0 + $0x90] ss:$8 sps:$4 sm:$0xff]  }
  0x11   :  { %913 = vmatpush1.bf16.msra.mxu1 %v2075_v26  ;;  %v2049_v48 = vld [vmem:[%s2475_s0 + $0xa4] ss:$8 sps:$4 sm:$0xff]   ;;  %v2085_v49 = vld [vmem:[%s2476_s3 + $0x14] ss:$8 sps:$4 sm:$0xff]   ;;  %v2087_v50 = vld [vmem:[%s2476_s3 + $0x10] ss:$8 sps:$4 sm:$0xff]  }
  0x12   :  { %914 = vmatprep.subr.bf16.mxu1 %v2076_v28  ;;  %v2088_v51 = vld [vmem:[%s2476_s3 + $0x4] ss:$8 sps:$4 sm:$0xff]   ;;  %v2090_v52 = vld [vmem:[%s2476_s3] ss:$8 sps:$4 sm:$0xff]   ;;  %v2052_v54 = vld [vmem:[%s2475_s0 + $0xb4] ss:$8 sps:$4 sm:$0xff]  }
  0x13   :  { %1899 = vmatpush3.bf16.msra.mxu0 %v2012_v9  ;;  %v2051_v53 = vld [vmem:[%s2475_s0 + $0xa0] ss:$8 sps:$4 sm:$0xff]   ;;  %v2054_v56 = vld [vmem:[%s2475_s0 + $0xb0] ss:$8 sps:$4 sm:$0xff]   ;;  %v2055_v57 = vld [vmem:[%s2475_s0 + $0xc4] ss:$8 sps:$4 sm:$0xff]  }
  0x14   :  { %1900 = vmatprep.subr.bf16.mxu0 %v2013_v10  ;;  %v2057_v58 = vld [vmem:[%s2475_s0 + $0xc0] ss:$8 sps:$4 sm:$0xff]   ;;  %v2058_v59 = vld [vmem:[%s2475_s0 + $0xd4] ss:$8 sps:$4 sm:$0xff]   ;;  %v2060_v60 = vld [vmem:[%s2475_s0 + $0xd0] ss:$8 sps:$4 sm:$0xff]  }
  0x15   :  { %915 = vmatpush1.bf16.msra.mxu1 %v2078_v30  ;;  %v2061_v61 = vld [vmem:[%s2475_s0 + $0xe4] ss:$8 sps:$4 sm:$0xff]   ;;  %v2063_v62 = vld [vmem:[%s2475_s0 + $0xe0] ss:$8 sps:$4 sm:$0xff]   ;;  %v2064_v63 = vld [vmem:[%s2475_s0 + $0xf4] ss:$8 sps:$4 sm:$0xff]  }
  0x16   :  { %916 = vmatprep.subr.bf16.mxu1 %v2079_v31  ;;  %v2066_v0 = vld [vmem:[%s2475_s0 + $0xf0] ss:$8 sps:$4 sm:$0xff]   ;;  %v1622_v2 = vld [vmem:[%s2477_s2] sm:$0xff]  }
  0x17   :  { %1901 = vmatpush3.bf16.msra.mxu0 %v2014_v12  ;;  %v1623_v5 = vunpack.c.l.bf16 %v1622_v2  ;;  %v1624_v7 = vunpack.c.h.bf16 %v1622_v2  ;;  %v1845_v12 = vld [vmem:[%s2477_s2 + $0x8] sm:$0xff]   ;;  %v1846_v26 = vld [vmem:[%s2477_s2 + $0x10] sm:$0xff]  }
  0x18   :  { %1902 = vmatprep.subr.bf16.mxu0 %v2015_v13  ;;  %v1628_v20 = vunpack.c.h.bf16 %v1845_v12 }
  0x19   :  { %917 = vmatpush1.bf16.msra.mxu1 %v2081_v44 }
  0x1a   :  { %918 = vmatprep.subr.bf16.mxu1 %v2082_v45 }
  0x1b   :  { %1903 = vmatpush3.bf16.msra.mxu0 %v2016_v14 }
  0x1c   :  { %1904 = vmatprep.subr.bf16.mxu0 %v2017_v15 }
  0x1d   :  { %919 = vmatpush1.bf16.msra.mxu1 %v2084_v46 }
  0x1e   :  { %920 = vmatprep.subr.bf16.mxu1 %v2085_v49 }
  0x1f   :  { %1905 = vmatpush3.bf16.msra.mxu0 %v2018_v16 }
  0x21   :  { %921 = vmatpush1.bf16.msra.mxu1 %v2087_v50 }
  0x22   :  { %441 = vmatmul.mubr.bf16.vlgmr.msra.gmra.mxu0 %v2019_v17  ;;  %922 = vmatprep.subr.bf16.mxu1 %v2088_v51 }
  0x23   :  { %448 = vmatprep.mubr.bf16.mxu0 %v2022_v18  ;;  %v1627_v18 = vunpack.c.l.bf16 %v1845_v12 }
  0x25   :  { %923 = vmatpush1.bf16.msra.mxu1 %v2090_v52 }
  0x2a   :  { %449 = vmatmul.mubr.bf16.gmra.mxu0 %v2024_v19 }
  0x2b   :  { %456 = vmatprep.mubr.bf16.mxu0 %v2025_v22 }
  0x32   :  { %457 = vmatmul.mubr.bf16.gmra.mxu0 %v2027_v27 }
  0x33   :  { %464 = vmatprep.mubr.bf16.mxu0 %v2028_v29 }
  0x3a   :  { %465 = vmatmul.mubr.bf16.gmra.mxu0 %v2030_v32  ;;  %v1631_v32 = vunpack.c.l.bf16 %v1846_v26 }
  0x3b   :  { %472 = vmatprep.mubr.bf16.mxu0 %v2031_v33 }
  0x42   :  { %473 = vmatmul.mubr.bf16.gmra.mxu0 %v2033_v34  ;;  %v1632_v34 = vunpack.c.h.bf16 %v1846_v26 }
  0x43   :  { %480 = vmatprep.mubr.bf16.mxu0 %v2034_v35 }
  0x4a   :  { %481 = vmatmul.mubr.bf16.gmra.mxu0 %v2036_v36 }
  0x4b   :  { %488 = vmatprep.mubr.bf16.mxu0 %v2037_v37 }
  0x52   :  { %489 = vmatmul.mubr.bf16.gmra.mxu0 %v2039_v38 }
  0x53   :  { %496 = vmatprep.mubr.bf16.mxu0 %v2040_v39 }
  0x5a   :  { %497 = vmatmul.mubr.bf16.gmra.mxu0 %v2042_v40  ;;  %v1847_v40 = vld [vmem:[%s2477_s2 + $0x18] sm:$0xff]  }
  0x5b   :  { %504 = vmatprep.mubr.bf16.mxu0 %v2043_v41  ;;  %v1635_v46 = vunpack.c.l.bf16 %v1847_v40 }
  0x62   :  { %505 = vmatmul.mubr.bf16.gmra.mxu0 %v2045_v42 }
  0x63   :  { %512 = vmatprep.mubr.bf16.mxu0 %v2046_v43 }
  0x6a   :  { %513 = vmatmul.mubr.bf16.gmra.mxu0 %v2048_v47 }
  0x6b   :  { %520 = vmatprep.mubr.bf16.mxu0 %v2049_v48  ;;  %v1636_v48 = vunpack.c.h.bf16 %v1847_v40 }
  0x72   :  { %521 = vmatmul.mubr.bf16.gmra.mxu0 %v2051_v53 }
  0x73   :  { %528 = vmatprep.mubr.bf16.mxu0 %v2052_v54  ;;  %v1848_v54 = vld [vmem:[%s2477_s2 + $0x20] sm:$0xff]  }
  0x7a   :  { %529 = vmatmul.mubr.bf16.gmra.mxu0 %v2054_v56 }
  0x7b   :  { %536 = vmatprep.mubr.bf16.mxu0 %v2055_v57 }
  0x82   :  { %537 = vmatmul.mubr.bf16.gmra.mxu0 %v2057_v58 }
  0x83   :  { %544 = vmatprep.mubr.bf16.mxu0 %v2058_v59 }
  0x8a   :  { %545 = vmatmul.mubr.bf16.gmra.mxu0 %v2060_v60 }
  0x8b   :  { %552 = vmatprep.mubr.bf16.mxu0 %v2061_v61  ;;  %v1639_v61 = vunpack.c.l.bf16 %v1848_v54 }
  0x92   :  { %553 = vmatmul.mubr.bf16.gmra.mxu0 %v2063_v62 }
  0x93   :  { %560 = vmatprep.mubr.bf16.mxu0 %v2064_v63  ;;  %v1640_v63 = vunpack.c.h.bf16 %v1848_v54 }
  0x9a   :  { %561 = vmatmul.mubr.bf16.gmra.mxu0 %v2066_v0 }
  0xe2   :  { %v1906_v1 = vpop.f32.mrf.mxu0 }
  0xe4   :  { %v1907_v3 = vpop.f32.mrf.mxu0 }
  0xe5   :  { %v1908_v4 = vadd.f32 %v1907_v3, %v1906_v1 }
  0xe6   :  { %v1909_v6 = vpop.f32.mrf.mxu0 }
  0xe7   :  { %v732_v9 = vadd.f32 %v1908_v4, %v1623_v5  ;;  %v1849_v5 = vld [vmem:[%s2477_s2 + $0x28] sm:$0xff]  }
  0xe8   :  { %v1910_v8 = vpop.f32.mrf.mxu0 }
  0xe9   :  { %v1911_v10 = vadd.f32 %v1910_v8, %v1909_v6  ;;  %v764_v15 = vmax.f32 %v732_v9, 0.0 }
  0xea   :  { %v1912_v11 = vpop.f32.mrf.mxu0 }
  0xeb   :  { %v733_v13 = vadd.f32 %v1911_v10, %v1624_v7 }
  0xec   :  { %v1913_v14 = vpop.f32.mrf.mxu0 }
  0xed   :  { %v765_v16 = vmax.f32 %v733_v13, 0.0  ;;  %v1914_v17 = vadd.f32 %v1913_v14, %v1912_v11  ;;  %v1643_v11 = vunpack.c.l.bf16 %v1849_v5  ;;  %v1644_v13 = vunpack.c.h.bf16 %v1849_v5 }
  0xee   :  { %v1915_v19 = vpop.f32.mrf.mxu0 }
  0xef   :  { %v796_v21 = vpack.c.bf16 %v765_v16, %v764_v15  ;;  %v734_v23 = vadd.f32 %v1914_v17, %v1627_v18 }
  0xf0   :  { %v1916_v22 = vpop.f32.mrf.mxu0 }
  0xf1   :  { %v1917_v24 = vadd.f32 %v1916_v22, %v1915_v19  ;;  %941 = vmatmul.mubr.bf16.vlgmr.msra.gmra.mxu1 %v796_v21  ;;  %v766_v29 = vmax.f32 %v734_v23, 0.0  ;;  %v1850_v19 = vld [vmem:[%s2477_s2 + $0x30] sm:$0xff]  }
  0xf2   :  { %v1918_v25 = vpop.f32.mrf.mxu0  ;;  %950 = vmatprep.mubr.bf16.mxu1 %v2091_v55 }
  0xf3   :  { %v735_v27 = vadd.f32 %v1917_v24, %v1628_v20 }
  0xf4   :  { %v1919_v28 = vpop.f32.mrf.mxu0 }
  0xf5   :  { %v767_v30 = vmax.f32 %v735_v27, 0.0  ;;  %v1920_v31 = vadd.f32 %v1919_v28, %v1918_v25  ;;  %v1647_v25 = vunpack.c.l.bf16 %v1850_v19  ;;  %v1648_v27 = vunpack.c.h.bf16 %v1850_v19 }
  0xf6   :  { %v1921_v33 = vpop.f32.mrf.mxu0 }
  0xf7   :  { %v797_v35 = vpack.c.bf16 %v767_v30, %v766_v29  ;;  %v736_v37 = vadd.f32 %v1920_v31, %v1631_v32 }
  0xf8   :  { %v1922_v36 = vpop.f32.mrf.mxu0 }
  0xf9   :  { %v1923_v38 = vadd.f32 %v1922_v36, %v1921_v33  ;;  %951 = vmatmul.mubr.bf16.gmra.mxu1 %v797_v35  ;;  %v768_v43 = vmax.f32 %v736_v37, 0.0  ;;  %v1851_v33 = vld [vmem:[%s2477_s2 + $0x38] sm:$0xff]  }
  0xfa   :  { %v1924_v39 = vpop.f32.mrf.mxu0  ;;  %960 = vmatprep.mubr.bf16.mxu1 %v2091_v55 }
  0xfb   :  { %v737_v41 = vadd.f32 %v1923_v38, %v1632_v34 }
  0xfc   :  { %v1925_v42 = vpop.f32.mrf.mxu0 }
  0xfd   :  { %v769_v44 = vmax.f32 %v737_v41, 0.0  ;;  %v1926_v45 = vadd.f32 %v1925_v42, %v1924_v39  ;;  %v1651_v39 = vunpack.c.l.bf16 %v1851_v33  ;;  %v1652_v41 = vunpack.c.h.bf16 %v1851_v33 }
  0xfe   :  { %v1927_v47 = vpop.f32.mrf.mxu0 }
  0xff   :  { %v798_v49 = vpack.c.bf16 %v769_v44, %v768_v43  ;;  %v738_v51 = vadd.f32 %v1926_v45, %v1635_v46 }
 0x100   :  { %v1928_v50 = vpop.f32.mrf.mxu0 }
 0x101   :  { %v1929_v52 = vadd.f32 %v1928_v50, %v1927_v47  ;;  %961 = vmatmul.mubr.bf16.gmra.mxu1 %v798_v49  ;;  %v770_v58 = vmax.f32 %v738_v51, 0.0  ;;  %v1852_v47 = vld [vmem:[%s2477_s2 + $0x40] sm:$0xff]  }
 0x102   :  { %v1930_v53 = vpop.f32.mrf.mxu0  ;;  %970 = vmatprep.mubr.bf16.mxu1 %v2091_v55 }
 0x103   :  { %v739_v56 = vadd.f32 %v1929_v52, %v1636_v48 }
 0x104   :  { %v1931_v57 = vpop.f32.mrf.mxu0 }
 0x105   :  { %v771_v59 = vmax.f32 %v739_v56, 0.0  ;;  %v1932_v60 = vadd.f32 %v1931_v57, %v1930_v53  ;;  %v1655_v53 = vunpack.c.l.bf16 %v1852_v47  ;;  %v1656_v56 = vunpack.c.h.bf16 %v1852_v47 }
 0x106   :  { %v1933_v62 = vpop.f32.mrf.mxu0 }
 0x107   :  { %v799_v0 = vpack.c.bf16 %v771_v59, %v770_v58  ;;  %v740_v2 = vadd.f32 %v1932_v60, %v1639_v61 }
 0x108   :  { %v1934_v1 = vpop.f32.mrf.mxu0 }
 0x109   :  { %v1935_v3 = vadd.f32 %v1934_v1, %v1933_v62  ;;  %971 = vmatmul.mubr.bf16.gmra.mxu1 %v799_v0  ;;  %v772_v8 = vmax.f32 %v740_v2, 0.0  ;;  %v1853_v62 = vld [vmem:[%s2477_s2 + $0x48] sm:$0xff]  }
 0x10a   :  { %v1936_v4 = vpop.f32.mrf.mxu0  ;;  %980 = vmatprep.mubr.bf16.mxu1 %v2091_v55 }
 0x10b   :  { %v741_v6 = vadd.f32 %v1935_v3, %v1640_v63 }
 0x10c   :  { %v1937_v7 = vpop.f32.mrf.mxu0 }
 0x10d   :  { %v773_v9 = vmax.f32 %v741_v6, 0.0  ;;  %v1938_v10 = vadd.f32 %v1937_v7, %v1936_v4  ;;  %v1659_v4 = vunpack.c.l.bf16 %v1853_v62  ;;  %v1660_v6 = vunpack.c.h.bf16 %v1853_v62 }
 0x10e   :  { %v1939_v12 = vpop.f32.mrf.mxu0 }
 0x10f   :  { %v800_v14 = vpack.c.bf16 %v773_v9, %v772_v8  ;;  %v742_v16 = vadd.f32 %v1938_v10, %v1643_v11 }
 0x110   :  { %v1940_v15 = vpop.f32.mrf.mxu0 }
 0x111   :  { %v1941_v17 = vadd.f32 %v1940_v15, %v1939_v12  ;;  %981 = vmatmul.mubr.bf16.gmra.mxu1 %v800_v14  ;;  %v774_v22 = vmax.f32 %v742_v16, 0.0  ;;  %v1854_v12 = vld [vmem:[%s2477_s2 + $0x50] sm:$0xff]  }
 0x112   :  { %v1942_v18 = vpop.f32.mrf.mxu0  ;;  %990 = vmatprep.mubr.bf16.mxu1 %v2091_v55 }
 0x113   :  { %v743_v20 = vadd.f32 %v1941_v17, %v1644_v13 }
 0x114   :  { %v1943_v21 = vpop.f32.mrf.mxu0 }
 0x115   :  { %v775_v23 = vmax.f32 %v743_v20, 0.0  ;;  %v1944_v24 = vadd.f32 %v1943_v21, %v1942_v18  ;;  %v1663_v18 = vunpack.c.l.bf16 %v1854_v12  ;;  %v1664_v20 = vunpack.c.h.bf16 %v1854_v12 }
 0x116   :  { %v1945_v26 = vpop.f32.mrf.mxu0 }
 0x117   :  { %v801_v28 = vpack.c.bf16 %v775_v23, %v774_v22  ;;  %v744_v30 = vadd.f32 %v1944_v24, %v1647_v25 }
 0x118   :  { %v1946_v29 = vpop.f32.mrf.mxu0 }
 0x119   :  { %v1947_v31 = vadd.f32 %v1946_v29, %v1945_v26  ;;  %991 = vmatmul.mubr.bf16.gmra.mxu1 %v801_v28  ;;  %v776_v36 = vmax.f32 %v744_v30, 0.0  ;;  %v1855_v26 = vld [vmem:[%s2477_s2 + $0x58] sm:$0xff]  }
 0x11a   :  { %v1948_v32 = vpop.f32.mrf.mxu0  ;;  %1000 = vmatprep.mubr.bf16.mxu1 %v2091_v55 }
 0x11b   :  { %v745_v34 = vadd.f32 %v1947_v31, %v1648_v27 }
 0x11c   :  { %v1949_v35 = vpop.f32.mrf.mxu0 }
 0x11d   :  { %v777_v37 = vmax.f32 %v745_v34, 0.0  ;;  %v1950_v38 = vadd.f32 %v1949_v35, %v1948_v32  ;;  %v1667_v32 = vunpack.c.l.bf16 %v1855_v26  ;;  %v1668_v34 = vunpack.c.h.bf16 %v1855_v26 }
 0x11e   :  { %v1951_v40 = vpop.f32.mrf.mxu0 }
 0x11f   :  { %v802_v42 = vpack.c.bf16 %v777_v37, %v776_v36  ;;  %v746_v44 = vadd.f32 %v1950_v38, %v1651_v39 }
 0x120   :  { %v1952_v43 = vpop.f32.mrf.mxu0 }
 0x121   :  { %v1953_v45 = vadd.f32 %v1952_v43, %v1951_v40  ;;  %1001 = vmatmul.mubr.bf16.gmra.mxu1 %v802_v42  ;;  %v778_v50 = vmax.f32 %v746_v44, 0.0  ;;  %v1856_v40 = vld [vmem:[%s2477_s2 + $0x60] sm:$0xff]  }
 0x122   :  { %v1954_v46 = vpop.f32.mrf.mxu0  ;;  %1010 = vmatprep.mubr.bf16.mxu1 %v2091_v55 }
 0x123   :  { %v747_v48 = vadd.f32 %v1953_v45, %v1652_v41 }
 0x124   :  { %v1955_v49 = vpop.f32.mrf.mxu0 }
 0x125   :  { %v779_v51 = vmax.f32 %v747_v48, 0.0  ;;  %v1956_v52 = vadd.f32 %v1955_v49, %v1954_v46  ;;  %v1671_v46 = vunpack.c.l.bf16 %v1856_v40  ;;  %v1672_v48 = vunpack.c.h.bf16 %v1856_v40 }
 0x126   :  { %v1957_v54 = vpop.f32.mrf.mxu0 }
 0x127   :  { %v803_v57 = vpack.c.bf16 %v779_v51, %v778_v50  ;;  %v748_v59 = vadd.f32 %v1956_v52, %v1655_v53 }
 0x128   :  { %v1958_v58 = vpop.f32.mrf.mxu0 }
 0x129   :  { %v1959_v60 = vadd.f32 %v1958_v58, %v1957_v54  ;;  %1011 = vmatmul.mubr.bf16.gmra.mxu1 %v803_v57  ;;  %v780_v1 = vmax.f32 %v748_v59, 0.0  ;;  %v1857_v54 = vld [vmem:[%s2477_s2 + $0x68] sm:$0xff]  }
 0x12a   :  { %v1960_v61 = vpop.f32.mrf.mxu0  ;;  %1020 = vmatprep.mubr.bf16.mxu1 %v2091_v55 }
 0x12b   :  { %v749_v63 = vadd.f32 %v1959_v60, %v1656_v56 }
 0x12c   :  { %v1961_v0 = vpop.f32.mrf.mxu0 }
 0x12d   :  { %v781_v2 = vmax.f32 %v749_v63, 0.0  ;;  %v1962_v3 = vadd.f32 %v1961_v0, %v1960_v61  ;;  %v1675_v61 = vunpack.c.l.bf16 %v1857_v54  ;;  %v1676_v63 = vunpack.c.h.bf16 %v1857_v54 }
 0x12e   :  { %v1963_v5 = vpop.f32.mrf.mxu0 }
 0x12f   :  { %v804_v7 = vpack.c.bf16 %v781_v2, %v780_v1  ;;  %v750_v9 = vadd.f32 %v1962_v3, %v1659_v4 }
 0x130   :  { %v1964_v8 = vpop.f32.mrf.mxu0 }
 0x131   :  { %v1965_v10 = vadd.f32 %v1964_v8, %v1963_v5  ;;  %1021 = vmatmul.mubr.bf16.gmra.mxu1 %v804_v7  ;;  %v782_v15 = vmax.f32 %v750_v9, 0.0  ;;  %v1858_v5 = vld [vmem:[%s2477_s2 + $0x70] sm:$0xff]  }
 0x132   :  { %v1966_v11 = vpop.f32.mrf.mxu0  ;;  %1030 = vmatprep.mubr.bf16.mxu1 %v2091_v55 }
 0x133   :  { %v751_v13 = vadd.f32 %v1965_v10, %v1660_v6 }
 0x134   :  { %v1967_v14 = vpop.f32.mrf.mxu0 }
 0x135   :  { %v783_v16 = vmax.f32 %v751_v13, 0.0  ;;  %v1968_v17 = vadd.f32 %v1967_v14, %v1966_v11  ;;  %v1679_v11 = vunpack.c.l.bf16 %v1858_v5  ;;  %v1680_v13 = vunpack.c.h.bf16 %v1858_v5 }
 0x136   :  { %v1969_v19 = vpop.f32.mrf.mxu0 }
 0x137   :  { %v805_v21 = vpack.c.bf16 %v783_v16, %v782_v15  ;;  %v752_v23 = vadd.f32 %v1968_v17, %v1663_v18 }
 0x138   :  { %v1970_v22 = vpop.f32.mrf.mxu0 }
 0x139   :  { %v1971_v24 = vadd.f32 %v1970_v22, %v1969_v19  ;;  %1031 = vmatmul.mubr.bf16.gmra.mxu1 %v805_v21  ;;  %v784_v29 = vmax.f32 %v752_v23, 0.0  ;;  %v1859_v19 = vld [vmem:[%s2477_s2 + $0x78] sm:$0xff]  }
 0x13a   :  { %v1972_v25 = vpop.f32.mrf.mxu0  ;;  %1040 = vmatprep.mubr.bf16.mxu1 %v2091_v55 }
 0x13b   :  { %v753_v27 = vadd.f32 %v1971_v24, %v1664_v20 }
 0x13c   :  { %v1973_v28 = vpop.f32.mrf.mxu0 }
 0x13d   :  { %v785_v30 = vmax.f32 %v753_v27, 0.0  ;;  %v1974_v31 = vadd.f32 %v1973_v28, %v1972_v25  ;;  %v1683_v25 = vunpack.c.l.bf16 %v1859_v19  ;;  %v1684_v27 = vunpack.c.h.bf16 %v1859_v19 }
 0x13e   :  { %v1975_v33 = vpop.f32.mrf.mxu0 }
 0x13f   :  { %v806_v35 = vpack.c.bf16 %v785_v30, %v784_v29  ;;  %v754_v37 = vadd.f32 %v1974_v31, %v1667_v32 }
 0x140   :  { %v1976_v36 = vpop.f32.mrf.mxu0 }
 0x141   :  { %v1977_v38 = vadd.f32 %v1976_v36, %v1975_v33  ;;  %1041 = vmatmul.mubr.bf16.gmra.mxu1 %v806_v35  ;;  %v786_v43 = vmax.f32 %v754_v37, 0.0 }
 0x142   :  { %v1978_v39 = vpop.f32.mrf.mxu0  ;;  %1050 = vmatprep.mubr.bf16.mxu1 %v2091_v55 }
 0x143   :  { %v755_v41 = vadd.f32 %v1977_v38, %v1668_v34 }
 0x144   :  { %v1979_v42 = vpop.f32.mrf.mxu0 }
 0x145   :  { %v787_v44 = vmax.f32 %v755_v41, 0.0  ;;  %v1980_v45 = vadd.f32 %v1979_v42, %v1978_v39 }
 0x146   :  { %v1981_v47 = vpop.f32.mrf.mxu0 }
 0x147   :  { %v807_v49 = vpack.c.bf16 %v787_v44, %v786_v43  ;;  %v756_v51 = vadd.f32 %v1980_v45, %v1671_v46 }
 0x148   :  { %v1982_v50 = vpop.f32.mrf.mxu0 }
 0x149   :  { %v1983_v52 = vadd.f32 %v1982_v50, %v1981_v47  ;;  %1051 = vmatmul.mubr.bf16.gmra.mxu1 %v807_v49  ;;  %v788_v58 = vmax.f32 %v756_v51, 0.0 }
 0x14a   :  { %v1984_v53 = vpop.f32.mrf.mxu0  ;;  %1060 = vmatprep.mubr.bf16.mxu1 %v2091_v55 }
 0x14b   :  { %v757_v56 = vadd.f32 %v1983_v52, %v1672_v48 }
 0x14c   :  { %v1985_v57 = vpop.f32.mrf.mxu0 }
 0x14d   :  { %v789_v59 = vmax.f32 %v757_v56, 0.0  ;;  %v1986_v60 = vadd.f32 %v1985_v57, %v1984_v53 }
 0x14e   :  { %v1987_v62 = vpop.f32.mrf.mxu0 }
 0x14f   :  { %v808_v0 = vpack.c.bf16 %v789_v59, %v788_v58  ;;  %v758_v2 = vadd.f32 %v1986_v60, %v1675_v61 }
 0x150   :  { %v1988_v1 = vpop.f32.mrf.mxu0 }
 0x151   :  { %v1989_v3 = vadd.f32 %v1988_v1, %v1987_v62  ;;  %1061 = vmatmul.mubr.bf16.gmra.mxu1 %v808_v0  ;;  %v790_v8 = vmax.f32 %v758_v2, 0.0 }
 0x152   :  { %v1990_v4 = vpop.f32.mrf.mxu0  ;;  %1070 = vmatprep.mubr.bf16.mxu1 %v2091_v55 }
 0x153   :  { %v759_v6 = vadd.f32 %v1989_v3, %v1676_v63 }
 0x154   :  { %v1991_v7 = vpop.f32.mrf.mxu0 }
 0x155   :  { %v791_v9 = vmax.f32 %v759_v6, 0.0  ;;  %v1992_v10 = vadd.f32 %v1991_v7, %v1990_v4 }
 0x156   :  { %v1993_v12 = vpop.f32.mrf.mxu0 }
 0x157   :  { %v809_v14 = vpack.c.bf16 %v791_v9, %v790_v8  ;;  %v760_v16 = vadd.f32 %v1992_v10, %v1679_v11 }
 0x158   :  { %v1994_v15 = vpop.f32.mrf.mxu0 }
 0x159   :  { %v1995_v17 = vadd.f32 %v1994_v15, %v1993_v12  ;;  %1071 = vmatmul.mubr.bf16.gmra.mxu1 %v809_v14  ;;  %v792_v22 = vmax.f32 %v760_v16, 0.0 }
 0x15a   :  { %v1996_v18 = vpop.f32.mrf.mxu0  ;;  %1080 = vmatprep.mubr.bf16.mxu1 %v2091_v55 }
 0x15b   :  { %v761_v20 = vadd.f32 %v1995_v17, %v1680_v13 }
 0x15c   :  { %v1997_v21 = vpop.f32.mrf.mxu0 }
 0x15d   :  { %v793_v23 = vmax.f32 %v761_v20, 0.0  ;;  %v1998_v24 = vadd.f32 %v1997_v21, %v1996_v18 }
 0x15e   :  { %v1999_v26 = vpop.f32.mrf.mxu0 }
 0x15f   :  { %v810_v28 = vpack.c.bf16 %v793_v23, %v792_v22  ;;  %v762_v30 = vadd.f32 %v1998_v24, %v1683_v25 }
 0x160   :  { %v2000_v29 = vpop.f32.mrf.mxu0 }
 0x161   :  { %v2001_v31 = vadd.f32 %v2000_v29, %v1999_v26  ;;  %1081 = vmatmul.mubr.bf16.gmra.mxu1 %v810_v28  ;;  %v794_v33 = vmax.f32 %v762_v30, 0.0 }
 0x162   :  { %1090 = vmatprep.mubr.bf16.mxu1 %v2091_v55 }
 0x163   :  { %v763_v32 = vadd.f32 %v2001_v31, %v1684_v27 }
 0x165   :  { %v795_v34 = vmax.f32 %v763_v32, 0.0 }
 0x167   :  { %v811_v35 = vpack.c.bf16 %v795_v34, %v794_v33 }
 0x169   :  { %1091 = vmatmul.mubr.bf16.gmra.mxu1 %v811_v35 }
 0x1b1   :  { %v942_v36 = vpop.f32.mrf.mxu1 }
 0x1b3   :  { %v944_v37 = vpop.f32.mrf.mxu1 }
 0x1b5   :  { %v946_v38 = vpop.f32.mrf.mxu1 }
 0x1b6   :  { %v1688_v39 = vpack.c.bf16 %v946_v38, %v942_v36 }
 0x1b7   :  { %v948_v40 = vpop.f32.mrf.mxu1 }
 0x1b8   :  { %1689 = vst [vmem:[%s2478_s4] sm:$0xff] %v1688_v39   ;;  %v1768_v41 = vpack.c.bf16 %v948_v40, %v944_v37 }
 0x1b9   :  { %v952_v42 = vpop.f32.mrf.mxu1 }
 0x1ba   :  { %1769 = vst [vmem:[%s2479_s5] sm:$0xff] %v1768_v41  }
 0x1bb   :  { %v954_v55 = vpop.f32.mrf.mxu1 }
 0x1bd   :  { %v956_v43 = vpop.f32.mrf.mxu1 }
 0x1be   :  { %v1693_v44 = vpack.c.bf16 %v956_v43, %v952_v42 }
 0x1bf   :  { %v958_v45 = vpop.f32.mrf.mxu1 }
 0x1c0   :  { %1860 = vst [vmem:[%s2478_s4 + $0x8] sm:$0xff] %v1693_v44   ;;  %v1773_v46 = vpack.c.bf16 %v958_v45, %v954_v55 }
 0x1c1   :  { %v962_v47 = vpop.f32.mrf.mxu1 }
 0x1c2   :  { %1875 = vst [vmem:[%s2479_s5 + $0x8] sm:$0xff] %v1773_v46  }
 0x1c3   :  { %v964_v48 = vpop.f32.mrf.mxu1 }
 0x1c5   :  { %v966_v49 = vpop.f32.mrf.mxu1 }
 0x1c6   :  { %v1698_v50 = vpack.c.bf16 %v966_v49, %v962_v47 }
 0x1c7   :  { %v968_v51 = vpop.f32.mrf.mxu1 }
 0x1c8   :  { %1861 = vst [vmem:[%s2478_s4 + $0x10] sm:$0xff] %v1698_v50   ;;  %v1778_v52 = vpack.c.bf16 %v968_v51, %v964_v48 }
 0x1c9   :  { %v972_v53 = vpop.f32.mrf.mxu1 }
 0x1ca   :  { %1876 = vst [vmem:[%s2479_s5 + $0x10] sm:$0xff] %v1778_v52  }
 0x1cb   :  { %v974_v54 = vpop.f32.mrf.mxu1 }
 0x1cd   :  { %v976_v56 = vpop.f32.mrf.mxu1 }
 0x1ce   :  { %v1703_v57 = vpack.c.bf16 %v976_v56, %v972_v53 }
 0x1cf   :  { %v978_v58 = vpop.f32.mrf.mxu1 }
 0x1d0   :  { %1862 = vst [vmem:[%s2478_s4 + $0x18] sm:$0xff] %v1703_v57   ;;  %v1783_v59 = vpack.c.bf16 %v978_v58, %v974_v54 }
 0x1d1   :  { %v982_v60 = vpop.f32.mrf.mxu1 }
 0x1d2   :  { %1877 = vst [vmem:[%s2479_s5 + $0x18] sm:$0xff] %v1783_v59  }
 0x1d3   :  { %v984_v61 = vpop.f32.mrf.mxu1 }
 0x1d5   :  { %v986_v62 = vpop.f32.mrf.mxu1 }
 0x1d6   :  { %v1708_v63 = vpack.c.bf16 %v986_v62, %v982_v60 }
 0x1d7   :  { %v988_v0 = vpop.f32.mrf.mxu1 }
 0x1d8   :  { %1863 = vst [vmem:[%s2478_s4 + $0x20] sm:$0xff] %v1708_v63   ;;  %v1788_v1 = vpack.c.bf16 %v988_v0, %v984_v61 }
 0x1d9   :  { %v992_v2 = vpop.f32.mrf.mxu1 }
 0x1da   :  { %1878 = vst [vmem:[%s2479_s5 + $0x20] sm:$0xff] %v1788_v1  }
 0x1db   :  { %v994_v3 = vpop.f32.mrf.mxu1 }
 0x1dd   :  { %v996_v4 = vpop.f32.mrf.mxu1 }
 0x1de   :  { %v1713_v5 = vpack.c.bf16 %v996_v4, %v992_v2 }
 0x1df   :  { %v998_v6 = vpop.f32.mrf.mxu1 }
 0x1e0   :  { %1864 = vst [vmem:[%s2478_s4 + $0x28] sm:$0xff] %v1713_v5   ;;  %v1793_v7 = vpack.c.bf16 %v998_v6, %v994_v3 }
 0x1e1   :  { %v1002_v8 = vpop.f32.mrf.mxu1 }
 0x1e2   :  { %1879 = vst [vmem:[%s2479_s5 + $0x28] sm:$0xff] %v1793_v7  }
 0x1e3   :  { %v1004_v9 = vpop.f32.mrf.mxu1 }
 0x1e5   :  { %v1006_v10 = vpop.f32.mrf.mxu1 }
 0x1e6   :  { %v1718_v11 = vpack.c.bf16 %v1006_v10, %v1002_v8 }
 0x1e7   :  { %v1008_v12 = vpop.f32.mrf.mxu1 }
 0x1e8   :  { %1865 = vst [vmem:[%s2478_s4 + $0x30] sm:$0xff] %v1718_v11   ;;  %v1798_v13 = vpack.c.bf16 %v1008_v12, %v1004_v9 }
 0x1e9   :  { %v1012_v14 = vpop.f32.mrf.mxu1 }
 0x1ea   :  { %1880 = vst [vmem:[%s2479_s5 + $0x30] sm:$0xff] %v1798_v13  }
 0x1eb   :  { %v1014_v15 = vpop.f32.mrf.mxu1 }
 0x1ed   :  { %v1016_v16 = vpop.f32.mrf.mxu1 }
 0x1ee   :  { %v1723_v17 = vpack.c.bf16 %v1016_v16, %v1012_v14 }
 0x1ef   :  { %v1018_v18 = vpop.f32.mrf.mxu1 }
 0x1f0   :  { %1866 = vst [vmem:[%s2478_s4 + $0x38] sm:$0xff] %v1723_v17   ;;  %v1803_v19 = vpack.c.bf16 %v1018_v18, %v1014_v15 }
 0x1f1   :  { %v1022_v20 = vpop.f32.mrf.mxu1 }
 0x1f2   :  { %1881 = vst [vmem:[%s2479_s5 + $0x38] sm:$0xff] %v1803_v19  }
 0x1f3   :  { %v1024_v21 = vpop.f32.mrf.mxu1 }
 0x1f5   :  { %v1026_v22 = vpop.f32.mrf.mxu1 }
 0x1f6   :  { %v1728_v23 = vpack.c.bf16 %v1026_v22, %v1022_v20 }
 0x1f7   :  { %v1028_v24 = vpop.f32.mrf.mxu1 }
 0x1f8   :  { %1867 = vst [vmem:[%s2478_s4 + $0x40] sm:$0xff] %v1728_v23   ;;  %v1808_v25 = vpack.c.bf16 %v1028_v24, %v1024_v21 }
 0x1f9   :  { %v1032_v26 = vpop.f32.mrf.mxu1 }
 0x1fa   :  { %1882 = vst [vmem:[%s2479_s5 + $0x40] sm:$0xff] %v1808_v25  }
 0x1fb   :  { %v1034_v27 = vpop.f32.mrf.mxu1 }
 0x1fd   :  { %v1036_v28 = vpop.f32.mrf.mxu1 }
 0x1fe   :  { %v1733_v29 = vpack.c.bf16 %v1036_v28, %v1032_v26 }
 0x1ff   :  { %v1038_v30 = vpop.f32.mrf.mxu1 }
 0x200   :  { %1868 = vst [vmem:[%s2478_s4 + $0x48] sm:$0xff] %v1733_v29   ;;  %v1813_v31 = vpack.c.bf16 %v1038_v30, %v1034_v27 }
 0x201   :  { %v1042_v32 = vpop.f32.mrf.mxu1 }
 0x202   :  { %1883 = vst [vmem:[%s2479_s5 + $0x48] sm:$0xff] %v1813_v31  }
 0x203   :  { %v1044_v33 = vpop.f32.mrf.mxu1 }
 0x205   :  { %v1046_v34 = vpop.f32.mrf.mxu1 }
 0x206   :  { %v1738_v35 = vpack.c.bf16 %v1046_v34, %v1042_v32 }
 0x207   :  { %v1048_v36 = vpop.f32.mrf.mxu1 }
 0x208   :  { %1869 = vst [vmem:[%s2478_s4 + $0x50] sm:$0xff] %v1738_v35   ;;  %v1818_v37 = vpack.c.bf16 %v1048_v36, %v1044_v33 }
 0x209   :  { %v1052_v38 = vpop.f32.mrf.mxu1 }
 0x20a   :  { %1884 = vst [vmem:[%s2479_s5 + $0x50] sm:$0xff] %v1818_v37  }
 0x20b   :  { %v1054_v39 = vpop.f32.mrf.mxu1 }
 0x20d   :  { %v1056_v40 = vpop.f32.mrf.mxu1 }
 0x20e   :  { %v1743_v41 = vpack.c.bf16 %v1056_v40, %v1052_v38 }
 0x20f   :  { %v1058_v42 = vpop.f32.mrf.mxu1 }
 0x210   :  { %1870 = vst [vmem:[%s2478_s4 + $0x58] sm:$0xff] %v1743_v41   ;;  %v1823_v55 = vpack.c.bf16 %v1058_v42, %v1054_v39 }
 0x211   :  { %v1062_v43 = vpop.f32.mrf.mxu1 }
 0x212   :  { %1885 = vst [vmem:[%s2479_s5 + $0x58] sm:$0xff] %v1823_v55  }
 0x213   :  { %v1064_v44 = vpop.f32.mrf.mxu1 }
 0x215   :  { %v1066_v45 = vpop.f32.mrf.mxu1 }
 0x216   :  { %v1748_v46 = vpack.c.bf16 %v1066_v45, %v1062_v43 }
 0x217   :  { %v1068_v47 = vpop.f32.mrf.mxu1 }
 0x218   :  { %1871 = vst [vmem:[%s2478_s4 + $0x60] sm:$0xff] %v1748_v46   ;;  %v1828_v48 = vpack.c.bf16 %v1068_v47, %v1064_v44 }
 0x219   :  { %v1072_v49 = vpop.f32.mrf.mxu1 }
 0x21a   :  { %1886 = vst [vmem:[%s2479_s5 + $0x60] sm:$0xff] %v1828_v48  }
 0x21b   :  { %v1074_v50 = vpop.f32.mrf.mxu1 }
 0x21d   :  { %v1076_v51 = vpop.f32.mrf.mxu1 }
 0x21e   :  { %v1753_v52 = vpack.c.bf16 %v1076_v51, %v1072_v49 }
 0x21f   :  { %v1078_v53 = vpop.f32.mrf.mxu1 }
 0x220   :  { %1872 = vst [vmem:[%s2478_s4 + $0x68] sm:$0xff] %v1753_v52   ;;  %v1833_v54 = vpack.c.bf16 %v1078_v53, %v1074_v50 }
 0x221   :  { %v1082_v56 = vpop.f32.mrf.mxu1 }
 0x222   :  { %1887 = vst [vmem:[%s2479_s5 + $0x68] sm:$0xff] %v1833_v54  }
 0x223   :  { %v1084_v57 = vpop.f32.mrf.mxu1 }
 0x225   :  { %v1086_v58 = vpop.f32.mrf.mxu1 }
 0x226   :  { %v1758_v59 = vpack.c.bf16 %v1086_v58, %v1082_v56 }
 0x227   :  { %v1088_v60 = vpop.f32.mrf.mxu1 }
 0x228   :  { %1873 = vst [vmem:[%s2478_s4 + $0x70] sm:$0xff] %v1758_v59   ;;  %v1838_v61 = vpack.c.bf16 %v1088_v60, %v1084_v57 }
 0x229   :  { %v1092_v62 = vpop.f32.mrf.mxu1 }
 0x22a   :  { %1888 = vst [vmem:[%s2479_s5 + $0x70] sm:$0xff] %v1838_v61  }
 0x22b   :  { %v1094_v63 = vpop.f32.mrf.mxu1 }
 0x22d   :  { %v1096_v0 = vpop.f32.mrf.mxu1 }
 0x22e   :  { %v1763_v1 = vpack.c.bf16 %v1096_v0, %v1092_v62 }
 0x22f   :  { %v1098_v2 = vpop.f32.mrf.mxu1 }
 0x230   :  { %1874 = vst [vmem:[%s2478_s4 + $0x78] sm:$0xff] %v1763_v1   ;;  %v1843_v3 = vpack.c.bf16 %v1098_v2, %v1094_v63 }
 0x232   :  { %1889 = vst [vmem:[%s2479_s5 + $0x78] sm:$0xff] %v1843_v3  }

// kernel: graphsage_forward.5
= control target key start
LH: loop header
LB: loop body
LE: loop exit
PB: predicated region body
PF: predicated region fallthrough
CT: control target
= control target key end

     0   :  { %s2648_s1 = inlined_call_operand.vmem [shape: bf16[256,128], index: 1, kind: input, shape index: {}]   ;;  %s2649_s0 = inlined_call_operand.vmem [shape: bf16[256,256], index: 0, kind: input, shape index: {}]   ;;  %s2650_s3 = inlined_call_operand.vmem [shape: bf16[128,128], index: 3, kind: input, shape index: {}]   ;;  %s2651_s2 = inlined_call_operand.vmem [shape: bf16[256,128], index: 2, kind: input, shape index: {}]   ;;  %s2652_s4 = inlined_call_operand.vmem [shape: f32[256,128], index: 4, kind: output, shape index: {}]  }
   0x1   :  { %v1761_v0 = vld [vmem:[%s2648_s1 + $0x78] sm:$0xff]   ;;  %v1763_v2 = vld [vmem:[%s2648_s1 + $0x70] sm:$0xff]   ;;  %v1765_v4 = vld [vmem:[%s2648_s1 + $0x68] sm:$0xff]  }
   0x2   :  { %v1762_v1 = vld [vmem:[%s2648_s1 + $0x38] sm:$0xff]   ;;  %1561 = vmatprep.subr.bf16.mxu0 %v1761_v0  ;;  %1745 = vmatprep.subr.bf16.mxu1 %v1761_v0  ;;  %v1764_v3 = vld [vmem:[%s2648_s1 + $0x30] sm:$0xff]   ;;  %v1766_v5 = vld [vmem:[%s2648_s1 + $0x28] sm:$0xff]  }
   0x3   :  { %1562 = vmatpush3.bf16.msra.mxu0 %v1762_v1  ;;  %1753 = vmatpush3.bf16.msra.mxu1 %v1762_v1  ;;  %v1767_v6 = vld [vmem:[%s2648_s1 + $0x60] sm:$0xff]   ;;  %v1769_v8 = vld [vmem:[%s2648_s1 + $0x58] sm:$0xff]   ;;  %v1771_v10 = vld [vmem:[%s2648_s1 + $0x50] sm:$0xff]  }
   0x4   :  { %1563 = vmatprep.subr.bf16.mxu0 %v1763_v2  ;;  %1746 = vmatprep.subr.bf16.mxu1 %v1763_v2  ;;  %v1768_v7 = vld [vmem:[%s2648_s1 + $0x20] sm:$0xff]   ;;  %v1770_v9 = vld [vmem:[%s2648_s1 + $0x18] sm:$0xff]   ;;  %v1772_v12 = vld [vmem:[%s2648_s1 + $0x10] sm:$0xff]  }
   0x5   :  { %v1779_v11 = vld [vmem:[%s2649_s0 + $0x4] ss:$8 sps:$4 sm:$0xff]   ;;  %v1777_v17 = vld [vmem:[%s2649_s0] ss:$8 sps:$4 sm:$0xff]   ;;  %v1780_v19 = vld [vmem:[%s2649_s0 + $0x14] ss:$8 sps:$4 sm:$0xff]  }
   0x6   :  { %438 = vmatprep.mubr.bf16.mxu0 %v1779_v11  ;;  %v1773_v13 = vld [vmem:[%s2648_s1 + $0x48] sm:$0xff]   ;;  %v1775_v15 = vld [vmem:[%s2648_s1 + $0x40] sm:$0xff]   ;;  %v1813_v21 = vld [vmem:[%s2649_s0 + $0xd4] ss:$8 sps:$4 sm:$0xff]  }
   0x7   :  { %1564 = vmatpush3.bf16.msra.mxu0 %v1764_v3  ;;  %1754 = vmatpush3.bf16.msra.mxu1 %v1764_v3  ;;  %v1774_v14 = vld [vmem:[%s2648_s1 + $0x8] sm:$0xff]   ;;  %v1776_v16 = vld [vmem:[%s2648_s1] sm:$0xff]   ;;  %v1782_v22 = vld [vmem:[%s2649_s0 + $0x10] ss:$8 sps:$4 sm:$0xff]  }
   0x8   :  { %1565 = vmatprep.subr.bf16.mxu0 %v1765_v4  ;;  %1747 = vmatprep.subr.bf16.mxu1 %v1765_v4  ;;  %v1809_v18 = vld [vmem:[%s2649_s0 + $0xc4] ss:$8 sps:$4 sm:$0xff]   ;;  %v1807_v20 = vld [vmem:[%s2649_s0 + $0xc0] ss:$8 sps:$4 sm:$0xff]   ;;  %v1815_v24 = vld [vmem:[%s2649_s0 + $0xd0] ss:$8 sps:$4 sm:$0xff]  }
   0x9   :  { %534 = vmatprep.mubr.bf16.mxu1 %v1809_v18  ;;  %v1783_v23 = vld [vmem:[%s2649_s0 + $0x24] ss:$8 sps:$4 sm:$0xff]   ;;  %v1825_v26 = vld [vmem:[%s2650_s3 + $0x38] sm:$0xff]   ;;  %v1826_v27 = vld [vmem:[%s2650_s3 + $0x30] sm:$0xff]  }
   0xa   :  { %v1819_v25 = vld [vmem:[%s2649_s0 + $0xe4] ss:$8 sps:$4 sm:$0xff]   ;;  %v1785_v29 = vld [vmem:[%s2649_s0 + $0x20] ss:$8 sps:$4 sm:$0xff]   ;;  %v1786_v30 = vld [vmem:[%s2649_s0 + $0x34] ss:$8 sps:$4 sm:$0xff]  }
   0xb   :  { %1566 = vmatpush3.bf16.msra.mxu0 %v1766_v5  ;;  %1755 = vmatpush3.bf16.msra.mxu1 %v1766_v5  ;;  %v1827_v28 = vld [vmem:[%s2650_s3 + $0x28] sm:$0xff]   ;;  %v1822_v32 = vld [vmem:[%s2649_s0 + $0xf4] ss:$8 sps:$4 sm:$0xff]   ;;  %v1788_v33 = vld [vmem:[%s2649_s0 + $0x30] ss:$8 sps:$4 sm:$0xff]  }
   0xc   :  { %1567 = vmatprep.subr.bf16.mxu0 %v1767_v6  ;;  %1748 = vmatprep.subr.bf16.mxu1 %v1767_v6  ;;  %v1821_v31 = vld [vmem:[%s2649_s0 + $0xe0] ss:$8 sps:$4 sm:$0xff]   ;;  %v1789_v34 = vld [vmem:[%s2649_s0 + $0x44] ss:$8 sps:$4 sm:$0xff]   ;;  %v1824_v35 = vld [vmem:[%s2649_s0 + $0xf0] ss:$8 sps:$4 sm:$0xff]  }
   0xd   :  { %v1791_v36 = vld [vmem:[%s2649_s0 + $0x40] ss:$8 sps:$4 sm:$0xff]   ;;  %v1792_v37 = vld [vmem:[%s2649_s0 + $0x54] ss:$8 sps:$4 sm:$0xff]   ;;  %v1794_v38 = vld [vmem:[%s2649_s0 + $0x50] ss:$8 sps:$4 sm:$0xff]  }
   0xe   :  { %v1795_v39 = vld [vmem:[%s2649_s0 + $0x64] ss:$8 sps:$4 sm:$0xff]   ;;  %v1797_v40 = vld [vmem:[%s2649_s0 + $0x60] ss:$8 sps:$4 sm:$0xff]   ;;  %v1798_v41 = vld [vmem:[%s2649_s0 + $0x74] ss:$8 sps:$4 sm:$0xff]  }
   0xf   :  { %1568 = vmatpush3.bf16.msra.mxu0 %v1768_v7  ;;  %1756 = vmatpush3.bf16.msra.mxu1 %v1768_v7  ;;  %v1800_v42 = vld [vmem:[%s2649_s0 + $0x70] ss:$8 sps:$4 sm:$0xff]   ;;  %v1801_v43 = vld [vmem:[%s2649_s0 + $0x84] ss:$8 sps:$4 sm:$0xff]   ;;  %v1803_v44 = vld [vmem:[%s2649_s0 + $0x80] ss:$8 sps:$4 sm:$0xff]  }
  0x10   :  { %1569 = vmatprep.subr.bf16.mxu0 %v1769_v8  ;;  %1749 = vmatprep.subr.bf16.mxu1 %v1769_v8  ;;  %v1804_v45 = vld [vmem:[%s2649_s0 + $0x94] ss:$8 sps:$4 sm:$0xff]   ;;  %v1828_v46 = vld [vmem:[%s2650_s3 + $0x20] sm:$0xff]   ;;  %v1806_v47 = vld [vmem:[%s2649_s0 + $0x90] ss:$8 sps:$4 sm:$0xff]  }
  0x11   :  { %v1810_v48 = vld [vmem:[%s2649_s0 + $0xa4] ss:$8 sps:$4 sm:$0xff]   ;;  %v1829_v49 = vld [vmem:[%s2650_s3 + $0x18] sm:$0xff]   ;;  %v1830_v50 = vld [vmem:[%s2650_s3 + $0x10] sm:$0xff]  }
  0x12   :  { %v1812_v51 = vld [vmem:[%s2649_s0 + $0xa0] ss:$8 sps:$4 sm:$0xff]   ;;  %v1816_v52 = vld [vmem:[%s2649_s0 + $0xb4] ss:$8 sps:$4 sm:$0xff]   ;;  %v1818_v55 = vld [vmem:[%s2649_s0 + $0xb0] ss:$8 sps:$4 sm:$0xff]  }
  0x13   :  { %1570 = vmatpush3.bf16.msra.mxu0 %v1770_v9  ;;  %1757 = vmatpush3.bf16.msra.mxu1 %v1770_v9  ;;  %v1831_v53 = vld [vmem:[%s2650_s3 + $0x8] sm:$0xff]   ;;  %v1832_v54 = vld [vmem:[%s2650_s3] sm:$0xff]  }
  0x14   :  { %1571 = vmatprep.subr.bf16.mxu0 %v1771_v10  ;;  %1750 = vmatprep.subr.bf16.mxu1 %v1771_v10  ;;  %v1483_v57 = vld [vmem:[%s2651_s2] sm:$0xff]   ;;  %v1546_v3 = vld [vmem:[%s2651_s2 + $0x8] sm:$0xff]  }
  0x15   :  { %v1484_v60 = vunpack.c.l.bf16 %v1483_v57  ;;  %v1485_v62 = vunpack.c.h.bf16 %v1483_v57  ;;  %v1488_v9 = vunpack.c.l.bf16 %v1546_v3  ;;  %v1489_v11 = vunpack.c.h.bf16 %v1546_v3 }
  0x17   :  { %1572 = vmatpush3.bf16.msra.mxu0 %v1772_v12  ;;  %1758 = vmatpush3.bf16.msra.mxu1 %v1772_v12 }
  0x18   :  { %1573 = vmatprep.subr.bf16.mxu0 %v1773_v13  ;;  %1751 = vmatprep.subr.bf16.mxu1 %v1773_v13 }
  0x1b   :  { %1574 = vmatpush3.bf16.msra.mxu0 %v1774_v14  ;;  %1759 = vmatpush3.bf16.msra.mxu1 %v1774_v14 }
  0x1c   :  { %1575 = vmatprep.subr.bf16.mxu0 %v1775_v15  ;;  %1752 = vmatprep.subr.bf16.mxu1 %v1775_v15 }
  0x1f   :  { %1576 = vmatpush3.bf16.msra.mxu0 %v1776_v16  ;;  %1760 = vmatpush3.bf16.msra.mxu1 %v1776_v16 }
  0x20   :  { %1697 = vmatprep.subr.bf16.mxu1 %v1825_v26 }
  0x22   :  { %439 = vmatmul.mubr.bf16.vlgmr.msra.gmra.mxu0 %v1777_v17  ;;  %535 = vmatmul.mubr.bf16.vlgmr.msra.gmra.mxu1 %v1807_v20  ;;  %v1547_v17 = vld [vmem:[%s2651_s2 + $0x10] sm:$0xff]  }
  0x23   :  { %446 = vmatprep.mubr.bf16.mxu0 %v1780_v19  ;;  %542 = vmatprep.mubr.bf16.mxu1 %v1813_v21 }
  0x24   :  { %1698 = vmatpush3.bf16.msra.mxu1 %v1825_v26  ;;  %v1493_v26 = vunpack.c.h.bf16 %v1547_v17 }
  0x25   :  { %1699 = vmatprep.subr.bf16.mxu1 %v1826_v27 }
  0x28   :  { %1700 = vmatpush3.bf16.msra.mxu1 %v1826_v27 }
  0x29   :  { %1701 = vmatprep.subr.bf16.mxu1 %v1827_v28 }
  0x2a   :  { %447 = vmatmul.mubr.bf16.gmra.mxu0 %v1782_v22  ;;  %543 = vmatmul.mubr.bf16.gmra.mxu1 %v1815_v24 }
  0x2b   :  { %454 = vmatprep.mubr.bf16.mxu0 %v1783_v23  ;;  %550 = vmatprep.mubr.bf16.mxu1 %v1819_v25  ;;  %v1492_v23 = vunpack.c.l.bf16 %v1547_v17 }
  0x2c   :  { %1702 = vmatpush3.bf16.msra.mxu1 %v1827_v28 }
  0x2d   :  { %1703 = vmatprep.subr.bf16.mxu1 %v1828_v46 }
  0x30   :  { %1704 = vmatpush3.bf16.msra.mxu1 %v1828_v46 }
  0x31   :  { %1705 = vmatprep.subr.bf16.mxu1 %v1829_v49 }
  0x32   :  { %455 = vmatmul.mubr.bf16.gmra.mxu0 %v1785_v29  ;;  %551 = vmatmul.mubr.bf16.gmra.mxu1 %v1821_v31  ;;  %v1548_v31 = vld [vmem:[%s2651_s2 + $0x18] sm:$0xff]  }
  0x33   :  { %462 = vmatprep.mubr.bf16.mxu0 %v1786_v30  ;;  %558 = vmatprep.mubr.bf16.mxu1 %v1822_v32 }
  0x34   :  { %1706 = vmatpush3.bf16.msra.mxu1 %v1829_v49 }
  0x35   :  { %1707 = vmatprep.subr.bf16.mxu1 %v1830_v50 }
  0x38   :  { %1708 = vmatpush3.bf16.msra.mxu1 %v1830_v50 }
  0x39   :  { %1709 = vmatprep.subr.bf16.mxu1 %v1831_v53 }
  0x3a   :  { %463 = vmatmul.mubr.bf16.gmra.mxu0 %v1788_v33  ;;  %559 = vmatmul.mubr.bf16.gmra.mxu1 %v1824_v35 }
  0x3b   :  { %470 = vmatprep.mubr.bf16.mxu0 %v1789_v34 }
  0x3c   :  { %1710 = vmatpush3.bf16.msra.mxu1 %v1831_v53 }
  0x3d   :  { %1711 = vmatprep.subr.bf16.mxu1 %v1832_v54 }
  0x40   :  { %1712 = vmatpush3.bf16.msra.mxu1 %v1832_v54 }
  0x42   :  { %471 = vmatmul.mubr.bf16.gmra.mxu0 %v1791_v36 }
  0x43   :  { %478 = vmatprep.mubr.bf16.mxu0 %v1792_v37  ;;  %v1496_v37 = vunpack.c.l.bf16 %v1548_v31 }
  0x4a   :  { %479 = vmatmul.mubr.bf16.gmra.mxu0 %v1794_v38 }
  0x4b   :  { %486 = vmatprep.mubr.bf16.mxu0 %v1795_v39  ;;  %v1497_v39 = vunpack.c.h.bf16 %v1548_v31 }
  0x52   :  { %487 = vmatmul.mubr.bf16.gmra.mxu0 %v1797_v40 }
  0x53   :  { %494 = vmatprep.mubr.bf16.mxu0 %v1798_v41 }
  0x5a   :  { %495 = vmatmul.mubr.bf16.gmra.mxu0 %v1800_v42 }
  0x5b   :  { %502 = vmatprep.mubr.bf16.mxu0 %v1801_v43 }
  0x62   :  { %503 = vmatmul.mubr.bf16.gmra.mxu0 %v1803_v44 }
  0x63   :  { %510 = vmatprep.mubr.bf16.mxu0 %v1804_v45  ;;  %v1549_v45 = vld [vmem:[%s2651_s2 + $0x20] sm:$0xff]  }
  0x64   :  { %v1501_v53 = vunpack.c.h.bf16 %v1549_v45 }
  0x6a   :  { %511 = vmatmul.mubr.bf16.gmra.mxu0 %v1806_v47 }
  0x6b   :  { %518 = vmatprep.mubr.bf16.mxu0 %v1810_v48 }
  0x72   :  { %519 = vmatmul.mubr.bf16.gmra.mxu0 %v1812_v51  ;;  %v1500_v51 = vunpack.c.l.bf16 %v1549_v45 }
  0x73   :  { %526 = vmatprep.mubr.bf16.mxu0 %v1816_v52 }
  0x7a   :  { %527 = vmatmul.mubr.bf16.gmra.mxu0 %v1818_v55 }
  0xe2   :  { %v1577_v56 = vpop.f32.mrf.mxu0 }
  0xe4   :  { %v1578_v58 = vpop.f32.mrf.mxu0 }
  0xe5   :  { %v1579_v59 = vadd.f32 %v1578_v58, %v1577_v56 }
  0xe6   :  { %v1580_v61 = vpop.f32.mrf.mxu0 }
  0xe7   :  { %v730_v0 = vadd.f32 %v1579_v59, %v1484_v60  ;;  %v1550_v59 = vld [vmem:[%s2651_s2 + $0x28] sm:$0xff]  }
  0xe8   :  { %v1581_v63 = vpop.f32.mrf.mxu0 }
  0xe9   :  { %v1582_v1 = vadd.f32 %v1581_v63, %v1580_v61  ;;  %v762_v6 = vmax.f32 %v730_v0, 0.0 }
  0xea   :  { %v1583_v2 = vpop.f32.mrf.mxu0 }
  0xeb   :  { %v731_v4 = vadd.f32 %v1582_v1, %v1485_v62  ;;  %v2172_v62 = vpop.f32.mrf.mxu1 }
  0xec   :  { %v1584_v5 = vpop.f32.mrf.mxu0 }
  0xed   :  { %v763_v7 = vmax.f32 %v731_v4, 0.0  ;;  %v1585_v8 = vadd.f32 %v1584_v5, %v1583_v2  ;;  %v1504_v2 = vunpack.c.l.bf16 %v1550_v59  ;;  %v1505_v4 = vunpack.c.h.bf16 %v1550_v59  ;;  %v1554_v59 = vld [vmem:[%s2651_s2 + $0x48] sm:$0xff]  }
  0xee   :  { %v1586_v10 = vpop.f32.mrf.mxu0 }
  0xef   :  { %v794_v12 = vpack.c.bf16 %v763_v7, %v762_v6  ;;  %v732_v14 = vadd.f32 %v1585_v8, %v1488_v9  ;;  %v2174_v7 = vpop.f32.mrf.mxu1 }
  0xf0   :  { %v1587_v13 = vpop.f32.mrf.mxu0 }
  0xf1   :  { %v1588_v15 = vadd.f32 %v1587_v13, %v1586_v10  ;;  %1713 = vmatprep.mubr.bf16.mxu1 %v794_v12  ;;  %v764_v20 = vmax.f32 %v732_v14, 0.0  ;;  %v2179_v14 = vpop.f32.mrf.mxu1 }
  0xf2   :  { %v1589_v16 = vpop.f32.mrf.mxu0 }
  0xf3   :  { %v733_v18 = vadd.f32 %v1588_v15, %v1489_v11  ;;  %v1551_v11 = vld [vmem:[%s2651_s2 + $0x30] sm:$0xff]  }
  0xf4   :  { %v1590_v19 = vpop.f32.mrf.mxu0 }
  0xf5   :  { %v765_v21 = vmax.f32 %v733_v18, 0.0  ;;  %v1591_v22 = vadd.f32 %v1590_v19, %v1589_v16  ;;  %v1508_v18 = vunpack.c.l.bf16 %v1551_v11 }
  0xf6   :  { %v1592_v24 = vpop.f32.mrf.mxu0 }
  0xf7   :  { %v795_v25 = vpack.c.bf16 %v765_v21, %v764_v20  ;;  %v734_v28 = vadd.f32 %v1591_v22, %v1492_v23  ;;  %v1509_v20 = vunpack.c.h.bf16 %v1551_v11  ;;  %v2181_v23 = vpop.f32.mrf.mxu1 }
  0xf8   :  { %v1593_v27 = vpop.f32.mrf.mxu0 }
  0xf9   :  { %v1594_v29 = vadd.f32 %v1593_v27, %v1592_v24  ;;  %1714 = vmatmul.mubr.bf16.vlgmr.msra.gmra.mxu1 %v795_v25  ;;  %v766_v34 = vmax.f32 %v734_v28, 0.0  ;;  %v1552_v27 = vld [vmem:[%s2651_s2 + $0x38] sm:$0xff]  }
  0xfa   :  { %v1595_v30 = vpop.f32.mrf.mxu0 }
  0xfb   :  { %v735_v32 = vadd.f32 %v1594_v29, %v1493_v26 }
  0xfc   :  { %v1596_v33 = vpop.f32.mrf.mxu0 }
  0xfd   :  { %v767_v35 = vmax.f32 %v735_v32, 0.0  ;;  %v1597_v36 = vadd.f32 %v1596_v33, %v1595_v30  ;;  %v2186_v30 = vpop.f32.mrf.mxu1 }
  0xfe   :  { %v1598_v38 = vpop.f32.mrf.mxu0 }
  0xff   :  { %v796_v40 = vpack.c.bf16 %v767_v35, %v766_v34  ;;  %v736_v42 = vadd.f32 %v1597_v36, %v1496_v37  ;;  %v1512_v34 = vunpack.c.l.bf16 %v1552_v27  ;;  %v1513_v36 = vunpack.c.h.bf16 %v1552_v27 }
 0x100   :  { %v1599_v41 = vpop.f32.mrf.mxu0 }
 0x101   :  { %v1600_v43 = vadd.f32 %v1599_v41, %v1598_v38  ;;  %1717 = vmatprep.mubr.bf16.mxu1 %v796_v40  ;;  %v768_v48 = vmax.f32 %v736_v42, 0.0 }
 0x102   :  { %v1601_v44 = vpop.f32.mrf.mxu0 }
 0x103   :  { %v737_v46 = vadd.f32 %v1600_v43, %v1497_v39  ;;  %v2188_v39 = vpop.f32.mrf.mxu1  ;;  %v1553_v43 = vld [vmem:[%s2651_s2 + $0x40] sm:$0xff]  }
 0x104   :  { %v1602_v47 = vpop.f32.mrf.mxu0 }
 0x105   :  { %v769_v49 = vmax.f32 %v737_v46, 0.0  ;;  %v1603_v50 = vadd.f32 %v1602_v47, %v1601_v44  ;;  %v2193_v46 = vpop.f32.mrf.mxu1 }
 0x106   :  { %v1604_v52 = vpop.f32.mrf.mxu0 }
 0x107   :  { %v797_v54 = vpack.c.bf16 %v769_v49, %v768_v48  ;;  %v738_v56 = vadd.f32 %v1603_v50, %v1500_v51  ;;  %v1516_v50 = vunpack.c.l.bf16 %v1553_v43 }
 0x108   :  { %v1605_v55 = vpop.f32.mrf.mxu0 }
 0x109   :  { %v1606_v57 = vadd.f32 %v1605_v55, %v1604_v52  ;;  %1718 = vmatmul.mubr.bf16.gmra.mxu1 %v797_v54  ;;  %v770_v63 = vmax.f32 %v738_v56, 0.0  ;;  %v1517_v52 = vunpack.c.h.bf16 %v1553_v43  ;;  %v2195_v55 = vpop.f32.mrf.mxu1 }
 0x10a   :  { %v1607_v58 = vpop.f32.mrf.mxu0 }
 0x10b   :  { %v739_v60 = vadd.f32 %v1606_v57, %v1501_v53 }
 0x10c   :  { %v1608_v61 = vpop.f32.mrf.mxu0 }
 0x10d   :  { %v771_v0 = vmax.f32 %v739_v60, 0.0  ;;  %v1609_v1 = vadd.f32 %v1608_v61, %v1607_v58 }
 0x10e   :  { %v1610_v3 = vpop.f32.mrf.mxu0 }
 0x10f   :  { %v798_v5 = vpack.c.bf16 %v771_v0, %v770_v63  ;;  %v740_v8 = vadd.f32 %v1609_v1, %v1504_v2  ;;  %v2200_v63 = vpop.f32.mrf.mxu1 }
 0x110   :  { %v1611_v6 = vpop.f32.mrf.mxu0 }
 0x111   :  { %v1612_v9 = vadd.f32 %v1611_v6, %v1610_v3  ;;  %1721 = vmatprep.mubr.bf16.mxu1 %v798_v5  ;;  %v772_v15 = vmax.f32 %v740_v8, 0.0  ;;  %v1520_v3 = vunpack.c.l.bf16 %v1554_v59  ;;  %v1521_v5 = vunpack.c.h.bf16 %v1554_v59 }
 0x112   :  { %v1613_v10 = vpop.f32.mrf.mxu0  ;;  %v1660_v59 = vadd.f32 %v2195_v55, %v2193_v46 }
 0x113   :  { %v741_v12 = vadd.f32 %v1612_v9, %v1505_v4  ;;  %v1662_v9 = vpop.f32.mrf.mxu1 }
 0x114   :  { %v1614_v13 = vpop.f32.mrf.mxu0 }
 0x115   :  { %v773_v16 = vmax.f32 %v741_v12, 0.0  ;;  %v1615_v17 = vadd.f32 %v1614_v13, %v1613_v10  ;;  %v1555_v13 = vld [vmem:[%s2651_s2 + $0x50] sm:$0xff]  }
 0x116   :  { %v1616_v19 = vpop.f32.mrf.mxu0 }
 0x117   :  { %v799_v21 = vpack.c.bf16 %v773_v16, %v772_v15  ;;  %v742_v24 = vadd.f32 %v1615_v17, %v1508_v18  ;;  %v1664_v17 = vpop.f32.mrf.mxu1 }
 0x118   :  { %v1617_v22 = vpop.f32.mrf.mxu0 }
 0x119   :  { %v1618_v25 = vadd.f32 %v1617_v22, %v1616_v19  ;;  %1722 = vmatmul.mubr.bf16.gmra.mxu1 %v799_v21  ;;  %v774_v31 = vmax.f32 %v742_v24, 0.0  ;;  %v1524_v21 = vunpack.c.l.bf16 %v1555_v13  ;;  %v1525_v24 = vunpack.c.h.bf16 %v1555_v13  ;;  %v1665_v27 = vpop.f32.mrf.mxu1 }
 0x11a   :  { %v1619_v26 = vpop.f32.mrf.mxu0 }
 0x11b   :  { %v743_v28 = vadd.f32 %v1618_v25, %v1509_v20 }
 0x11c   :  { %v1620_v29 = vpop.f32.mrf.mxu0 }
 0x11d   :  { %v775_v32 = vmax.f32 %v743_v28, 0.0  ;;  %v1621_v33 = vadd.f32 %v1620_v29, %v1619_v26  ;;  %v1557_v28 = vld [vmem:[%s2651_s2 + $0x60] sm:$0xff]  }
 0x11e   :  { %v1622_v35 = vpop.f32.mrf.mxu0 }
 0x11f   :  { %v800_v37 = vpack.c.bf16 %v775_v32, %v774_v31  ;;  %v744_v40 = vadd.f32 %v1621_v33, %v1512_v34  ;;  %v1556_v33 = vld [vmem:[%s2651_s2 + $0x58] sm:$0xff]  }
 0x120   :  { %v1623_v38 = vpop.f32.mrf.mxu0 }
 0x121   :  { %v1624_v41 = vadd.f32 %v1623_v38, %v1622_v35  ;;  %1725 = vmatprep.mubr.bf16.mxu1 %v800_v37  ;;  %v776_v47 = vmax.f32 %v744_v40, 0.0  ;;  %v1651_v35 = vadd.f32 %v2174_v7, %v2172_v62  ;;  %v1654_v37 = vadd.f32 %v2181_v23, %v2179_v14  ;;  %v1559_v62 = vld [vmem:[%s2651_s2 + $0x70] sm:$0xff]  }
 0x122   :  { %v1625_v42 = vpop.f32.mrf.mxu0  ;;  %v1533_v38 = vunpack.c.h.bf16 %v1557_v28  ;;  %v1529_v7 = vunpack.c.h.bf16 %v1556_v33 }
 0x123   :  { %v745_v44 = vadd.f32 %v1624_v41, %v1513_v36  ;;  %v1532_v36 = vunpack.c.l.bf16 %v1557_v28  ;;  %v1667_v41 = vpop.f32.mrf.mxu1  ;;  %v1035_v28 = vlaneseq }
 0x124   :  { %v1626_v45 = vpop.f32.mrf.mxu0  ;;  %v755_v14 = vadd.f32 %v1654_v37, %v1533_v38 }
 0x125   :  { %v777_v48 = vmax.f32 %v745_v44, 0.0  ;;  %v1627_v49 = vadd.f32 %v1626_v45, %v1625_v42  ;;  %v1528_v45 = vunpack.c.l.bf16 %v1556_v33 }
 0x126   :  { %v1628_v51 = vpop.f32.mrf.mxu0 }
 0x127   :  { %v801_v53 = vpack.c.bf16 %v777_v48, %v776_v47  ;;  %v746_v56 = vadd.f32 %v1627_v49, %v1516_v50  ;;  %v1558_v48 = vld [vmem:[%s2651_s2 + $0x68] sm:$0xff]   ;;  %v754_v50 = vadd.f32 %v1651_v35, %v1532_v36 }
 0x128   :  { %v1629_v54 = vpop.f32.mrf.mxu0 }
 0x129   :  { %v1630_v57 = vadd.f32 %v1629_v54, %v1628_v51  ;;  %1726 = vmatmul.mubr.bf16.gmra.mxu1 %v801_v53  ;;  %v778_v0 = vmax.f32 %v746_v56, 0.0  ;;  %v1668_v51 = vpop.f32.mrf.mxu1  ;;  %v1536_v54 = vunpack.c.l.bf16 %v1558_v48  ;;  %v1537_v56 = vunpack.c.h.bf16 %v1558_v48 }
 0x12a   :  { %v1631_v58 = vpop.f32.mrf.mxu0 }
 0x12b   :  { %v747_v60 = vadd.f32 %v1630_v57, %v1517_v52  ;;  %v1540_v57 = vunpack.c.l.bf16 %v1559_v62 }
 0x12c   :  { %v1632_v61 = vpop.f32.mrf.mxu0 }
 0x12d   :  { %v779_v1 = vmax.f32 %v747_v60, 0.0  ;;  %v1633_v2 = vadd.f32 %v1632_v61, %v1631_v58  ;;  %v1657_v58 = vadd.f32 %v2188_v39, %v2186_v30  ;;  %v1541_v61 = vunpack.c.h.bf16 %v1559_v62 }
 0x12e   :  { %v1634_v4 = vpop.f32.mrf.mxu0 }
 0x12f   :  { %v802_v6 = vpack.c.bf16 %v779_v1, %v778_v0  ;;  %v748_v10 = vadd.f32 %v1633_v2, %v1520_v3  ;;  %v786_v0 = vmax.f32 %v754_v50, 0.0  ;;  %v787_v1 = vmax.f32 %v755_v14, 0.0 }
 0x130   :  { %v1635_v8 = vpop.f32.mrf.mxu0  ;;  %v1663_v2 = vadd.f32 %v1662_v9, %v2200_v63  ;;  %v1666_v3 = vadd.f32 %v1665_v27, %v1664_v17 }
 0x131   :  { %v1636_v11 = vadd.f32 %v1635_v8, %v1634_v4  ;;  %1729 = vmatprep.mubr.bf16.mxu1 %v802_v6  ;;  %v780_v18 = vmax.f32 %v748_v10, 0.0  ;;  %v1670_v4 = vpop.f32.mrf.mxu1  ;;  %v756_v8 = vadd.f32 %v1657_v58, %v1536_v54  ;;  %v757_v10 = vadd.f32 %v1660_v59, %v1537_v56 }
 0x132   :  { %v1637_v12 = vpop.f32.mrf.mxu0  ;;  %v758_v39 = vadd.f32 %v1663_v2, %v1540_v57  ;;  %v806_v55 = vpack.c.bf16 %v787_v1, %v786_v0 }
 0x133   :  { %v749_v15 = vadd.f32 %v1636_v11, %v1521_v5  ;;  %v1560_v11 = vld [vmem:[%s2651_s2 + $0x78] sm:$0xff]   ;;  %v1671_v46 = vpop.f32.mrf.mxu1  ;;  %v788_v63 = vmax.f32 %v756_v8, 0.0  ;;  %v789_v9 = vmax.f32 %v757_v10, 0.0 }
 0x134   :  { %v1638_v16 = vpop.f32.mrf.mxu0  ;;  %v1544_v13 = vunpack.c.l.bf16 %v1560_v11  ;;  %v1672_v17 = vadd.f32 %v1671_v46, %v1670_v4 }
 0x135   :  { %v781_v19 = vmax.f32 %v749_v15, 0.0  ;;  %v1639_v20 = vadd.f32 %v1638_v16, %v1637_v12  ;;  %v759_v12 = vadd.f32 %v1666_v3, %v1541_v61  ;;  %v1545_v15 = vunpack.c.h.bf16 %v1560_v11 }
 0x136   :  { %v1640_v22 = vpop.f32.mrf.mxu0  ;;  %v1669_v16 = vadd.f32 %v1668_v51, %v1667_v41 }
 0x137   :  { %v803_v25 = vpack.c.bf16 %v781_v19, %v780_v18  ;;  %v750_v29 = vadd.f32 %v1639_v20, %v1524_v21  ;;  %v790_v18 = vmax.f32 %v758_v39, 0.0  ;;  %v791_v19 = vmax.f32 %v759_v12, 0.0 }
 0x138   :  { %v1641_v26 = vpop.f32.mrf.mxu0  ;;  %v760_v20 = vadd.f32 %v1669_v16, %v1544_v13  ;;  %v761_v21 = vadd.f32 %v1672_v17, %v1545_v15 }
 0x139   :  { %v1642_v31 = vadd.f32 %v1641_v26, %v1640_v22  ;;  %1730 = vmatmul.mubr.bf16.gmra.mxu1 %v803_v25  ;;  %v782_v42 = vmax.f32 %v750_v29, 0.0  ;;  %v807_v22 = vpack.c.bf16 %v789_v9, %v788_v63  ;;  %v2229_v29 = vand.u32 127, %v1035_v28 }
 0x13a   :  { %v1643_v32 = vpop.f32.mrf.mxu0  ;;  %v792_v25 = vmax.f32 %v760_v20, 0.0  ;;  %v793_v26 = vmax.f32 %v761_v21, 0.0 }
 0x13b   :  { %v751_v34 = vadd.f32 %v1642_v31, %v1525_v24  ;;  %v808_v24 = vpack.c.bf16 %v791_v19, %v790_v18  ;;  %vm1037_vm0 = vcmp.lt.s32.totalorder %v2229_v29, 7 }
 0x13c   :  { %v1644_v40 = vpop.f32.mrf.mxu0  ;;  %v809_v27 = vpack.c.bf16 %v793_v26, %v792_v25 }
 0x13d   :  { %v783_v43 = vmax.f32 %v751_v34, 0.0  ;;  %v1645_v44 = vadd.f32 %v1644_v40, %v1643_v32 }
 0x13e   :  { %v1646_v47 = vpop.f32.mrf.mxu0 }
 0x13f   :  { %v804_v49 = vpack.c.bf16 %v783_v43, %v782_v42  ;;  %v752_v52 = vadd.f32 %v1645_v44, %v1528_v45 }
 0x140   :  { %v1647_v23 = vpop.f32.mrf.mxu0 }
 0x141   :  { %v1648_v53 = vadd.f32 %v1647_v23, %v1646_v47  ;;  %1733 = vmatprep.mubr.bf16.mxu1 %v804_v49  ;;  %v784_v5 = vmax.f32 %v752_v52, 0.0 }
 0x143   :  { %v753_v60 = vadd.f32 %v1648_v53, %v1529_v7 }
 0x145   :  { %v785_v6 = vmax.f32 %v753_v60, 0.0 }
 0x147   :  { %v805_v30 = vpack.c.bf16 %v785_v6, %v784_v5 }
 0x149   :  { %1734 = vmatmul.mubr.bf16.gmra.mxu1 %v805_v30 }
 0x14a   :  { %1737 = vmatprep.mubr.bf16.mxu1 %v806_v55 }
 0x151   :  { %1738 = vmatmul.mubr.bf16.gmra.mxu1 %v807_v22 }
 0x152   :  { %1741 = vmatprep.mubr.bf16.mxu1 %v808_v24 }
 0x159   :  { %1742 = vmatmul.mubr.bf16.gmra.mxu1 %v809_v27 }
 0x1b9   :  { %v1715_v31 = vpop.f32.mrf.mxu1 }
 0x1ba   :  { %v2234_v32 = vsel %vm1037_vm0, %v1715_v31, -1e+30 }
 0x1bb   :  { %1074 = vmax.xlane.f32.xlu1 %v2234_v32  ;;  %v908_v33 = vpop.f32.mrf.mxu1 }
 0x1bc   :  { %v2239_v34 = vsel %vm1037_vm0, %v908_v33, -1e+30 }
 0x1bd   :  { %1070 = vmax.xlane.f32.xlu0 %v2239_v34  ;;  %v1716_v35 = vpop.f32.mrf.mxu1 }
 0x1be   :  { %v2244_v36 = vsel %vm1037_vm0, %v1716_v35, -1e+30 }
 0x1bf   :  { %1076 = vmax.xlane.f32.xlu1 %v2244_v36  ;;  %v911_v37 = vpop.f32.mrf.mxu1 }
 0x1c0   :  { %v2249_v38 = vsel %vm1037_vm0, %v911_v37, -1e+30 }
 0x1c1   :  { %1072 = vmax.xlane.f32.xlu0 %v2249_v38 }
 0x1c9   :  { %v1719_v40 = vpop.f32.mrf.mxu1 }
 0x1ca   :  { %v2254_v41 = vsel %vm1037_vm0, %v1719_v40, -1e+30 }
 0x1cb   :  { %1082 = vmax.xlane.f32.xlu0 %v2254_v41  ;;  %v924_v42 = vpop.f32.mrf.mxu1 }
 0x1cc   :  { %v2259_v44 = vsel %vm1037_vm0, %v924_v42, -1e+30 }
 0x1cd   :  { %v1720_v43 = vpop.f32.mrf.mxu1 }
 0x1ce   :  { %v2263_v45 = vsel %vm1037_vm0, %v1720_v43, -1e+30 }
 0x1cf   :  { %1078 = vmax.xlane.f32.xlu0 %v2259_v44  ;;  %1084 = vmax.xlane.f32.xlu1 %v2263_v45  ;;  %v927_v47 = vpop.f32.mrf.mxu1 }
 0x1d0   :  { %v2269_v48 = vsel %vm1037_vm0, %v927_v47, -1e+30 }
 0x1d3   :  { %1080 = vmax.xlane.f32.xlu1 %v2269_v48 }
 0x1d9   :  { %v1723_v62 = vpop.f32.mrf.mxu1 }
 0x1da   :  { %v2274_v7 = vsel %vm1037_vm0, %v1723_v62, -1e+30 }
 0x1db   :  { %1090 = vmax.xlane.f32.xlu0 %v2274_v7  ;;  %v940_v49 = vpop.f32.mrf.mxu1 }
 0x1dc   :  { %v2279_v14 = vsel %vm1037_vm0, %v940_v49, -1e+30 }
 0x1dd   :  { %v1724_v50 = vpop.f32.mrf.mxu1 }
 0x1de   :  { %v2283_v23 = vsel %vm1037_vm0, %v1724_v50, -1e+30 }
 0x1df   :  { %1086 = vmax.xlane.f32.xlu0 %v2279_v14  ;;  %1092 = vmax.xlane.f32.xlu1 %v2283_v23  ;;  %v943_v51 = vpop.f32.mrf.mxu1 }
 0x1e0   :  { %v2289_v52 = vsel %vm1037_vm0, %v943_v51, -1e+30 }
 0x1e3   :  { %1088 = vmax.xlane.f32.xlu1 %v2289_v52 }
 0x1e9   :  { %v1727_v53 = vpop.f32.mrf.mxu1 }
 0x1ea   :  { %v2294_v54 = vsel %vm1037_vm0, %v1727_v53, -1e+30 }
 0x1eb   :  { %1098 = vmax.xlane.f32.xlu0 %v2294_v54  ;;  %v956_v56 = vpop.f32.mrf.mxu1 }
 0x1ec   :  { %v2299_v58 = vsel %vm1037_vm0, %v956_v56, -1e+30 }
 0x1ed   :  { %v1728_v57 = vpop.f32.mrf.mxu1 }
 0x1ee   :  { %v2303_v59 = vsel %vm1037_vm0, %v1728_v57, -1e+30 }
 0x1ef   :  { %1094 = vmax.xlane.f32.xlu0 %v2299_v58  ;;  %1100 = vmax.xlane.f32.xlu1 %v2303_v59  ;;  %v959_v60 = vpop.f32.mrf.mxu1 }
 0x1f0   :  { %v2309_v61 = vsel %vm1037_vm0, %v959_v60, -1e+30 }
 0x1f3   :  { %1096 = vmax.xlane.f32.xlu1 %v2309_v61 }
 0x1f9   :  { %v1731_v0 = vpop.f32.mrf.mxu1 }
 0x1fa   :  { %v2314_v1 = vsel %vm1037_vm0, %v1731_v0, -1e+30 }
 0x1fb   :  { %1106 = vmax.xlane.f32.xlu0 %v2314_v1  ;;  %v972_v2 = vpop.f32.mrf.mxu1 }
 0x1fc   :  { %v2319_v4 = vsel %vm1037_vm0, %v972_v2, -1e+30 }
 0x1fd   :  { %v1732_v3 = vpop.f32.mrf.mxu1 }
 0x1fe   :  { %v2323_v5 = vsel %vm1037_vm0, %v1732_v3, -1e+30 }
 0x1ff   :  { %1102 = vmax.xlane.f32.xlu0 %v2319_v4  ;;  %1108 = vmax.xlane.f32.xlu1 %v2323_v5  ;;  %v975_v6 = vpop.f32.mrf.mxu1 }
 0x200   :  { %v2329_v8 = vsel %vm1037_vm0, %v975_v6, -1e+30 }
 0x203   :  { %1104 = vmax.xlane.f32.xlu1 %v2329_v8 }
 0x209   :  { %v1735_v10 = vpop.f32.mrf.mxu1 }
 0x20a   :  { %v2334_v11 = vsel %vm1037_vm0, %v1735_v10, -1e+30 }
 0x20b   :  { %1114 = vmax.xlane.f32.xlu0 %v2334_v11  ;;  %v988_v30 = vpop.f32.mrf.mxu1 }
 0x20c   :  { %v2339_v12 = vsel %vm1037_vm0, %v988_v30, -1e+30 }
 0x20d   :  { %v1736_v39 = vpop.f32.mrf.mxu1 }
 0x20e   :  { %v2343_v46 = vsel %vm1037_vm0, %v1736_v39, -1e+30 }
 0x20f   :  { %1110 = vmax.xlane.f32.xlu0 %v2339_v12  ;;  %1116 = vmax.xlane.f32.xlu1 %v2343_v46  ;;  %v991_v55 = vpop.f32.mrf.mxu1 }
 0x210   :  { %v2349_v15 = vsel %vm1037_vm0, %v991_v55, -1e+30 }
 0x211   :  { %v1739_v13 = vpop.f32.mrf.mxu1 }
 0x212   :  { %v2353_v63 = vsel %vm1037_vm0, %v1739_v13, -1e+30 }
 0x213   :  { %1112 = vmax.xlane.f32.xlu1 %v2349_v15  ;;  %1122 = vmax.xlane.f32.xlu0 %v2353_v63  ;;  %v1004_v9 = vpop.f32.mrf.mxu1 }
 0x214   :  { %v2359_v17 = vsel %vm1037_vm0, %v1004_v9, -1e+30 }
 0x215   :  { %v1740_v16 = vpop.f32.mrf.mxu1 }
 0x216   :  { %v2363_v18 = vsel %vm1037_vm0, %v1740_v16, -1e+30 }
 0x217   :  { %1118 = vmax.xlane.f32.xlu0 %v2359_v17  ;;  %1124 = vmax.xlane.f32.xlu1 %v2363_v18  ;;  %v1007_v19 = vpop.f32.mrf.mxu1 }
 0x218   :  { %v2369_v21 = vsel %vm1037_vm0, %v1007_v19, -1e+30 }
 0x219   :  { %v1743_v20 = vpop.f32.mrf.mxu1 }
 0x21a   :  { %v2379_v27 = vsel %vm1037_vm0, %v1743_v20, -1e+30 }
 0x21b   :  { %1120 = vmax.xlane.f32.xlu1 %v2369_v21  ;;  %v1020_v22 = vpop.f32.mrf.mxu1 }
 0x21c   :  { %v2374_v24 = vsel %vm1037_vm0, %v1020_v22, -1e+30 }
 0x21d   :  { %1126 = vmax.xlane.f32.xlu0 %v2374_v24  ;;  %v1744_v25 = vpop.f32.mrf.mxu1 }
 0x21e   :  { %v2389_v31 = vsel %vm1037_vm0, %v1744_v25, -1e+30 }
 0x21f   :  { %v1023_v26 = vpop.f32.mrf.mxu1 }
 0x220   :  { %v2383_v28 = vsel %vm1037_vm0, %v1023_v26, -1e+30 }
 0x221   :  { %1130 = vmax.xlane.f32.xlu0 %v2379_v27  ;;  %1128 = vmax.xlane.f32.xlu1 %v2383_v28 }
 0x225   :  { %1132 = vmax.xlane.f32.xlu1 %v2389_v31 }
 0x244   :  { %v1075_v33 = vpop.xlane.xlu1 %1074 }
 0x245   :  { %v2393_v35 = vsub.f32 %v2234_v32, %v1075_v33 }
 0x246   :  { %v1071_v37 = vpop.xlane.xlu0 %1070 }
 0x247   :  { %v1170_v40 = vmul.f32 1.442695, %v2393_v35  ;;  %v2397_v42 = vsub.f32 %v2239_v34, %v1071_v37 }
 0x248   :  { %v1077_v43 = vpop.xlane.xlu1 %1076 }
 0x249   :  { %1833 = vpow2.f32 %v1170_v40  ;;  %v1166_v47 = vmul.f32 1.442695, %v2397_v42  ;;  %v2401_v29 = vsub.f32 %v2244_v36, %v1077_v43 }
 0x24a   :  { %v1073_v62 = vpop.xlane.xlu0 %1072 }
 0x24b   :  { %v1172_v49 = vmul.f32 1.442695, %v2401_v29  ;;  %v2405_v50 = vsub.f32 %v2249_v38, %v1073_v62  ;;  %1835 = vpow2.f32 %v1166_v47 }
 0x24d   :  { %1837 = vpow2.f32 %v1172_v49  ;;  %v1168_v32 = vmul.f32 1.442695, %v2405_v50 }
 0x24f   :  { %1839 = vpow2.f32 %v1168_v32 }
 0x254   :  { %v1083_v34 = vpop.xlane.xlu0 %1082 }
 0x255   :  { %v2409_v51 = vsub.f32 %v2254_v41, %v1083_v34 }
 0x256   :  { %v1834_v53 = vpop.eup %1833 }
 0x257   :  { %v1178_v56 = vmul.f32 1.442695, %v2409_v51  ;;  %1234 = vadd.xlane.f32.xlu0 %v1834_v53 }
 0x258   :  { %v1079_v36 = vpop.xlane.xlu0 %1078  ;;  %v1085_v57 = vpop.xlane.xlu1 %1084 }
 0x259   :  { %v1836_v60 = vpop.eup %1835  ;;  %1841 = vpow2.f32 %v1178_v56  ;;  %v2413_v38 = vsub.f32 %v2259_v44, %v1079_v36  ;;  %v2416_v0 = vsub.f32 %v2263_v45, %v1085_v57 }
 0x25a   :  { %v1838_v2 = vpop.eup %1837 }
 0x25b   :  { %v1174_v3 = vmul.f32 1.442695, %v2413_v38  ;;  %v1180_v41 = vmul.f32 1.442695, %v2416_v0  ;;  %1230 = vadd.xlane.f32.xlu0 %v1836_v60  ;;  %1236 = vadd.xlane.f32.xlu1 %v1838_v2 }
 0x25c   :  { %v1081_v6 = vpop.xlane.xlu1 %1080  ;;  %v1840_v30 = vpop.eup %1839 }
 0x25d   :  { %1843 = vpow2.f32 %v1174_v3  ;;  %v2421_v10 = vsub.f32 %v2269_v48, %v1081_v6 }
 0x25e   :  { %1845 = vpow2.f32 %v1180_v41 }
 0x25f   :  { %v1176_v44 = vmul.f32 1.442695, %v2421_v10  ;;  %1232 = vadd.xlane.f32.xlu1 %v1840_v30 }
 0x261   :  { %1847 = vpow2.f32 %v1176_v44 }
 0x264   :  { %v1091_v45 = vpop.xlane.xlu0 %1090 }
 0x265   :  { %v2425_v39 = vsub.f32 %v2274_v7, %v1091_v45 }
 0x266   :  { %v1842_v55 = vpop.eup %1841 }
 0x267   :  { %v1186_v13 = vmul.f32 1.442695, %v2425_v39  ;;  %1242 = vadd.xlane.f32.xlu0 %v1842_v55 }
 0x268   :  { %v1087_v9 = vpop.xlane.xlu0 %1086  ;;  %v1093_v16 = vpop.xlane.xlu1 %1092 }
 0x269   :  { %1849 = vpow2.f32 %v1186_v13  ;;  %v2429_v48 = vsub.f32 %v2279_v14, %v1087_v9  ;;  %v2432_v19 = vsub.f32 %v2283_v23, %v1093_v16 }
 0x26a   :  { %v1844_v20 = vpop.eup %1843 }
 0x26b   :  { %v1846_v22 = vpop.eup %1845  ;;  %v1182_v25 = vmul.f32 1.442695, %v2429_v48  ;;  %v1188_v7 = vmul.f32 1.442695, %v2432_v19  ;;  %1238 = vadd.xlane.f32.xlu0 %v1844_v20 }
 0x26c   :  { %1244 = vadd.xlane.f32.xlu1 %v1846_v22  ;;  %v1089_v26 = vpop.xlane.xlu1 %1088 }
 0x26d   :  { %1851 = vpow2.f32 %v1182_v25  ;;  %v2437_v33 = vsub.f32 %v2289_v52, %v1089_v26 }
 0x26e   :  { %v1848_v37 = vpop.eup %1847  ;;  %1853 = vpow2.f32 %v1188_v7 }
 0x26f   :  { %v1184_v14 = vmul.f32 1.442695, %v2437_v33 }
 0x270   :  { %1240 = vadd.xlane.f32.xlu1 %v1848_v37 }
 0x271   :  { %1855 = vpow2.f32 %v1184_v14 }
 0x274   :  { %v1099_v23 = vpop.xlane.xlu0 %1098 }
 0x275   :  { %v2441_v40 = vsub.f32 %v2294_v54, %v1099_v23 }
 0x276   :  { %v1850_v43 = vpop.eup %1849 }
 0x277   :  { %v1194_v47 = vmul.f32 1.442695, %v2441_v40  ;;  %1250 = vadd.xlane.f32.xlu0 %v1850_v43 }
 0x278   :  { %v1095_v62 = vpop.xlane.xlu0 %1094  ;;  %v1101_v49 = vpop.xlane.xlu1 %1100 }
 0x279   :  { %1857 = vpow2.f32 %v1194_v47  ;;  %v2445_v52 = vsub.f32 %v2299_v58, %v1095_v62  ;;  %v2448_v32 = vsub.f32 %v2303_v59, %v1101_v49 }
 0x27a   :  { %v1852_v34 = vpop.eup %1851 }
 0x27b   :  { %v1854_v53 = vpop.eup %1853  ;;  %v1190_v56 = vmul.f32 1.442695, %v2445_v52  ;;  %v1196_v54 = vmul.f32 1.442695, %v2448_v32  ;;  %1246 = vadd.xlane.f32.xlu0 %v1852_v34 }
 0x27c   :  { %1252 = vadd.xlane.f32.xlu1 %v1854_v53  ;;  %v1097_v36 = vpop.xlane.xlu1 %1096 }
 0x27d   :  { %1859 = vpow2.f32 %v1190_v56  ;;  %v2453_v57 = vsub.f32 %v2309_v61, %v1097_v36 }
 0x27e   :  { %v1856_v60 = vpop.eup %1855  ;;  %1861 = vpow2.f32 %v1196_v54 }
 0x27f   :  { %v1192_v58 = vmul.f32 1.442695, %v2453_v57 }
 0x280   :  { %1248 = vadd.xlane.f32.xlu1 %v1856_v60 }
 0x281   :  { %1863 = vpow2.f32 %v1192_v58 }
 0x284   :  { %v1107_v59 = vpop.xlane.xlu0 %1106 }
 0x285   :  { %v2457_v2 = vsub.f32 %v2314_v1, %v1107_v59 }
 0x286   :  { %v1858_v3 = vpop.eup %1857 }
 0x287   :  { %v1202_v41 = vmul.f32 1.442695, %v2457_v2  ;;  %1258 = vadd.xlane.f32.xlu0 %v1858_v3 }
 0x288   :  { %v1103_v6 = vpop.xlane.xlu0 %1102  ;;  %v1109_v30 = vpop.xlane.xlu1 %1108 }
 0x289   :  { %1865 = vpow2.f32 %v1202_v41  ;;  %v2461_v61 = vsub.f32 %v2319_v4, %v1103_v6  ;;  %v2464_v44 = vsub.f32 %v2323_v5, %v1109_v30 }
 0x28a   :  { %v1860_v45 = vpop.eup %1859 }
 0x28b   :  { %v1862_v55 = vpop.eup %1861  ;;  %v1198_v13 = vmul.f32 1.442695, %v2461_v61  ;;  %v1204_v1 = vmul.f32 1.442695, %v2464_v44  ;;  %1254 = vadd.xlane.f32.xlu0 %v1860_v45 }
 0x28c   :  { %1260 = vadd.xlane.f32.xlu1 %v1862_v55  ;;  %v1105_v9 = vpop.xlane.xlu1 %1104 }
 0x28d   :  { %1867 = vpow2.f32 %v1198_v13  ;;  %v2469_v16 = vsub.f32 %v2329_v8, %v1105_v9 }
 0x28e   :  { %v1864_v20 = vpop.eup %1863  ;;  %1869 = vpow2.f32 %v1204_v1 }
 0x28f   :  { %v1200_v4 = vmul.f32 1.442695, %v2469_v16 }
 0x290   :  { %1256 = vadd.xlane.f32.xlu1 %v1864_v20 }
 0x291   :  { %1871 = vpow2.f32 %v1200_v4 }
 0x294   :  { %v1115_v5 = vpop.xlane.xlu0 %1114 }
 0x295   :  { %v2473_v22 = vsub.f32 %v2334_v11, %v1115_v5 }
 0x296   :  { %v1866_v25 = vpop.eup %1865 }
 0x297   :  { %v1210_v7 = vmul.f32 1.442695, %v2473_v22  ;;  %1266 = vadd.xlane.f32.xlu0 %v1866_v25 }
 0x298   :  { %v1111_v26 = vpop.xlane.xlu0 %1110  ;;  %v1117_v37 = vpop.xlane.xlu1 %1116 }
 0x299   :  { %1873 = vpow2.f32 %v1210_v7  ;;  %v2477_v8 = vsub.f32 %v2339_v12, %v1111_v26  ;;  %v2480_v14 = vsub.f32 %v2343_v46, %v1117_v37 }
 0x29a   :  { %v1868_v23 = vpop.eup %1867 }
 0x29b   :  { %v1870_v43 = vpop.eup %1869  ;;  %v1206_v47 = vmul.f32 1.442695, %v2477_v8  ;;  %v1212_v11 = vmul.f32 1.442695, %v2480_v14  ;;  %1262 = vadd.xlane.f32.xlu0 %v1868_v23 }
 0x29c   :  { %1268 = vadd.xlane.f32.xlu1 %v1870_v43  ;;  %v1113_v62 = vpop.xlane.xlu1 %1112  ;;  %v1123_v49 = vpop.xlane.xlu0 %1122 }
 0x29d   :  { %1875 = vpow2.f32 %v1206_v47  ;;  %v2485_v34 = vsub.f32 %v2349_v15, %v1113_v62  ;;  %v2488_v12 = vsub.f32 %v2353_v63, %v1123_v49 }
 0x29e   :  { %v1872_v53 = vpop.eup %1871  ;;  %1877 = vpow2.f32 %v1212_v11 }
 0x29f   :  { %v1208_v46 = vmul.f32 1.442695, %v2485_v34  ;;  %v1218_v56 = vmul.f32 1.442695, %v2488_v12 }
 0x2a0   :  { %1264 = vadd.xlane.f32.xlu1 %v1872_v53  ;;  %v1119_v54 = vpop.xlane.xlu0 %1118  ;;  %v1125_v36 = vpop.xlane.xlu1 %1124 }
 0x2a1   :  { %1879 = vpow2.f32 %v1208_v46  ;;  %v2493_v60 = vsub.f32 %v2359_v17, %v1119_v54  ;;  %v2496_v58 = vsub.f32 %v2363_v18, %v1125_v36 }
 0x2a2   :  { %1881 = vpow2.f32 %v1218_v56 }
 0x2a3   :  { %v1214_v15 = vmul.f32 1.442695, %v2493_v60  ;;  %v1220_v63 = vmul.f32 1.442695, %v2496_v58 }
 0x2a4   :  { %v1121_v59 = vpop.xlane.xlu1 %1120 }
 0x2a5   :  { %1883 = vpow2.f32 %v1214_v15  ;;  %v2501_v3 = vsub.f32 %v2369_v21, %v1121_v59 }
 0x2a6   :  { %v1874_v41 = vpop.eup %1873  ;;  %1885 = vpow2.f32 %v1220_v63  ;;  %v1127_v6 = vpop.xlane.xlu0 %1126 }
 0x2a7   :  { %v1216_v30 = vmul.f32 1.442695, %v2501_v3  ;;  %v2505_v17 = vsub.f32 %v2374_v24, %v1127_v6  ;;  %1274 = vadd.xlane.f32.xlu0 %v1874_v41 }
 0x2a9   :  { %1887 = vpow2.f32 %v1216_v30  ;;  %v1222_v18 = vmul.f32 1.442695, %v2505_v17 }
 0x2aa   :  { %v1876_v45 = vpop.eup %1875  ;;  %v1131_v55 = vpop.xlane.xlu0 %1130 }
 0x2ab   :  { %v1129_v13 = vpop.xlane.xlu1 %1128  ;;  %v1878_v1 = vpop.eup %1877  ;;  %1889 = vpow2.f32 %v1222_v18  ;;  %v2509_v21 = vsub.f32 %v2379_v27, %v1131_v55  ;;  %1270 = vadd.xlane.f32.xlu0 %v1876_v45 }
 0x2ac   :  { %v2512_v9 = vsub.f32 %v2383_v28, %v1129_v13  ;;  %1276 = vadd.xlane.f32.xlu1 %v1878_v1 }
 0x2ad   :  { %v1226_v24 = vmul.f32 1.442695, %v2509_v21 }
 0x2ae   :  { %v1224_v20 = vmul.f32 1.442695, %v2512_v9  ;;  %v1880_v4 = vpop.eup %1879 }
 0x2af   :  { %v1133_v5 = vpop.xlane.xlu1 %1132  ;;  %v1882_v25 = vpop.eup %1881  ;;  %1891 = vpow2.f32 %v1226_v24 }
 0x2b0   :  { %v2517_v7 = vsub.f32 %v2389_v31, %v1133_v5  ;;  %1893 = vpow2.f32 %v1224_v20  ;;  %1282 = vadd.xlane.f32.xlu0 %v1882_v25  ;;  %1272 = vadd.xlane.f32.xlu1 %v1880_v4 }
 0x2b2   :  { %v1228_v27 = vmul.f32 1.442695, %v2517_v7  ;;  %v1884_v28 = vpop.eup %1883 }
 0x2b3   :  { %v1886_v26 = vpop.eup %1885 }
 0x2b4   :  { %1895 = vpow2.f32 %v1228_v27  ;;  %1278 = vadd.xlane.f32.xlu0 %v1884_v28  ;;  %1284 = vadd.xlane.f32.xlu1 %v1886_v26 }
 0x2b6   :  { %v1888_v37 = vpop.eup %1887 }
 0x2b8   :  { %v1890_v23 = vpop.eup %1889  ;;  %1280 = vadd.xlane.f32.xlu1 %v1888_v37 }
 0x2b9   :  { %1286 = vadd.xlane.f32.xlu0 %v1890_v23 }
 0x2bc   :  { %v1892_v43 = vpop.eup %1891 }
 0x2bd   :  { %v1894_v47 = vpop.eup %1893  ;;  %1290 = vadd.xlane.f32.xlu0 %v1892_v43 }
 0x2be   :  { %1288 = vadd.xlane.f32.xlu1 %v1894_v47 }
 0x2c1   :  { %v1896_v31 = vpop.eup %1895 }
 0x2c2   :  { %1292 = vadd.xlane.f32.xlu1 %v1896_v31 }
 0x2e0   :  { %v1235_v11 = vpop.xlane.xlu0 %1234 }
 0x2e1   :  { %1897 = vlog2.f32 %v1235_v11 }
 0x2e4   :  { %v1231_v62 = vpop.xlane.xlu0 %1230  ;;  %v1237_v49 = vpop.xlane.xlu1 %1236 }
 0x2e5   :  { %1899 = vlog2.f32 %v1231_v62 }
 0x2e6   :  { %1901 = vlog2.f32 %v1237_v49 }
 0x2e8   :  { %v1233_v53 = vpop.xlane.xlu1 %1232 }
 0x2e9   :  { %1903 = vlog2.f32 %v1233_v53 }
 0x2ee   :  { %v1898_v46 = vpop.eup %1897 }
 0x2ef   :  { %v1299_v56 = vmul.f32 0.6931472, %v1898_v46 }
 0x2f0   :  { %v1243_v54 = vpop.xlane.xlu0 %1242 }
 0x2f1   :  { %v1360_v36 = vsub.f32 %v2393_v35, %v1299_v56  ;;  %1905 = vlog2.f32 %v1243_v54 }
 0x2f2   :  { %v1900_v15 = vpop.eup %1899 }
 0x2f3   :  { %v1902_v63 = vpop.eup %1901  ;;  %1392 = vst [vmem:[%s2652_s4 + $0x10] sm:$0xff] %v1360_v36  ;;  %v1295_v59 = vmul.f32 0.6931472, %v1900_v15 }
 0x2f4   :  { %v1301_v41 = vmul.f32 0.6931472, %v1902_v63  ;;  %v1239_v6 = vpop.xlane.xlu0 %1238 }
 0x2f5   :  { %v1358_v30 = vsub.f32 %v2397_v42, %v1295_v59  ;;  %1907 = vlog2.f32 %v1239_v6  ;;  %v1245_v18 = vpop.xlane.xlu1 %1244 }
 0x2f6   :  { %v1904_v45 = vpop.eup %1903  ;;  %v1361_v55 = vsub.f32 %v2401_v29, %v1301_v41  ;;  %1909 = vlog2.f32 %v1245_v18 }
 0x2f7   :  { %1390 = vst [vmem:[%s2652_s4] sm:$0xff] %v1358_v30  ;;  %v1297_v35 = vmul.f32 0.6931472, %v1904_v45 }
 0x2f8   :  { %1393 = vst [vmem:[%s2652_s4 + $0x18] sm:$0xff] %v1361_v55 }
 0x2f9   :  { %v1359_v13 = vsub.f32 %v2405_v50, %v1297_v35  ;;  %v1241_v1 = vpop.xlane.xlu1 %1240 }
 0x2fa   :  { %1911 = vlog2.f32 %v1241_v1 }
 0x2fb   :  { %1391 = vst [vmem:[%s2652_s4 + $0x8] sm:$0xff] %v1359_v13 }
 0x2fe   :  { %v1906_v42 = vpop.eup %1905 }
 0x2ff   :  { %v1307_v29 = vmul.f32 0.6931472, %v1906_v42 }
 0x300   :  { %v1251_v24 = vpop.xlane.xlu0 %1250 }
 0x301   :  { %v1364_v20 = vsub.f32 %v2409_v51, %v1307_v29  ;;  %1913 = vlog2.f32 %v1251_v24 }
 0x302   :  { %v1908_v4 = vpop.eup %1907 }
 0x303   :  { %v1910_v5 = vpop.eup %1909  ;;  %1396 = vst [vmem:[%s2652_s4 + $0x30] sm:$0xff] %v1364_v20  ;;  %v1303_v25 = vmul.f32 0.6931472, %v1908_v4 }
 0x304   :  { %v1309_v50 = vmul.f32 0.6931472, %v1910_v5  ;;  %v1247_v27 = vpop.xlane.xlu0 %1246 }
 0x305   :  { %v1362_v28 = vsub.f32 %v2413_v38, %v1303_v25  ;;  %1915 = vlog2.f32 %v1247_v27  ;;  %v1253_v26 = vpop.xlane.xlu1 %1252 }
 0x306   :  { %v1365_v37 = vsub.f32 %v2416_v0, %v1309_v50  ;;  %1917 = vlog2.f32 %v1253_v26 }
 0x307   :  { %v1912_v23 = vpop.eup %1911  ;;  %1394 = vst [vmem:[%s2652_s4 + $0x20] sm:$0xff] %v1362_v28 }
 0x308   :  { %1397 = vst [vmem:[%s2652_s4 + $0x38] sm:$0xff] %v1365_v37  ;;  %v1305_v51 = vmul.f32 0.6931472, %v1912_v23 }
 0x309   :  { %v1249_v43 = vpop.xlane.xlu1 %1248 }
 0x30a   :  { %v1363_v47 = vsub.f32 %v2421_v10, %v1305_v51  ;;  %1919 = vlog2.f32 %v1249_v43 }
 0x30c   :  { %1395 = vst [vmem:[%s2652_s4 + $0x28] sm:$0xff] %v1363_v47 }
 0x30e   :  { %v1914_v38 = vpop.eup %1913 }
 0x30f   :  { %v1315_v0 = vmul.f32 0.6931472, %v1914_v38 }
 0x310   :  { %v1259_v31 = vpop.xlane.xlu0 %1258 }
 0x311   :  { %v1368_v11 = vsub.f32 %v2425_v39, %v1315_v0  ;;  %1921 = vlog2.f32 %v1259_v31 }
 0x312   :  { %v1916_v62 = vpop.eup %1915 }
 0x313   :  { %v1918_v49 = vpop.eup %1917  ;;  %1400 = vst [vmem:[%s2652_s4 + $0x50] sm:$0xff] %v1368_v11  ;;  %v1311_v53 = vmul.f32 0.6931472, %v1916_v62 }
 0x314   :  { %v1317_v46 = vmul.f32 0.6931472, %v1918_v49  ;;  %v1255_v10 = vpop.xlane.xlu0 %1254 }
 0x315   :  { %v1366_v56 = vsub.f32 %v2429_v48, %v1311_v53  ;;  %1923 = vlog2.f32 %v1255_v10  ;;  %v1261_v54 = vpop.xlane.xlu1 %1260 }
 0x316   :  { %v1369_v36 = vsub.f32 %v2432_v19, %v1317_v46  ;;  %1925 = vlog2.f32 %v1261_v54 }
 0x317   :  { %v1920_v15 = vpop.eup %1919  ;;  %1398 = vst [vmem:[%s2652_s4 + $0x40] sm:$0xff] %v1366_v56 }
 0x318   :  { %1401 = vst [vmem:[%s2652_s4 + $0x58] sm:$0xff] %v1369_v36  ;;  %v1313_v39 = vmul.f32 0.6931472, %v1920_v15 }
 0x319   :  { %v1257_v63 = vpop.xlane.xlu1 %1256 }
 0x31a   :  { %v1367_v59 = vsub.f32 %v2437_v33, %v1313_v39  ;;  %1927 = vlog2.f32 %v1257_v63 }
 0x31c   :  { %1399 = vst [vmem:[%s2652_s4 + $0x48] sm:$0xff] %v1367_v59 }
 0x31e   :  { %v1922_v48 = vpop.eup %1921 }
 0x31f   :  { %v1323_v19 = vmul.f32 0.6931472, %v1922_v48 }
 0x320   :  { %v1267_v41 = vpop.xlane.xlu0 %1266 }
 0x321   :  { %v1372_v6 = vsub.f32 %v2441_v40, %v1323_v19  ;;  %1929 = vlog2.f32 %v1267_v41 }
 0x322   :  { %v1924_v30 = vpop.eup %1923 }
 0x323   :  { %v1926_v18 = vpop.eup %1925  ;;  %1404 = vst [vmem:[%s2652_s4 + $0x70] sm:$0xff] %v1372_v6  ;;  %v1319_v45 = vmul.f32 0.6931472, %v1924_v30 }
 0x324   :  { %v1325_v55 = vmul.f32 0.6931472, %v1926_v18  ;;  %v1263_v33 = vpop.xlane.xlu0 %1262 }
 0x325   :  { %v1370_v35 = vsub.f32 %v2445_v52, %v1319_v45  ;;  %1931 = vlog2.f32 %v1263_v33  ;;  %v1269_v13 = vpop.xlane.xlu1 %1268 }
 0x326   :  { %v1373_v1 = vsub.f32 %v2448_v32, %v1325_v55  ;;  %1933 = vlog2.f32 %v1269_v13 }
 0x327   :  { %v1928_v42 = vpop.eup %1927  ;;  %1402 = vst [vmem:[%s2652_s4 + $0x60] sm:$0xff] %v1370_v35 }
 0x328   :  { %1405 = vst [vmem:[%s2652_s4 + $0x78] sm:$0xff] %v1373_v1  ;;  %v1321_v40 = vmul.f32 0.6931472, %v1928_v42 }
 0x329   :  { %v1265_v29 = vpop.xlane.xlu1 %1264 }
 0x32a   :  { %v1371_v24 = vsub.f32 %v2453_v57, %v1321_v40  ;;  %1935 = vlog2.f32 %v1265_v29 }
 0x32c   :  { %1403 = vst [vmem:[%s2652_s4 + $0x68] sm:$0xff] %v1371_v24 }
 0x32e   :  { %v1930_v52 = vpop.eup %1929 }
 0x32f   :  { %v1331_v32 = vmul.f32 0.6931472, %v1930_v52 }
 0x330   :  { %v1275_v20 = vpop.xlane.xlu0 %1274 }
 0x331   :  { %v1376_v4 = vsub.f32 %v2457_v2, %v1331_v32  ;;  %1937 = vlog2.f32 %v1275_v20 }
 0x332   :  { %v1932_v5 = vpop.eup %1931 }
 0x333   :  { %v1934_v25 = vpop.eup %1933  ;;  %1408 = vst [vmem:[%s2652_s4 + $0x90] sm:$0xff] %v1376_v4  ;;  %v1327_v50 = vmul.f32 0.6931472, %v1932_v5 }
 0x334   :  { %v1333_v27 = vmul.f32 0.6931472, %v1934_v25  ;;  %v1271_v57 = vpop.xlane.xlu0 %1270 }
 0x335   :  { %v1374_v28 = vsub.f32 %v2461_v61, %v1327_v50  ;;  %1939 = vlog2.f32 %v1271_v57  ;;  %v1277_v26 = vpop.xlane.xlu1 %1276 }
 0x336   :  { %v1377_v37 = vsub.f32 %v2464_v44, %v1333_v27  ;;  %1941 = vlog2.f32 %v1277_v26 }
 0x337   :  { %v1936_v23 = vpop.eup %1935  ;;  %1406 = vst [vmem:[%s2652_s4 + $0x80] sm:$0xff] %v1374_v28 }
 0x338   :  { %1409 = vst [vmem:[%s2652_s4 + $0x98] sm:$0xff] %v1377_v37  ;;  %v1329_v2 = vmul.f32 0.6931472, %v1936_v23 }
 0x339   :  { %v1283_v51 = vpop.xlane.xlu0 %1282  ;;  %v1273_v43 = vpop.xlane.xlu1 %1272 }
 0x33a   :  { %v1375_v47 = vsub.f32 %v2469_v16, %v1329_v2  ;;  %1943 = vlog2.f32 %v1283_v51 }
 0x33b   :  { %1945 = vlog2.f32 %v1273_v43 }
 0x33c   :  { %1407 = vst [vmem:[%s2652_s4 + $0x88] sm:$0xff] %v1375_v47 }
 0x33d   :  { %v1279_v61 = vpop.xlane.xlu0 %1278  ;;  %v1285_v44 = vpop.xlane.xlu1 %1284 }
 0x33e   :  { %v1938_v38 = vpop.eup %1937  ;;  %1947 = vlog2.f32 %v1279_v61 }
 0x33f   :  { %v1339_v0 = vmul.f32 0.6931472, %v1938_v38  ;;  %1949 = vlog2.f32 %v1285_v44 }
 0x341   :  { %v1380_v31 = vsub.f32 %v2473_v22, %v1339_v0  ;;  %v1281_v11 = vpop.xlane.xlu1 %1280 }
 0x342   :  { %v1940_v62 = vpop.eup %1939  ;;  %1951 = vlog2.f32 %v1281_v11  ;;  %v1287_v49 = vpop.xlane.xlu0 %1286 }
 0x343   :  { %v1942_v53 = vpop.eup %1941  ;;  %1412 = vst [vmem:[%s2652_s4 + $0xb0] sm:$0xff] %v1380_v31  ;;  %v1335_v16 = vmul.f32 0.6931472, %v1940_v62  ;;  %1953 = vlog2.f32 %v1287_v49 }
 0x344   :  { %v1341_v46 = vmul.f32 0.6931472, %v1942_v53 }
 0x345   :  { %v1378_v10 = vsub.f32 %v2477_v8, %v1335_v16 }
 0x346   :  { %v1381_v56 = vsub.f32 %v2480_v14, %v1341_v46  ;;  %v1291_v54 = vpop.xlane.xlu0 %1290 }
 0x347   :  { %v1944_v36 = vpop.eup %1943  ;;  %1410 = vst [vmem:[%s2652_s4 + $0xa0] sm:$0xff] %v1378_v10  ;;  %1955 = vlog2.f32 %v1291_v54  ;;  %v1289_v22 = vpop.xlane.xlu1 %1288 }
 0x348   :  { %v1946_v15 = vpop.eup %1945  ;;  %1413 = vst [vmem:[%s2652_s4 + $0xb8] sm:$0xff] %v1381_v56  ;;  %v1347_v39 = vmul.f32 0.6931472, %v1944_v36  ;;  %1957 = vlog2.f32 %v1289_v22 }
 0x349   :  { %v1337_v63 = vmul.f32 0.6931472, %v1946_v15 }
 0x34a   :  { %v1384_v8 = vsub.f32 %v2488_v12, %v1347_v39 }
 0x34b   :  { %v1948_v59 = vpop.eup %1947  ;;  %v1379_v14 = vsub.f32 %v2485_v34, %v1337_v63  ;;  %v1293_v48 = vpop.xlane.xlu1 %1292 }
 0x34c   :  { %v1950_v19 = vpop.eup %1949  ;;  %1416 = vst [vmem:[%s2652_s4 + $0xd0] sm:$0xff] %v1384_v8  ;;  %v1343_v41 = vmul.f32 0.6931472, %v1948_v59  ;;  %1959 = vlog2.f32 %v1293_v48 }
 0x34d   :  { %1411 = vst [vmem:[%s2652_s4 + $0xa8] sm:$0xff] %v1379_v14  ;;  %v1349_v6 = vmul.f32 0.6931472, %v1950_v19 }
 0x34e   :  { %v1382_v30 = vsub.f32 %v2493_v60, %v1343_v41 }
 0x34f   :  { %v1952_v18 = vpop.eup %1951  ;;  %v1385_v12 = vsub.f32 %v2496_v58, %v1349_v6 }
 0x350   :  { %v1954_v45 = vpop.eup %1953  ;;  %1414 = vst [vmem:[%s2652_s4 + $0xc0] sm:$0xff] %v1382_v30  ;;  %v1345_v34 = vmul.f32 0.6931472, %v1952_v18 }
 0x351   :  { %1417 = vst [vmem:[%s2652_s4 + $0xd8] sm:$0xff] %v1385_v12  ;;  %v1351_v55 = vmul.f32 0.6931472, %v1954_v45 }
 0x352   :  { %v1383_v33 = vsub.f32 %v2501_v3, %v1345_v34 }
 0x353   :  { %v1386_v35 = vsub.f32 %v2505_v17, %v1351_v55 }
 0x354   :  { %v1956_v13 = vpop.eup %1955  ;;  %1415 = vst [vmem:[%s2652_s4 + $0xc8] sm:$0xff] %v1383_v33 }
 0x355   :  { %v1958_v60 = vpop.eup %1957  ;;  %1418 = vst [vmem:[%s2652_s4 + $0xe0] sm:$0xff] %v1386_v35  ;;  %v1355_v58 = vmul.f32 0.6931472, %v1956_v13 }
 0x356   :  { %v1353_v1 = vmul.f32 0.6931472, %v1958_v60 }
 0x357   :  { %v1388_v42 = vsub.f32 %v2509_v21, %v1355_v58 }
 0x358   :  { %v1387_v40 = vsub.f32 %v2512_v9, %v1353_v1 }
 0x359   :  { %v1960_v29 = vpop.eup %1959  ;;  %1420 = vst [vmem:[%s2652_s4 + $0xf0] sm:$0xff] %v1388_v42 }
 0x35a   :  { %1419 = vst [vmem:[%s2652_s4 + $0xe8] sm:$0xff] %v1387_v40  ;;  %v1357_v3 = vmul.f32 0.6931472, %v1960_v29 }
 0x35c   :  { %v1389_v17 = vsub.f32 %v2517_v7, %v1357_v3 }
 0x35e   :  { %1421 = vst [vmem:[%s2652_s4 + $0xf8] sm:$0xff] %v1389_v17 }

// kernel: graphsage_forward.3
= control target key start
LH: loop header
LB: loop body
LE: loop exit
PB: predicated region body
PF: predicated region fallthrough
CT: control target
= control target key end

     0   :  { %v2222_v1 = vmov 0   ;;  %s2643_s1 = inlined_call_operand.vmem [shape: bf16[384,256], index: 1, kind: input, shape index: {}]   ;;  %s2644_s0 = inlined_call_operand.vmem [shape: bf16[256,384], index: 0, kind: input, shape index: {}]   ;;  %s2645_s2 = inlined_call_operand.vmem [shape: bf16[256,128], index: 2, kind: output, shape index: {0}]   ;;  %s2646_s3 = inlined_call_operand.vmem [shape: bf16[256,128], index: 3, kind: output, shape index: {1}]  }
   0x1   :  { %v2086_v0 = vld [vmem:[%s2643_s1 + $0x74] ss:$8 sps:$4 sm:$0xff]   ;;  %985 = vmatprep.mubr.bf16.mxu1 %v2222_v1  ;;  %v2088_v2 = vld [vmem:[%s2643_s1 + $0x70] ss:$8 sps:$4 sm:$0xff]   ;;  %v2089_v3 = vld [vmem:[%s2643_s1 + $0x64] ss:$8 sps:$4 sm:$0xff]  }
   0x2   :  { %760 = vmatprep.subr.bf16.mxu0 %v2086_v0  ;;  %v2091_v4 = vld [vmem:[%s2643_s1 + $0x60] ss:$8 sps:$4 sm:$0xff]   ;;  %v2092_v5 = vld [vmem:[%s2643_s1 + $0x54] ss:$8 sps:$4 sm:$0xff]   ;;  %v2094_v6 = vld [vmem:[%s2643_s1 + $0x50] ss:$8 sps:$4 sm:$0xff]  }
   0x3   :  { %761 = vmatpush1.bf16.msra.mxu0 %v2088_v2  ;;  %v2095_v7 = vld [vmem:[%s2643_s1 + $0x44] ss:$8 sps:$4 sm:$0xff]   ;;  %v2107_v8 = vld [vmem:[%s2643_s1 + $0x174] ss:$8 sps:$4 sm:$0xff]   ;;  %v2109_v9 = vld [vmem:[%s2643_s1 + $0x170] ss:$8 sps:$4 sm:$0xff]  }
   0x4   :  { %762 = vmatprep.subr.bf16.mxu0 %v2089_v3  ;;  %v2097_v10 = vld [vmem:[%s2643_s1 + $0x40] ss:$8 sps:$4 sm:$0xff]   ;;  %v2098_v11 = vld [vmem:[%s2643_s1 + $0x34] ss:$8 sps:$4 sm:$0xff]   ;;  %953 = vmatprep.subr.bf16.mxu1 %v2107_v8  ;;  %v2113_v12 = vld [vmem:[%s2643_s1 + $0x164] ss:$8 sps:$4 sm:$0xff]  }
   0x5   :  { %954 = vmatpush1.bf16.msra.mxu1 %v2109_v9  ;;  %v2115_v13 = vld [vmem:[%s2643_s1 + $0x160] ss:$8 sps:$4 sm:$0xff]   ;;  %v2100_v14 = vld [vmem:[%s2643_s1 + $0x30] ss:$8 sps:$4 sm:$0xff]   ;;  %v2119_v15 = vld [vmem:[%s2643_s1 + $0x154] ss:$8 sps:$4 sm:$0xff]  }
   0x6   :  { %955 = vmatprep.subr.bf16.mxu1 %v2113_v12  ;;  %v2101_v16 = vld [vmem:[%s2643_s1 + $0x24] ss:$8 sps:$4 sm:$0xff]   ;;  %v2121_v17 = vld [vmem:[%s2643_s1 + $0x150] ss:$8 sps:$4 sm:$0xff]   ;;  %v2103_v19 = vld [vmem:[%s2643_s1 + $0x20] ss:$8 sps:$4 sm:$0xff]  }
   0x7   :  { %763 = vmatpush1.bf16.msra.mxu0 %v2091_v4  ;;  %v2125_v18 = vld [vmem:[%s2643_s1 + $0x144] ss:$8 sps:$4 sm:$0xff]   ;;  %v2104_v20 = vld [vmem:[%s2643_s1 + $0x14] ss:$8 sps:$4 sm:$0xff]   ;;  %v2127_v21 = vld [vmem:[%s2643_s1 + $0x140] ss:$8 sps:$4 sm:$0xff]  }
   0x8   :  { %764 = vmatprep.subr.bf16.mxu0 %v2092_v5  ;;  %v2131_v22 = vld [vmem:[%s2643_s1 + $0x134] ss:$8 sps:$4 sm:$0xff]   ;;  %v2106_v23 = vld [vmem:[%s2643_s1 + $0x10] ss:$8 sps:$4 sm:$0xff]   ;;  %v2110_v24 = vld [vmem:[%s2643_s1 + $0x4] ss:$8 sps:$4 sm:$0xff]  }
   0x9   :  { %956 = vmatpush1.bf16.msra.mxu1 %v2115_v13  ;;  %v2133_v25 = vld [vmem:[%s2643_s1 + $0x130] ss:$8 sps:$4 sm:$0xff]   ;;  %v2137_v26 = vld [vmem:[%s2643_s1 + $0x124] ss:$8 sps:$4 sm:$0xff]   ;;  %v2112_v27 = vld [vmem:[%s2643_s1] ss:$8 sps:$4 sm:$0xff]  }
   0xa   :  { %957 = vmatprep.subr.bf16.mxu1 %v2119_v15  ;;  %v2116_v28 = vld [vmem:[%s2643_s1 + $0xf4] ss:$8 sps:$4 sm:$0xff]   ;;  %v2139_v29 = vld [vmem:[%s2643_s1 + $0x120] ss:$8 sps:$4 sm:$0xff]   ;;  %v2118_v31 = vld [vmem:[%s2643_s1 + $0xf0] ss:$8 sps:$4 sm:$0xff]  }
   0xb   :  { %765 = vmatpush1.bf16.msra.mxu0 %v2094_v6  ;;  %v2143_v30 = vld [vmem:[%s2643_s1 + $0x114] ss:$8 sps:$4 sm:$0xff]   ;;  %v2122_v32 = vld [vmem:[%s2643_s1 + $0xe4] ss:$8 sps:$4 sm:$0xff]   ;;  %v2145_v33 = vld [vmem:[%s2643_s1 + $0x110] ss:$8 sps:$4 sm:$0xff]  }
   0xc   :  { %766 = vmatprep.subr.bf16.mxu0 %v2095_v7  ;;  %v2149_v34 = vld [vmem:[%s2643_s1 + $0x104] ss:$8 sps:$4 sm:$0xff]   ;;  %v2124_v36 = vld [vmem:[%s2643_s1 + $0xe0] ss:$8 sps:$4 sm:$0xff]   ;;  %v2128_v37 = vld [vmem:[%s2643_s1 + $0xd4] ss:$8 sps:$4 sm:$0xff]  }
   0xd   :  { %958 = vmatpush1.bf16.msra.mxu1 %v2121_v17  ;;  %v2161_v35 = vld [vmem:[%s2644_s0 + $0x4] ss:$12 sps:$4 sm:$0xff]   ;;  %v2151_v38 = vld [vmem:[%s2643_s1 + $0x100] ss:$8 sps:$4 sm:$0xff]   ;;  %v2140_v43 = vld [vmem:[%s2643_s1 + $0xb4] ss:$8 sps:$4 sm:$0xff]  }
   0xe   :  { %959 = vmatprep.subr.bf16.mxu1 %v2125_v18  ;;  %792 = vmatprep.mubr.bf16.mxu0 %v2161_v35  ;;  %v2130_v39 = vld [vmem:[%s2643_s1 + $0xd0] ss:$8 sps:$4 sm:$0xff]   ;;  %v2134_v40 = vld [vmem:[%s2643_s1 + $0xc4] ss:$8 sps:$4 sm:$0xff]   ;;  %v2155_v41 = vld [vmem:[%s2644_s0 + $0x8] ss:$12 sps:$4 sm:$0xff]  }
   0xf   :  { %767 = vmatpush1.bf16.msra.mxu0 %v2097_v10  ;;  %v2136_v42 = vld [vmem:[%s2643_s1 + $0xc0] ss:$8 sps:$4 sm:$0xff]   ;;  %v2142_v44 = vld [vmem:[%s2643_s1 + $0xb0] ss:$8 sps:$4 sm:$0xff]   ;;  %v2146_v45 = vld [vmem:[%s2643_s1 + $0xa4] ss:$8 sps:$4 sm:$0xff]  }
  0x10   :  { %768 = vmatprep.subr.bf16.mxu0 %v2098_v11  ;;  %v2162_v46 = vld [vmem:[%s2644_s0 + $0x20] ss:$12 sps:$4 sm:$0xff]   ;;  %v2152_v48 = vld [vmem:[%s2643_s1 + $0x94] ss:$8 sps:$4 sm:$0xff]   ;;  %v2154_v49 = vld [vmem:[%s2643_s1 + $0x90] ss:$8 sps:$4 sm:$0xff]  }
  0x11   :  { %960 = vmatpush1.bf16.msra.mxu1 %v2127_v21  ;;  %v2148_v47 = vld [vmem:[%s2643_s1 + $0xa0] ss:$8 sps:$4 sm:$0xff]   ;;  %v2156_v50 = vld [vmem:[%s2643_s1 + $0x84] ss:$8 sps:$4 sm:$0xff]   ;;  %v2170_v55 = vld [vmem:[%s2644_s0 + $0x50] ss:$12 sps:$4 sm:$0xff]  }
  0x12   :  { %961 = vmatprep.subr.bf16.mxu1 %v2131_v22  ;;  %v2166_v51 = vld [vmem:[%s2644_s0 + $0x38] ss:$12 sps:$4 sm:$0xff]   ;;  %v2158_v52 = vld [vmem:[%s2643_s1 + $0x80] ss:$8 sps:$4 sm:$0xff]   ;;  %v2169_v59 = vld [vmem:[%s2644_s0 + $0x30] ss:$12 sps:$4 sm:$0xff]  }
  0x13   :  { %769 = vmatpush1.bf16.msra.mxu0 %v2100_v14  ;;  %v2159_v53 = vld [vmem:[%s2644_s0] ss:$12 sps:$4 sm:$0xff]   ;;  %v2163_v54 = vld [vmem:[%s2644_s0 + $0x1c] ss:$12 sps:$4 sm:$0xff]   ;;  %v2165_v56 = vld [vmem:[%s2644_s0 + $0x18] ss:$12 sps:$4 sm:$0xff]  }
  0x14   :  { %770 = vmatprep.subr.bf16.mxu0 %v2101_v16  ;;  %v2167_v57 = vld [vmem:[%s2644_s0 + $0x34] ss:$12 sps:$4 sm:$0xff]   ;;  %v2171_v60 = vld [vmem:[%s2644_s0 + $0x4c] ss:$12 sps:$4 sm:$0xff]   ;;  %v2175_v63 = vld [vmem:[%s2644_s0 + $0x64] ss:$12 sps:$4 sm:$0xff]  }
  0x15   :  { %962 = vmatpush1.bf16.msra.mxu1 %v2133_v25  ;;  %v2174_v58 = vld [vmem:[%s2644_s0 + $0x68] ss:$12 sps:$4 sm:$0xff]   ;;  %v2178_v61 = vld [vmem:[%s2644_s0 + $0x80] ss:$12 sps:$4 sm:$0xff]   ;;  %v2182_v0 = vld [vmem:[%s2644_s0 + $0x98] ss:$12 sps:$4 sm:$0xff]  }
  0x16   :  { %963 = vmatprep.subr.bf16.mxu1 %v2137_v26  ;;  %v2173_v62 = vld [vmem:[%s2644_s0 + $0x48] ss:$12 sps:$4 sm:$0xff]   ;;  %v2177_v2 = vld [vmem:[%s2644_s0 + $0x60] ss:$12 sps:$4 sm:$0xff]   ;;  %v2186_v4 = vld [vmem:[%s2644_s0 + $0xb0] ss:$12 sps:$4 sm:$0xff]  }
  0x17   :  { %771 = vmatpush1.bf16.msra.mxu0 %v2103_v19  ;;  %v2179_v3 = vld [vmem:[%s2644_s0 + $0x7c] ss:$12 sps:$4 sm:$0xff]   ;;  %v2181_v5 = vld [vmem:[%s2644_s0 + $0x78] ss:$12 sps:$4 sm:$0xff]   ;;  %v2183_v6 = vld [vmem:[%s2644_s0 + $0x94] ss:$12 sps:$4 sm:$0xff]  }
  0x18   :  { %772 = vmatprep.subr.bf16.mxu0 %v2104_v20  ;;  %v2190_v7 = vld [vmem:[%s2644_s0 + $0xc8] ss:$12 sps:$4 sm:$0xff]   ;;  %v2185_v8 = vld [vmem:[%s2644_s0 + $0x90] ss:$12 sps:$4 sm:$0xff]   ;;  %v2187_v9 = vld [vmem:[%s2644_s0 + $0xac] ss:$12 sps:$4 sm:$0xff]  }
  0x19   :  { %964 = vmatpush1.bf16.msra.mxu1 %v2139_v29  ;;  %v2194_v10 = vld [vmem:[%s2644_s0 + $0xe0] ss:$12 sps:$4 sm:$0xff]   ;;  %v2189_v11 = vld [vmem:[%s2644_s0 + $0xa8] ss:$12 sps:$4 sm:$0xff]   ;;  %v2191_v12 = vld [vmem:[%s2644_s0 + $0xc4] ss:$12 sps:$4 sm:$0xff]  }
  0x1a   :  { %965 = vmatprep.subr.bf16.mxu1 %v2143_v30  ;;  %v2198_v13 = vld [vmem:[%s2644_s0 + $0xf8] ss:$12 sps:$4 sm:$0xff]   ;;  %v2193_v14 = vld [vmem:[%s2644_s0 + $0xc0] ss:$12 sps:$4 sm:$0xff]   ;;  %v2195_v15 = vld [vmem:[%s2644_s0 + $0xdc] ss:$12 sps:$4 sm:$0xff]  }
  0x1b   :  { %773 = vmatpush1.bf16.msra.mxu0 %v2106_v23  ;;  %v2202_v16 = vld [vmem:[%s2644_s0 + $0x110] ss:$12 sps:$4 sm:$0xff]   ;;  %v2197_v17 = vld [vmem:[%s2644_s0 + $0xd8] ss:$12 sps:$4 sm:$0xff]   ;;  %v2199_v18 = vld [vmem:[%s2644_s0 + $0xf4] ss:$12 sps:$4 sm:$0xff]  }
  0x1c   :  { %774 = vmatprep.subr.bf16.mxu0 %v2110_v24  ;;  %v2206_v19 = vld [vmem:[%s2644_s0 + $0x128] ss:$12 sps:$4 sm:$0xff]   ;;  %v2201_v20 = vld [vmem:[%s2644_s0 + $0xf0] ss:$12 sps:$4 sm:$0xff]   ;;  %v2203_v21 = vld [vmem:[%s2644_s0 + $0x10c] ss:$12 sps:$4 sm:$0xff]  }
  0x1d   :  { %966 = vmatpush1.bf16.msra.mxu1 %v2145_v33  ;;  %v2210_v22 = vld [vmem:[%s2644_s0 + $0x140] ss:$12 sps:$4 sm:$0xff]   ;;  %v2205_v23 = vld [vmem:[%s2644_s0 + $0x108] ss:$12 sps:$4 sm:$0xff]   ;;  %v2207_v24 = vld [vmem:[%s2644_s0 + $0x124] ss:$12 sps:$4 sm:$0xff]  }
  0x1e   :  { %967 = vmatprep.subr.bf16.mxu1 %v2149_v34  ;;  %v2214_v25 = vld [vmem:[%s2644_s0 + $0x158] ss:$12 sps:$4 sm:$0xff]   ;;  %v2209_v26 = vld [vmem:[%s2644_s0 + $0x120] ss:$12 sps:$4 sm:$0xff]   ;;  %v2217_v30 = vld [vmem:[%s2644_s0 + $0x150] ss:$12 sps:$4 sm:$0xff]  }
  0x1f   :  { %775 = vmatpush1.bf16.msra.mxu0 %v2112_v27  ;;  %v2211_v27 = vld [vmem:[%s2644_s0 + $0x13c] ss:$12 sps:$4 sm:$0xff]   ;;  %v2213_v29 = vld [vmem:[%s2644_s0 + $0x138] ss:$12 sps:$4 sm:$0xff]  }
  0x20   :  { %776 = vmatprep.subr.bf16.mxu0 %v2116_v28  ;;  %v2218_v28 = vld [vmem:[%s2644_s0 + $0x170] ss:$12 sps:$4 sm:$0xff]  }
  0x21   :  { %968 = vmatpush1.bf16.msra.mxu1 %v2151_v38 }
  0x23   :  { %777 = vmatpush2.bf16.msra.mxu0 %v2118_v31  ;;  %v2219_v31 = vld [vmem:[%s2644_s0 + $0x16c] ss:$12 sps:$4 sm:$0xff]  }
  0x24   :  { %778 = vmatprep.subr.bf16.mxu0 %v2122_v32  ;;  %986 = vmatmul.mubr.bf16.vlgmr.msra.gmra.mxu1 %v2155_v41  ;;  %v2221_v32 = vld [vmem:[%s2644_s0 + $0x168] ss:$12 sps:$4 sm:$0xff]  }
  0x25   :  { %995 = vmatprep.mubr.bf16.mxu1 %v2222_v1 }
  0x27   :  { %779 = vmatpush2.bf16.msra.mxu0 %v2124_v36 }
  0x28   :  { %780 = vmatprep.subr.bf16.mxu0 %v2128_v37 }
  0x2b   :  { %781 = vmatpush2.bf16.msra.mxu0 %v2130_v39 }
  0x2c   :  { %782 = vmatprep.subr.bf16.mxu0 %v2134_v40  ;;  %996 = vmatmul.mubr.bf16.gmra.mxu1 %v2162_v46 }
  0x2d   :  { %1005 = vmatprep.mubr.bf16.mxu1 %v2222_v1 }
  0x2f   :  { %783 = vmatpush2.bf16.msra.mxu0 %v2136_v42 }
  0x30   :  { %784 = vmatprep.subr.bf16.mxu0 %v2140_v43 }
  0x33   :  { %785 = vmatpush2.bf16.msra.mxu0 %v2142_v44 }
  0x34   :  { %786 = vmatprep.subr.bf16.mxu0 %v2146_v45  ;;  %1006 = vmatmul.mubr.bf16.gmra.mxu1 %v2166_v51 }
  0x35   :  { %1015 = vmatprep.mubr.bf16.mxu1 %v2222_v1 }
  0x37   :  { %787 = vmatpush2.bf16.msra.mxu0 %v2148_v47 }
  0x38   :  { %788 = vmatprep.subr.bf16.mxu0 %v2152_v48 }
  0x3b   :  { %789 = vmatpush2.bf16.msra.mxu0 %v2154_v49 }
  0x3c   :  { %790 = vmatprep.subr.bf16.mxu0 %v2156_v50  ;;  %1016 = vmatmul.mubr.bf16.gmra.mxu1 %v2170_v55 }
  0x3d   :  { %1025 = vmatprep.mubr.bf16.mxu1 %v2222_v1 }
  0x3f   :  { %791 = vmatpush2.bf16.msra.mxu0 %v2158_v52 }
  0x42   :  { %793 = vmatmul.mubr.bf16.vlgmr.msra.gmra.mxu0 %v2159_v53 }
  0x43   :  { %802 = vmatprep.mubr.bf16.mxu0 %v2163_v54 }
  0x44   :  { %1026 = vmatmul.mubr.bf16.gmra.mxu1 %v2174_v58 }
  0x45   :  { %1035 = vmatprep.mubr.bf16.mxu1 %v2222_v1 }
  0x4a   :  { %803 = vmatmul.mubr.bf16.gmra.mxu0 %v2165_v56 }
  0x4b   :  { %812 = vmatprep.mubr.bf16.mxu0 %v2167_v57 }
  0x4c   :  { %1036 = vmatmul.mubr.bf16.gmra.mxu1 %v2178_v61 }
  0x4d   :  { %1045 = vmatprep.mubr.bf16.mxu1 %v2222_v1 }
  0x52   :  { %813 = vmatmul.mubr.bf16.gmra.mxu0 %v2169_v59 }
  0x53   :  { %822 = vmatprep.mubr.bf16.mxu0 %v2171_v60 }
  0x54   :  { %1046 = vmatmul.mubr.bf16.gmra.mxu1 %v2182_v0 }
  0x55   :  { %1055 = vmatprep.mubr.bf16.mxu1 %v2222_v1 }
  0x5a   :  { %823 = vmatmul.mubr.bf16.gmra.mxu0 %v2173_v62 }
  0x5b   :  { %832 = vmatprep.mubr.bf16.mxu0 %v2175_v63 }
  0x5c   :  { %1056 = vmatmul.mubr.bf16.gmra.mxu1 %v2186_v4 }
  0x5d   :  { %1065 = vmatprep.mubr.bf16.mxu1 %v2222_v1 }
  0x62   :  { %833 = vmatmul.mubr.bf16.gmra.mxu0 %v2177_v2 }
  0x63   :  { %842 = vmatprep.mubr.bf16.mxu0 %v2179_v3 }
  0x64   :  { %1066 = vmatmul.mubr.bf16.gmra.mxu1 %v2190_v7 }
  0x65   :  { %1075 = vmatprep.mubr.bf16.mxu1 %v2222_v1 }
  0x6a   :  { %843 = vmatmul.mubr.bf16.gmra.mxu0 %v2181_v5 }
  0x6b   :  { %852 = vmatprep.mubr.bf16.mxu0 %v2183_v6 }
  0x6c   :  { %1076 = vmatmul.mubr.bf16.gmra.mxu1 %v2194_v10 }
  0x6d   :  { %1085 = vmatprep.mubr.bf16.mxu1 %v2222_v1 }
  0x72   :  { %853 = vmatmul.mubr.bf16.gmra.mxu0 %v2185_v8 }
  0x73   :  { %862 = vmatprep.mubr.bf16.mxu0 %v2187_v9 }
  0x74   :  { %1086 = vmatmul.mubr.bf16.gmra.mxu1 %v2198_v13 }
  0x75   :  { %1095 = vmatprep.mubr.bf16.mxu1 %v2222_v1 }
  0x7a   :  { %863 = vmatmul.mubr.bf16.gmra.mxu0 %v2189_v11 }
  0x7b   :  { %872 = vmatprep.mubr.bf16.mxu0 %v2191_v12 }
  0x7c   :  { %1096 = vmatmul.mubr.bf16.gmra.mxu1 %v2202_v16 }
  0x7d   :  { %1105 = vmatprep.mubr.bf16.mxu1 %v2222_v1 }
  0x82   :  { %873 = vmatmul.mubr.bf16.gmra.mxu0 %v2193_v14 }
  0x83   :  { %882 = vmatprep.mubr.bf16.mxu0 %v2195_v15 }
  0x84   :  { %1106 = vmatmul.mubr.bf16.gmra.mxu1 %v2206_v19 }
  0x85   :  { %1115 = vmatprep.mubr.bf16.mxu1 %v2222_v1 }
  0x8a   :  { %883 = vmatmul.mubr.bf16.gmra.mxu0 %v2197_v17 }
  0x8b   :  { %892 = vmatprep.mubr.bf16.mxu0 %v2199_v18 }
  0x8c   :  { %1116 = vmatmul.mubr.bf16.gmra.mxu1 %v2210_v22 }
  0x8d   :  { %1125 = vmatprep.mubr.bf16.mxu1 %v2222_v1 }
  0x92   :  { %893 = vmatmul.mubr.bf16.gmra.mxu0 %v2201_v20 }
  0x93   :  { %902 = vmatprep.mubr.bf16.mxu0 %v2203_v21 }
  0x94   :  { %1126 = vmatmul.mubr.bf16.gmra.mxu1 %v2214_v25 }
  0x95   :  { %1135 = vmatprep.mubr.bf16.mxu1 %v2222_v1  ;;  %v2215_v1 = vld [vmem:[%s2644_s0 + $0x154] ss:$12 sps:$4 sm:$0xff]  }
  0x9a   :  { %903 = vmatmul.mubr.bf16.gmra.mxu0 %v2205_v23 }
  0x9b   :  { %912 = vmatprep.mubr.bf16.mxu0 %v2207_v24 }
  0x9c   :  { %1136 = vmatmul.mubr.bf16.gmra.mxu1 %v2218_v28 }
  0xa2   :  { %913 = vmatmul.mubr.bf16.gmra.mxu0 %v2209_v26 }
  0xa3   :  { %922 = vmatprep.mubr.bf16.mxu0 %v2211_v27 }
  0xaa   :  { %923 = vmatmul.mubr.bf16.gmra.mxu0 %v2213_v29 }
  0xab   :  { %932 = vmatprep.mubr.bf16.mxu0 %v2215_v1 }
  0xb2   :  { %933 = vmatmul.mubr.bf16.gmra.mxu0 %v2217_v30 }
  0xb3   :  { %942 = vmatprep.mubr.bf16.mxu0 %v2219_v31 }
  0xba   :  { %943 = vmatmul.mubr.bf16.gmra.mxu0 %v2221_v32 }
  0xe4   :  { %v987_v33 = vpop.f32.mrf.mxu1 }
  0xe6   :  { %v989_v34 = vpop.f32.mrf.mxu1 }
  0xe8   :  { %v991_v35 = vpop.f32.mrf.mxu1 }
  0xea   :  { %v993_v36 = vpop.f32.mrf.mxu1 }
  0xec   :  { %v997_v37 = vpop.f32.mrf.mxu1 }
  0xee   :  { %v999_v38 = vpop.f32.mrf.mxu1 }
  0xf0   :  { %v1001_v39 = vpop.f32.mrf.mxu1 }
  0xf2   :  { %v1003_v40 = vpop.f32.mrf.mxu1 }
  0xf4   :  { %v1007_v41 = vpop.f32.mrf.mxu1 }
  0xf6   :  { %v1009_v42 = vpop.f32.mrf.mxu1 }
  0xf8   :  { %v1011_v43 = vpop.f32.mrf.mxu1 }
  0xfa   :  { %v1013_v45 = vpop.f32.mrf.mxu1 }
  0xfc   :  { %v1017_v47 = vpop.f32.mrf.mxu1 }
  0xfe   :  { %v1019_v49 = vpop.f32.mrf.mxu1 }
 0x100   :  { %v1021_v53 = vpop.f32.mrf.mxu1 }
 0x102   :  { %v794_v44 = vpop.f32.mrf.mxu0  ;;  %v1023_v58 = vpop.f32.mrf.mxu1 }
 0x103   :  { %v988_v50 = vadd.f32 %v987_v33, %v794_v44 }
 0x104   :  { %v796_v46 = vpop.f32.mrf.mxu0  ;;  %v1027_v61 = vpop.f32.mrf.mxu1 }
 0x105   :  { %v990_v54 = vadd.f32 %v989_v34, %v796_v46 }
 0x106   :  { %v798_v48 = vpop.f32.mrf.mxu0  ;;  %v1029_v63 = vpop.f32.mrf.mxu1 }
 0x107   :  { %v992_v51 = vadd.f32 %v991_v35, %v798_v48 }
 0x108   :  { %v800_v52 = vpop.f32.mrf.mxu0  ;;  %v1031_v4 = vpop.f32.mrf.mxu1 }
 0x109   :  { %v1898_v55 = vpack.c.bf16 %v992_v51, %v988_v50  ;;  %v994_v56 = vadd.f32 %v993_v36, %v800_v52 }
 0x10a   :  { %v804_v57 = vpop.f32.mrf.mxu0  ;;  %v1033_v9 = vpop.f32.mrf.mxu1 }
 0x10b   :  { %1899 = vst [vmem:[%s2645_s2] sm:$0xff] %v1898_v55   ;;  %v1978_v59 = vpack.c.bf16 %v994_v56, %v990_v54  ;;  %v998_v0 = vadd.f32 %v997_v37, %v804_v57 }
 0x10c   :  { %v806_v60 = vpop.f32.mrf.mxu0  ;;  %v1037_v12 = vpop.f32.mrf.mxu1 }
 0x10d   :  { %1979 = vst [vmem:[%s2646_s3] sm:$0xff] %v1978_v59   ;;  %v1000_v5 = vadd.f32 %v999_v38, %v806_v60 }
 0x10e   :  { %v808_v62 = vpop.f32.mrf.mxu0  ;;  %v1039_v14 = vpop.f32.mrf.mxu1 }
 0x10f   :  { %v1002_v2 = vadd.f32 %v1001_v39, %v808_v62 }
 0x110   :  { %v810_v3 = vpop.f32.mrf.mxu0  ;;  %v1041_v18 = vpop.f32.mrf.mxu1 }
 0x111   :  { %v1903_v6 = vpack.c.bf16 %v1002_v2, %v998_v0  ;;  %v1004_v7 = vadd.f32 %v1003_v40, %v810_v3 }
 0x112   :  { %v814_v8 = vpop.f32.mrf.mxu0  ;;  %v1043_v23 = vpop.f32.mrf.mxu1 }
 0x113   :  { %2055 = vst [vmem:[%s2645_s2 + $0x8] sm:$0xff] %v1903_v6   ;;  %v1983_v10 = vpack.c.bf16 %v1004_v7, %v1000_v5  ;;  %v1008_v15 = vadd.f32 %v1007_v41, %v814_v8 }
 0x114   :  { %v816_v11 = vpop.f32.mrf.mxu0  ;;  %v1047_v26 = vpop.f32.mrf.mxu1 }
 0x115   :  { %2070 = vst [vmem:[%s2646_s3 + $0x8] sm:$0xff] %v1983_v10   ;;  %v1010_v19 = vadd.f32 %v1009_v42, %v816_v11 }
 0x116   :  { %v818_v13 = vpop.f32.mrf.mxu0  ;;  %v1049_v28 = vpop.f32.mrf.mxu1 }
 0x117   :  { %v1012_v16 = vadd.f32 %v1011_v43, %v818_v13 }
 0x118   :  { %v820_v17 = vpop.f32.mrf.mxu0  ;;  %v1051_v31 = vpop.f32.mrf.mxu1 }
 0x119   :  { %v1908_v20 = vpack.c.bf16 %v1012_v16, %v1008_v15  ;;  %v1014_v21 = vadd.f32 %v1013_v45, %v820_v17 }
 0x11a   :  { %v824_v22 = vpop.f32.mrf.mxu0  ;;  %v1053_v36 = vpop.f32.mrf.mxu1 }
 0x11b   :  { %2056 = vst [vmem:[%s2645_s2 + $0x10] sm:$0xff] %v1908_v20   ;;  %v1988_v24 = vpack.c.bf16 %v1014_v21, %v1010_v19  ;;  %v1018_v29 = vadd.f32 %v1017_v47, %v824_v22 }
 0x11c   :  { %v826_v25 = vpop.f32.mrf.mxu0  ;;  %v1057_v39 = vpop.f32.mrf.mxu1 }
 0x11d   :  { %2071 = vst [vmem:[%s2646_s3 + $0x10] sm:$0xff] %v1988_v24   ;;  %v1020_v32 = vadd.f32 %v1019_v49, %v826_v25 }
 0x11e   :  { %v828_v27 = vpop.f32.mrf.mxu0  ;;  %v1059_v41 = vpop.f32.mrf.mxu1 }
 0x11f   :  { %v1022_v1 = vadd.f32 %v1021_v53, %v828_v27 }
 0x120   :  { %v830_v30 = vpop.f32.mrf.mxu0  ;;  %v1061_v45 = vpop.f32.mrf.mxu1 }
 0x121   :  { %v1913_v33 = vpack.c.bf16 %v1022_v1, %v1018_v29  ;;  %v1024_v34 = vadd.f32 %v1023_v58, %v830_v30 }
 0x122   :  { %v834_v35 = vpop.f32.mrf.mxu0  ;;  %v1063_v50 = vpop.f32.mrf.mxu1 }
 0x123   :  { %2057 = vst [vmem:[%s2645_s2 + $0x18] sm:$0xff] %v1913_v33   ;;  %v1993_v37 = vpack.c.bf16 %v1024_v34, %v1020_v32  ;;  %v1028_v42 = vadd.f32 %v1027_v61, %v834_v35 }
 0x124   :  { %v836_v38 = vpop.f32.mrf.mxu0  ;;  %v1067_v53 = vpop.f32.mrf.mxu1 }
 0x125   :  { %2072 = vst [vmem:[%s2646_s3 + $0x18] sm:$0xff] %v1993_v37   ;;  %v1030_v46 = vadd.f32 %v1029_v63, %v836_v38 }
 0x126   :  { %v838_v40 = vpop.f32.mrf.mxu0  ;;  %v1069_v55 = vpop.f32.mrf.mxu1 }
 0x127   :  { %v1032_v43 = vadd.f32 %v1031_v4, %v838_v40 }
 0x128   :  { %v840_v44 = vpop.f32.mrf.mxu0  ;;  %v1071_v59 = vpop.f32.mrf.mxu1 }
 0x129   :  { %v1918_v47 = vpack.c.bf16 %v1032_v43, %v1028_v42  ;;  %v1034_v48 = vadd.f32 %v1033_v9, %v840_v44 }
 0x12a   :  { %v844_v49 = vpop.f32.mrf.mxu0  ;;  %v1073_v0 = vpop.f32.mrf.mxu1 }
 0x12b   :  { %2058 = vst [vmem:[%s2645_s2 + $0x20] sm:$0xff] %v1918_v47   ;;  %v1998_v51 = vpack.c.bf16 %v1034_v48, %v1030_v46  ;;  %v1038_v56 = vadd.f32 %v1037_v12, %v844_v49 }
 0x12c   :  { %v846_v52 = vpop.f32.mrf.mxu0  ;;  %v1077_v4 = vpop.f32.mrf.mxu1 }
 0x12d   :  { %2073 = vst [vmem:[%s2646_s3 + $0x20] sm:$0xff] %v1998_v51   ;;  %v1040_v60 = vadd.f32 %v1039_v14, %v846_v52 }
 0x12e   :  { %v848_v54 = vpop.f32.mrf.mxu0  ;;  %v1079_v6 = vpop.f32.mrf.mxu1 }
 0x12f   :  { %v1042_v57 = vadd.f32 %v1041_v18, %v848_v54 }
 0x130   :  { %v850_v58 = vpop.f32.mrf.mxu0  ;;  %v1081_v10 = vpop.f32.mrf.mxu1 }
 0x131   :  { %v1923_v61 = vpack.c.bf16 %v1042_v57, %v1038_v56  ;;  %v1044_v62 = vadd.f32 %v1043_v23, %v850_v58 }
 0x132   :  { %v854_v63 = vpop.f32.mrf.mxu0  ;;  %v1083_v15 = vpop.f32.mrf.mxu1 }
 0x133   :  { %2059 = vst [vmem:[%s2645_s2 + $0x28] sm:$0xff] %v1923_v61   ;;  %v2003_v2 = vpack.c.bf16 %v1044_v62, %v1040_v60  ;;  %v1048_v7 = vadd.f32 %v1047_v26, %v854_v63 }
 0x134   :  { %v856_v3 = vpop.f32.mrf.mxu0  ;;  %v1087_v18 = vpop.f32.mrf.mxu1 }
 0x135   :  { %2074 = vst [vmem:[%s2646_s3 + $0x28] sm:$0xff] %v2003_v2   ;;  %v1050_v11 = vadd.f32 %v1049_v28, %v856_v3 }
 0x136   :  { %v858_v5 = vpop.f32.mrf.mxu0  ;;  %v1089_v20 = vpop.f32.mrf.mxu1 }
 0x137   :  { %v1052_v8 = vadd.f32 %v1051_v31, %v858_v5 }
 0x138   :  { %v860_v9 = vpop.f32.mrf.mxu0  ;;  %v1091_v24 = vpop.f32.mrf.mxu1 }
 0x139   :  { %v1928_v12 = vpack.c.bf16 %v1052_v8, %v1048_v7  ;;  %v1054_v13 = vadd.f32 %v1053_v36, %v860_v9 }
 0x13a   :  { %v864_v14 = vpop.f32.mrf.mxu0  ;;  %v1093_v29 = vpop.f32.mrf.mxu1 }
 0x13b   :  { %2060 = vst [vmem:[%s2645_s2 + $0x30] sm:$0xff] %v1928_v12   ;;  %v2008_v16 = vpack.c.bf16 %v1054_v13, %v1050_v11  ;;  %v1058_v21 = vadd.f32 %v1057_v39, %v864_v14 }
 0x13c   :  { %v866_v17 = vpop.f32.mrf.mxu0  ;;  %v1097_v31 = vpop.f32.mrf.mxu1 }
 0x13d   :  { %2075 = vst [vmem:[%s2646_s3 + $0x30] sm:$0xff] %v2008_v16   ;;  %v1060_v25 = vadd.f32 %v1059_v41, %v866_v17 }
 0x13e   :  { %v868_v19 = vpop.f32.mrf.mxu0  ;;  %v1099_v33 = vpop.f32.mrf.mxu1 }
 0x13f   :  { %v1062_v22 = vadd.f32 %v1061_v45, %v868_v19 }
 0x140   :  { %v870_v23 = vpop.f32.mrf.mxu0  ;;  %v1101_v37 = vpop.f32.mrf.mxu1 }
 0x141   :  { %v1933_v26 = vpack.c.bf16 %v1062_v22, %v1058_v21  ;;  %v1064_v27 = vadd.f32 %v1063_v50, %v870_v23 }
 0x142   :  { %v874_v28 = vpop.f32.mrf.mxu0  ;;  %v1103_v42 = vpop.f32.mrf.mxu1 }
 0x143   :  { %2061 = vst [vmem:[%s2645_s2 + $0x38] sm:$0xff] %v1933_v26   ;;  %v2013_v1 = vpack.c.bf16 %v1064_v27, %v1060_v25  ;;  %v1068_v34 = vadd.f32 %v1067_v53, %v874_v28 }
 0x144   :  { %v876_v30 = vpop.f32.mrf.mxu0  ;;  %v1107_v45 = vpop.f32.mrf.mxu1 }
 0x145   :  { %2076 = vst [vmem:[%s2646_s3 + $0x38] sm:$0xff] %v2013_v1   ;;  %v1070_v38 = vadd.f32 %v1069_v55, %v876_v30 }
 0x146   :  { %v878_v32 = vpop.f32.mrf.mxu0  ;;  %v1109_v47 = vpop.f32.mrf.mxu1 }
 0x147   :  { %v1072_v35 = vadd.f32 %v1071_v59, %v878_v32 }
 0x148   :  { %v880_v36 = vpop.f32.mrf.mxu0  ;;  %v1111_v51 = vpop.f32.mrf.mxu1 }
 0x149   :  { %v1938_v39 = vpack.c.bf16 %v1072_v35, %v1068_v34  ;;  %v1074_v40 = vadd.f32 %v1073_v0, %v880_v36 }
 0x14a   :  { %v884_v41 = vpop.f32.mrf.mxu0  ;;  %v1113_v56 = vpop.f32.mrf.mxu1 }
 0x14b   :  { %2062 = vst [vmem:[%s2645_s2 + $0x40] sm:$0xff] %v1938_v39   ;;  %v2018_v43 = vpack.c.bf16 %v1074_v40, %v1070_v38  ;;  %v1078_v48 = vadd.f32 %v1077_v4, %v884_v41 }
 0x14c   :  { %v886_v44 = vpop.f32.mrf.mxu0  ;;  %v1117_v59 = vpop.f32.mrf.mxu1 }
 0x14d   :  { %2077 = vst [vmem:[%s2646_s3 + $0x40] sm:$0xff] %v2018_v43   ;;  %v1080_v52 = vadd.f32 %v1079_v6, %v886_v44 }
 0x14e   :  { %v888_v46 = vpop.f32.mrf.mxu0  ;;  %v1119_v0 = vpop.f32.mrf.mxu1 }
 0x14f   :  { %v1082_v49 = vadd.f32 %v1081_v10, %v888_v46 }
 0x150   :  { %v890_v50 = vpop.f32.mrf.mxu0  ;;  %v1121_v8 = vpop.f32.mrf.mxu1 }
 0x151   :  { %v1943_v53 = vpack.c.bf16 %v1082_v49, %v1078_v48  ;;  %v1084_v54 = vadd.f32 %v1083_v15, %v890_v50 }
 0x152   :  { %v894_v55 = vpop.f32.mrf.mxu0  ;;  %v1123_v13 = vpop.f32.mrf.mxu1 }
 0x153   :  { %2063 = vst [vmem:[%s2645_s2 + $0x48] sm:$0xff] %v1943_v53   ;;  %v2023_v57 = vpack.c.bf16 %v1084_v54, %v1080_v52  ;;  %v1088_v61 = vadd.f32 %v1087_v18, %v894_v55 }
 0x154   :  { %v896_v58 = vpop.f32.mrf.mxu0 }
 0x155   :  { %2078 = vst [vmem:[%s2646_s3 + $0x48] sm:$0xff] %v2023_v57   ;;  %v1090_v2 = vadd.f32 %v1089_v20, %v896_v58  ;;  %v1127_v20 = vpop.f32.mrf.mxu1 }
 0x156   :  { %v898_v60 = vpop.f32.mrf.mxu0 }
 0x157   :  { %v1092_v62 = vadd.f32 %v1091_v24, %v898_v60  ;;  %v1129_v25 = vpop.f32.mrf.mxu1 }
 0x158   :  { %v900_v63 = vpop.f32.mrf.mxu0 }
 0x159   :  { %v1948_v3 = vpack.c.bf16 %v1092_v62, %v1088_v61  ;;  %v1094_v4 = vadd.f32 %v1093_v29, %v900_v63 }
 0x15a   :  { %v904_v5 = vpop.f32.mrf.mxu0 }
 0x15b   :  { %2064 = vst [vmem:[%s2645_s2 + $0x50] sm:$0xff] %v1948_v3   ;;  %v2028_v6 = vpack.c.bf16 %v1094_v4, %v1090_v2  ;;  %v1098_v10 = vadd.f32 %v1097_v31, %v904_v5  ;;  %v1131_v31 = vpop.f32.mrf.mxu1 }
 0x15c   :  { %v906_v7 = vpop.f32.mrf.mxu0 }
 0x15d   :  { %2079 = vst [vmem:[%s2646_s3 + $0x50] sm:$0xff] %v2028_v6   ;;  %v1100_v14 = vadd.f32 %v1099_v33, %v906_v7  ;;  %v1133_v36 = vpop.f32.mrf.mxu1 }
 0x15e   :  { %v908_v9 = vpop.f32.mrf.mxu0 }
 0x15f   :  { %v1102_v11 = vadd.f32 %v1101_v37, %v908_v9  ;;  %v1137_v43 = vpop.f32.mrf.mxu1 }
 0x160   :  { %v910_v12 = vpop.f32.mrf.mxu0 }
 0x161   :  { %v1953_v15 = vpack.c.bf16 %v1102_v11, %v1098_v10  ;;  %v1104_v16 = vadd.f32 %v1103_v42, %v910_v12 }
 0x162   :  { %v914_v17 = vpop.f32.mrf.mxu0 }
 0x163   :  { %2065 = vst [vmem:[%s2645_s2 + $0x58] sm:$0xff] %v1953_v15   ;;  %v2033_v18 = vpack.c.bf16 %v1104_v16, %v1100_v14  ;;  %v1108_v22 = vadd.f32 %v1107_v45, %v914_v17 }
 0x164   :  { %v916_v19 = vpop.f32.mrf.mxu0 }
 0x165   :  { %2080 = vst [vmem:[%s2646_s3 + $0x58] sm:$0xff] %v2033_v18   ;;  %v1110_v26 = vadd.f32 %v1109_v47, %v916_v19  ;;  %v1139_v47 = vpop.f32.mrf.mxu1 }
 0x166   :  { %v918_v21 = vpop.f32.mrf.mxu0 }
 0x167   :  { %v1112_v23 = vadd.f32 %v1111_v51, %v918_v21  ;;  %v1141_v54 = vpop.f32.mrf.mxu1 }
 0x168   :  { %v920_v24 = vpop.f32.mrf.mxu0 }
 0x169   :  { %v1958_v27 = vpack.c.bf16 %v1112_v23, %v1108_v22  ;;  %v1114_v28 = vadd.f32 %v1113_v56, %v920_v24 }
 0x16a   :  { %v924_v29 = vpop.f32.mrf.mxu0 }
 0x16b   :  { %2066 = vst [vmem:[%s2645_s2 + $0x60] sm:$0xff] %v1958_v27   ;;  %v2038_v1 = vpack.c.bf16 %v1114_v28, %v1110_v26  ;;  %v1118_v33 = vadd.f32 %v1117_v59, %v924_v29  ;;  %v1143_v59 = vpop.f32.mrf.mxu1 }
 0x16c   :  { %v926_v30 = vpop.f32.mrf.mxu0 }
 0x16d   :  { %2081 = vst [vmem:[%s2646_s3 + $0x60] sm:$0xff] %v2038_v1   ;;  %v1120_v37 = vadd.f32 %v1119_v0, %v926_v30 }
 0x16e   :  { %v928_v32 = vpop.f32.mrf.mxu0 }
 0x16f   :  { %v1122_v34 = vadd.f32 %v1121_v8, %v928_v32 }
 0x170   :  { %v930_v35 = vpop.f32.mrf.mxu0 }
 0x171   :  { %v1963_v38 = vpack.c.bf16 %v1122_v34, %v1118_v33  ;;  %v1124_v39 = vadd.f32 %v1123_v13, %v930_v35 }
 0x172   :  { %v934_v40 = vpop.f32.mrf.mxu0 }
 0x173   :  { %2067 = vst [vmem:[%s2645_s2 + $0x68] sm:$0xff] %v1963_v38   ;;  %v2043_v41 = vpack.c.bf16 %v1124_v39, %v1120_v37  ;;  %v1128_v45 = vadd.f32 %v1127_v20, %v934_v40 }
 0x174   :  { %v936_v42 = vpop.f32.mrf.mxu0 }
 0x175   :  { %2082 = vst [vmem:[%s2646_s3 + $0x68] sm:$0xff] %v2043_v41   ;;  %v1130_v49 = vadd.f32 %v1129_v25, %v936_v42 }
 0x176   :  { %v938_v44 = vpop.f32.mrf.mxu0 }
 0x177   :  { %v1132_v46 = vadd.f32 %v1131_v31, %v938_v44 }
 0x178   :  { %v940_v48 = vpop.f32.mrf.mxu0 }
 0x179   :  { %v1968_v50 = vpack.c.bf16 %v1132_v46, %v1128_v45  ;;  %v1134_v51 = vadd.f32 %v1133_v36, %v940_v48 }
 0x17a   :  { %v944_v52 = vpop.f32.mrf.mxu0 }
 0x17b   :  { %2068 = vst [vmem:[%s2645_s2 + $0x70] sm:$0xff] %v1968_v50   ;;  %v2048_v53 = vpack.c.bf16 %v1134_v51, %v1130_v49  ;;  %v1138_v57 = vadd.f32 %v1137_v43, %v944_v52 }
 0x17c   :  { %v946_v55 = vpop.f32.mrf.mxu0 }
 0x17d   :  { %2083 = vst [vmem:[%s2646_s3 + $0x70] sm:$0xff] %v2048_v53   ;;  %v1140_v61 = vadd.f32 %v1139_v47, %v946_v55 }
 0x17e   :  { %v948_v56 = vpop.f32.mrf.mxu0 }
 0x17f   :  { %v1142_v58 = vadd.f32 %v1141_v54, %v948_v56 }
 0x180   :  { %v950_v60 = vpop.f32.mrf.mxu0 }
 0x181   :  { %v1973_v62 = vpack.c.bf16 %v1142_v58, %v1138_v57  ;;  %v1144_v63 = vadd.f32 %v1143_v59, %v950_v60 }
 0x183   :  { %2069 = vst [vmem:[%s2645_s2 + $0x78] sm:$0xff] %v1973_v62   ;;  %v2053_v0 = vpack.c.bf16 %v1144_v63, %v1140_v61 }
 0x185   :  { %2084 = vst [vmem:[%s2646_s3 + $0x78] sm:$0xff] %v2053_v0  }

</bundles_post_ra>
